<compile_context>
chip_gen: v7x
topology: tpu7x:2x2x1
jax: 0.10.0
libtpu: 0.0.40
codegen_flags: <defaults>
</compile_context>

<pallas_src>
import functools

import jax
import jax.numpy as jnp
from jax.experimental import pallas as pl
from jax.experimental.pallas import tpu as pltpu


def _bottle2neck_kernel(
    ws_ref,                                   # SMEM (nums, scale) weighted-sum coeffs
    x_ref,                                    # (1, Cin, L) f32, L = n_seg*Tp
    w1_ref, b1_ref, s1_ref, t1_ref,           # conv1 (f32) + bias / bn1 (folded)
    wc_ref, bc_ref, sc_ref, tc_ref,           # branch convs (f32 im2col) + bias / bn
    w3_ref, b3_ref, s3_ref, t3_ref,           # conv3 (bf16, unsplit) + bias / bn3
    wse1_ref, bse1_ref, wse2_ref, bse2_ref,   # SE module (tiny f32 matvecs)
    o_ref,                                    # (1, planes, L)
    slab_ref,                                 # VMEM (width, scale*L) f32 slot slab
    mid_ref,                                  # VMEM (C1, L) bf16 conv3 input
    *, width, scale, kernel_size, dilation, t_valid, tp, n_seg,
):
    nums = scale - 1
    pad = (kernel_size // 2) * dilation
    L = n_seg * tp
    planes = w3_ref.shape[0]
    f32 = jnp.float32
    bf16 = jnp.bfloat16

    x = x_ref[0]                                            # (Cin, L) f32

    # ---- conv1 (1x1) -> ReLU -> BN1 (folded), all f32 ----------------------
    h = jnp.dot(w1_ref[...], x, preferred_element_type=f32)
    h = jnp.maximum(h + b1_ref[...], 0.0) * s1_ref[...] + t1_ref[...]

    # Narrow tail zeroing: columns [t_valid, tp) of every tp-period must be 0
    # so dilated taps (and roll wrap-around) read zeros across period/slot
    # boundaries.  Only these small bands are zeroed (no full-slab mask pass).
    tail = tp - t_valid
    ztail = jnp.zeros((width, tail), f32) if tail > 0 else None

    def zero_tails(col0, n_periods):
        if tail == 0:
            return
        for m in range(n_periods):
            c0 = col0 + m * tp + t_valid
            slab_ref[:, c0:c0 + tail] = ztail

    # Slot 0 = spx[nums]; it is also conv3's last input chunk.
    last = h[nums * width:(nums + 1) * width, :]
    slab_ref[:, 0:L] = last
    zero_tails(0, n_seg)
    mid_ref[nums * width:(nums + 1) * width, :] = last.astype(bf16)

    # ---- Res2Net branches ---------------------------------------------------
    for i in range(nums):
        n = i + 2                                           # live slots
        ncols = n * L

        # Append new input slot spx[i] in place.
        slab_ref[:, (n - 1) * L:n * L] = h[i * width:(i + 1) * width, :]
        zero_tails((n - 1) * L, n_seg)

        # k shifted copies via static XLU rolls (shift = pad - j*dilation);
        # wrap-around columns land in already-zeroed tail bands.
        S = slab_ref[:, 0:ncols]                            # (width, ncols) f32
        parts = []
        for j in range(kernel_size):
            sh = (pad - j * dilation) % ncols
            parts.append(pltpu.roll(S, shift=sh, axis=1) if sh else S)
        im2col = jnp.concatenate(parts, axis=0) if kernel_size > 1 else parts[0]

        # One f32 MXU matmul covering all taps and all slots of this branch.
        y = jnp.dot(wc_ref[i], im2col, preferred_element_type=f32)
        y = jnp.maximum(y + bc_ref[i], 0.0) * sc_ref[i] + tc_ref[i]

        # Branch output becomes the next branch's input slots.
        slab_ref[:, 0:ncols] = y
        zero_tails(0, n * n_seg)

        # Weighted sum over slots -> conv3 input chunk i (bf16 in mid scratch).
        sp_s = y[:, 0:L] * ws_ref[i, 0]
        for s in range(1, n):
            sp_s = sp_s + y[:, s * L:(s + 1) * L] * ws_ref[i, s]
        mid_ref[i * width:(i + 1) * width, :] = sp_s.astype(bf16)

    # ---- conv3: ONE (planes, C1) x (C1, L) bf16 matmul -> ReLU -> BN3 ------
    acc3 = jnp.dot(w3_ref[...], mid_ref[...], preferred_element_type=f32)
    out3 = jnp.maximum(acc3 + b3_ref[...], 0.0) * s3_ref[...] + t3_ref[...]

    # ---- SE module: masked per-segment mean -> matvecs -> sigmoid gate -----
    tcols = jax.lax.broadcasted_iota(jnp.int32, (1, tp), 1)
    keep = (tcols < t_valid).astype(f32)                    # (1, tp)
    inv_t = 1.0 / t_valid
    cols = []
    for s in range(n_seg):
        seg = out3[:, s * tp:(s + 1) * tp]
        cols.append(jnp.sum(seg * keep, axis=1, keepdims=True) * inv_t)
    m = jnp.concatenate(cols, axis=1) if n_seg > 1 else cols[0]   # (planes, n_seg)

    a = jnp.maximum(jnp.dot(wse1_ref[...], m, preferred_element_type=f32)
                    + bse1_ref[...], 0.0)
    z = jnp.dot(wse2_ref[...], a, preferred_element_type=f32) + bse2_ref[...]
    g = pl.reciprocal(1.0 + jnp.exp(-z), approx=True)       # sigmoid (EUP)

    # ---- SE gate + residual, per batch segment (aligned stores) ------------
    for s in range(n_seg):
        sl = slice(s * tp, (s + 1) * tp)
        o_ref[0, :, sl] = (out3[:, sl] * g[:, s:s + 1] + x[:, sl]).astype(o_ref.dtype)


def _pick_pack(B, max_pack=4):
    """Largest batch-pack factor that keeps at least 2 grid steps (megacore)."""
    best = 1
    for c in range(2, max_pack + 1):
        if B % c == 0 and B // c >= 2:
            best = c
    return best


def bottle2neck_pallas(x, p, *, kernel_size, dilation, scale, max_pack=4):
    B, Cin, T = x.shape
    planes = p['w3'].shape[0]
    width = planes // scale
    C1 = width * scale
    nums = scale - 1
    bott = p['wse1'].shape[0]
    pad = (kernel_size // 2) * dilation
    assert Cin == planes, "residual add requires inplanes == planes"

    # Lane-dense time axis: pad T up to a multiple of 128 with >= `pad` slack
    # so dilated taps / roll wrap-around only ever read zeroed columns.
    Tp = ((T + pad + 127) // 128) * 128
    assert Tp >= T + pad

    n_seg = _pick_pack(B, max_pack)
    G = B // n_seg
    L = n_seg * Tp

    xp = jnp.pad(x, ((0, 0), (0, 0), (0, Tp - T))) if Tp != T else x
    # Pack n_seg batch elements along the lane/time axis: (G, Cin, n_seg*Tp).
    xp = xp.reshape(G, n_seg, Cin, Tp).transpose(0, 2, 1, 3).reshape(G, Cin, L)

    f32, bf16 = jnp.float32, jnp.bfloat16
    col = lambda v: v.reshape(-1, 1).astype(f32)
    bcol = lambda v: v.reshape(nums, width, 1).astype(f32)

    # Branch conv weights flattened to im2col layout (tap-major contraction).
    wcf = jnp.transpose(p['wc'], (0, 2, 1, 3)).reshape(
        nums, width, kernel_size * width).astype(f32)
    w1f = p['w1'].astype(f32)
    w3b = p['w3'].astype(bf16)                               # (planes, C1) unsplit

    def full(shape):
        return pl.BlockSpec(shape, lambda b, _n=len(shape): (0,) * _n)

    in_specs = [
        pl.BlockSpec(memory_space=pltpu.MemorySpace.SMEM),              # ws
        pl.BlockSpec((1, Cin, L), lambda b: (b, 0, 0)),                 # x
        full((C1, Cin)), full((C1, 1)), full((C1, 1)), full((C1, 1)),
        full((nums, width, kernel_size * width)),
        full((nums, width, 1)), full((nums, width, 1)), full((nums, width, 1)),
        full((planes, C1)), full((planes, 1)), full((planes, 1)), full((planes, 1)),
        full((bott, planes)), full((bott, 1)),
        full((planes, bott)), full((planes, 1)),
    ]
    out_spec = pl.BlockSpec((1, planes, L), lambda b: (b, 0, 0))

    scratch = [pltpu.VMEM((width, scale * L), f32),          # slot slab
               pltpu.VMEM((C1, L), bf16)]                    # conv3 input ("mid")

    # Rough per-step VMEM budget (double-buffered x/out blocks, scratch, temps).
    # Note v7x has 64 MiB physical VMEM (32 MiB scoped default); v5e's scoped
    # default is only 16 MiB, so we always raise the limit explicitly.
    est = L * 4 * (2 * (Cin + planes)                        # x/out (double-buffered)
                   + (3 + kernel_size) * width * scale       # slab + im2col + y
                   + 2 * planes + 2 * C1)                    # h, acc3/out3, mid
    vmem_limit = int(max(32 * 2 ** 20, min(2 * est, 100 * 2 ** 20)))

    kern = functools.partial(_bottle2neck_kernel, width=width, scale=scale,
                             kernel_size=kernel_size, dilation=dilation,
                             t_valid=T, tp=Tp, n_seg=n_seg)

    fn = pl.pallas_call(
        kern,
        out_shape=jax.ShapeDtypeStruct((G, planes, L), x.dtype),
        grid=(G,),
        in_specs=in_specs,
        out_specs=out_spec,
        scratch_shapes=scratch,
        compiler_params=pltpu.CompilerParams(
            dimension_semantics=("parallel",),
            vmem_limit_bytes=vmem_limit),
    )
    out = fn(p['ws'], xp,
             w1f, col(p['b1']), col(p['s1']), col(p['t1']),
             wcf, bcol(p['bc']), bcol(p['sc']), bcol(p['tc']),
             w3b, col(p['b3']), col(p['s3']), col(p['t3']),
             p['wse1'].astype(f32), col(p['bse1']),
             p['wse2'].astype(f32), col(p['bse2']))

    # Unpack batch segments and drop time padding.
    out = out.reshape(G, planes, n_seg, Tp).transpose(0, 2, 1, 3).reshape(B, planes, Tp)
    return out[:, :, :T]


# ---------------- parameter init (deterministic, synthetic) -----------------
def init_params(key, inplanes, planes, kernel_size, dilation, scale, SE_ratio):
    width = planes // scale
    C1 = width * scale
    nums = scale - 1
    bott = planes // SE_ratio
    kit = iter(jax.random.split(key, 32))

    def rnd(shape, s=0.1):
        return (s * jax.random.normal(next(kit), shape)).astype(jnp.float32)

    def bn_fold(shape):
        gamma = 1.0 + rnd(shape)
        beta = rnd(shape)
        mean = rnd(shape)
        var = 1.0 + 0.1 * jnp.abs(jax.random.normal(next(kit), shape))
        s = gamma / jnp.sqrt(var + 1e-5)
        t = beta - mean * s
        return s.astype(jnp.float32), t.astype(jnp.float32)

    p = {}
    p['w1'] = rnd((C1, inplanes)); p['b1'] = rnd((C1,))
    p['s1'], p['t1'] = bn_fold((C1,))
    p['wc'] = rnd((nums, kernel_size, width, width))      # [branch, tap, co, ci]
    p['bc'] = rnd((nums, width))
    p['sc'], p['tc'] = bn_fold((nums, width))
    p['w3'] = rnd((planes, C1)); p['b3'] = rnd((planes,))
    p['s3'], p['t3'] = bn_fold((planes,))
    p['wse1'] = rnd((bott, planes)); p['bse1'] = rnd((bott,))
    p['wse2'] = rnd((planes, bott)); p['bse2'] = rnd((planes,))

    ws = jnp.zeros((nums, scale), jnp.float32)
    for i in range(nums):
        ws = ws.at[i, :i + 2].set(1.0 / (i + 2))
    p['ws'] = ws
    return p


# ---------------- pure-JAX reference (for correctness check) ----------------
def ref_forward(x, p, *, kernel_size, dilation, scale):
    planes = p['w3'].shape[0]
    width = planes // scale
    nums = scale - 1
    pad = (kernel_size // 2) * dilation
    B, Cin, T = x.shape

    h = jnp.einsum('oi,bit->bot', p['w1'], x) + p['b1'][None, :, None]
    h = jnp.maximum(h, 0.0)
    h = h * p['s1'][None, :, None] + p['t1'][None, :, None]

    spx = [h[:, j * width:(j + 1) * width, :] for j in range(scale)]
    slots = [spx[nums]]
    chunks = []
    for i in range(nums):
        slots = slots + [spx[i]]
        new_slots = []
        for s in slots:
            sp_pad = jnp.pad(s, ((0, 0), (0, 0), (pad, pad)))
            acc = jnp.zeros((B, width, T), jnp.float32)
            for j in range(kernel_size):
                shifted = sp_pad[:, :, j * dilation:j * dilation + T]
                acc = acc + jnp.einsum('oc,bct->bot', p['wc'][i, j], shifted)
            y = jnp.maximum(acc + p['bc'][i][None, :, None], 0.0)
            y = y * p['sc'][i][None, :, None] + p['tc'][i][None, :, None]
            new_slots.append(y)
        slots = new_slots
        sp_s = sum(s * p['ws'][i, k] for k, s in enumerate(slots))
        chunks.append(sp_s)
    chunks.append(spx[nums])
    mid = jnp.concatenate(chunks, axis=1)

    out = jnp.einsum('oi,bit->bot', p['w3'], mid) + p['b3'][None, :, None]
    out = jnp.maximum(out, 0.0)
    out = out * p['s3'][None, :, None] + p['t3'][None, :, None]

    m = jnp.mean(out, axis=2, keepdims=True)
    a = jnp.maximum(jnp.einsum('oi,bix->box', p['wse1'], m)
                    + p['bse1'][None, :, None], 0.0)
    z = jnp.einsum('oi,bix->box', p['wse2'], a) + p['bse2'][None, :, None]
    g = 1.0 / (1.0 + jnp.exp(-z))
    return out * g + x


if __name__ == "__main__":
    B, inplanes, T = 2, 64, 200
    planes, scale, kernel_size, dilation, SE_ratio = 64, 4, 3, 2, 8

    key = jax.random.PRNGKey(0)
    kx, kp = jax.random.split(key)
    x = jax.random.normal(kx, (B, inplanes, T), dtype=jnp.float32)
    params = init_params(kp, inplanes, planes, kernel_size, dilation, scale, SE_ratio)

    out = bottle2neck_pallas(x, params, kernel_size=kernel_size,
                             dilation=dilation, scale=scale)
    out = jax.block_until_ready(out)

    ref = ref_forward(x, params, kernel_size=kernel_size,
                      dilation=dilation, scale=scale)
    assert out.shape == (B, planes, T)
    err = float(jnp.max(jnp.abs(out - ref)))
    assert err < 5e-2, f"max abs err {err}"
    print("KERNEL_OK")
</pallas_src>

<mosaic_0001>
module attributes {stable_mosaic.version = 11 : i64} {
  func.func @_bottle2neck_kernel(%arg0: i32, %arg1: memref<3x4xf32, #tpu.memory_space<smem>>, %arg2: memref<1x64x256xf32, #tpu.memory_space<vmem>>, %arg3: memref<64x64xf32, #tpu.memory_space<vmem>>, %arg4: memref<64x1xf32, #tpu.memory_space<vmem>>, %arg5: memref<64x1xf32, #tpu.memory_space<vmem>>, %arg6: memref<64x1xf32, #tpu.memory_space<vmem>>, %arg7: memref<3x16x48xf32, #tpu.memory_space<vmem>>, %arg8: memref<3x16x1xf32, #tpu.memory_space<vmem>>, %arg9: memref<3x16x1xf32, #tpu.memory_space<vmem>>, %arg10: memref<3x16x1xf32, #tpu.memory_space<vmem>>, %arg11: memref<64x64xbf16, #tpu.memory_space<vmem>>, %arg12: memref<64x1xf32, #tpu.memory_space<vmem>>, %arg13: memref<64x1xf32, #tpu.memory_space<vmem>>, %arg14: memref<64x1xf32, #tpu.memory_space<vmem>>, %arg15: memref<8x64xf32, #tpu.memory_space<vmem>>, %arg16: memref<8x1xf32, #tpu.memory_space<vmem>>, %arg17: memref<64x8xf32, #tpu.memory_space<vmem>>, %arg18: memref<64x1xf32, #tpu.memory_space<vmem>>, %arg19: memref<1x64x256xf32, #tpu.memory_space<vmem>>, %arg20: memref<16x1024xf32, #tpu.memory_space<vmem>>, %arg21: memref<64x256xbf16, #tpu.memory_space<vmem>>) attributes {dimension_semantics = [#tpu.dimension_semantics<parallel>], iteration_bounds = array<i64: 2>, scalar_prefetch = 0 : i64, scratch_operands = 2 : i64, tpu.core_type = #tpu.core_type<tc>, window_params = [{transform_indices = @transform_0, window_bounds = array<i64: 3, 4>}, {transform_indices = @transform_1, window_bounds = array<i64: 1, 64, 256>}, {pipeline_mode = #tpu.pipeline_mode<synchronous>, transform_indices = @transform_2, window_bounds = array<i64: 64, 64>}, {pipeline_mode = #tpu.pipeline_mode<synchronous>, transform_indices = @transform_3, window_bounds = array<i64: 64, 1>}, {pipeline_mode = #tpu.pipeline_mode<synchronous>, transform_indices = @transform_4, window_bounds = array<i64: 64, 1>}, {pipeline_mode = #tpu.pipeline_mode<synchronous>, transform_indices = @transform_5, window_bounds = array<i64: 64, 1>}, {pipeline_mode = #tpu.pipeline_mode<synchronous>, transform_indices = @transform_6, window_bounds = array<i64: 3, 16, 48>}, {pipeline_mode = #tpu.pipeline_mode<synchronous>, transform_indices = @transform_7, window_bounds = array<i64: 3, 16, 1>}, {pipeline_mode = #tpu.pipeline_mode<synchronous>, transform_indices = @transform_8, window_bounds = array<i64: 3, 16, 1>}, {pipeline_mode = #tpu.pipeline_mode<synchronous>, transform_indices = @transform_9, window_bounds = array<i64: 3, 16, 1>}, {pipeline_mode = #tpu.pipeline_mode<synchronous>, transform_indices = @transform_10, window_bounds = array<i64: 64, 64>}, {pipeline_mode = #tpu.pipeline_mode<synchronous>, transform_indices = @transform_11, window_bounds = array<i64: 64, 1>}, {pipeline_mode = #tpu.pipeline_mode<synchronous>, transform_indices = @transform_12, window_bounds = array<i64: 64, 1>}, {pipeline_mode = #tpu.pipeline_mode<synchronous>, transform_indices = @transform_13, window_bounds = array<i64: 64, 1>}, {pipeline_mode = #tpu.pipeline_mode<synchronous>, transform_indices = @transform_14, window_bounds = array<i64: 8, 64>}, {pipeline_mode = #tpu.pipeline_mode<synchronous>, transform_indices = @transform_15, window_bounds = array<i64: 8, 1>}, {pipeline_mode = #tpu.pipeline_mode<synchronous>, transform_indices = @transform_16, window_bounds = array<i64: 64, 8>}, {pipeline_mode = #tpu.pipeline_mode<synchronous>, transform_indices = @transform_17, window_bounds = array<i64: 64, 1>}, {transform_indices = @transform_18, window_bounds = array<i64: 1, 64, 256>}]} {
    %c0 = arith.constant 0 : index
    %c0_0 = arith.constant 0 : index
    %c0_1 = arith.constant 0 : index
    %0 = vector.load %arg2[%c0, %c0_0, %c0_1] : memref<1x64x256xf32, #tpu.memory_space<vmem>>, vector<1x64x256xf32>
    %1 = vector.shape_cast %0 : vector<1x64x256xf32> to vector<64x256xf32>
    %c0_2 = arith.constant 0 : index
    %c0_3 = arith.constant 0 : index
    %2 = vector.load %arg3[%c0_2, %c0_3] : memref<64x64xf32, #tpu.memory_space<vmem>>, vector<64x64xf32>
    %cst = arith.constant dense<0.000000e+00> : vector<64x256xf32>
    %3 = tpu.matmul %2, %1, %cst {dimension_numbers = #tpu.dot_dimension_numbers<[1], [0], [0], [1], [0, 0, 1, 1], [], []>} : vector<64x64xf32>, vector<64x256xf32>, vector<64x256xf32> -> vector<64x256xf32>
    %c0_4 = arith.constant 0 : index
    %c0_5 = arith.constant 0 : index
    %4 = vector.load %arg4[%c0_4, %c0_5] : memref<64x1xf32, #tpu.memory_space<vmem>>, vector<64x1xf32>
    %5 = vector.broadcast %4 : vector<64x1xf32> to vector<64x256xf32>
    %6 = arith.addf %3, %5 : vector<64x256xf32>
    %cst_6 = arith.constant 0.000000e+00 : f32
    %7 = vector.broadcast %cst_6 : f32 to vector<64x256xf32>
    %8 = arith.maximumf %6, %7 : vector<64x256xf32>
    %c0_7 = arith.constant 0 : index
    %c0_8 = arith.constant 0 : index
    %9 = vector.load %arg5[%c0_7, %c0_8] : memref<64x1xf32, #tpu.memory_space<vmem>>, vector<64x1xf32>
    %10 = vector.broadcast %9 : vector<64x1xf32> to vector<64x256xf32>
    %11 = arith.mulf %8, %10 : vector<64x256xf32>
    %c0_9 = arith.constant 0 : index
    %c0_10 = arith.constant 0 : index
    %12 = vector.load %arg6[%c0_9, %c0_10] : memref<64x1xf32, #tpu.memory_space<vmem>>, vector<64x1xf32>
    %13 = vector.broadcast %12 : vector<64x1xf32> to vector<64x256xf32>
    %14 = arith.addf %11, %13 : vector<64x256xf32>
    %cst_11 = arith.constant 0.000000e+00 : f32
    %15 = vector.broadcast %cst_11 : f32 to vector<16x56xf32>
    %16 = vector.extract_strided_slice %14 {offsets = [48, 0], sizes = [16, 256], strides = [1, 1]} : vector<64x256xf32> to vector<16x256xf32>
    %c0_12 = arith.constant 0 : index
    %c0_13 = arith.constant 0 : index
    %17 = vector.load %arg20[%c0_12, %c0_13] : memref<16x1024xf32, #tpu.memory_space<vmem>>, vector<16x256xf32>
    tpu.vector_store %arg20[%c0_12, %c0_13], %16 {strides = array<i32>} : memref<16x1024xf32, #tpu.memory_space<vmem>>, vector<16x256xf32>,
    %c0_14 = arith.constant 0 : index
    %c200 = arith.constant 200 : index
    %18 = vector.load %arg20[%c0_14, %c200] : memref<16x1024xf32, #tpu.memory_space<vmem>>, vector<16x56xf32>
    tpu.vector_store %arg20[%c0_14, %c200], %15 {strides = array<i32>} : memref<16x1024xf32, #tpu.memory_space<vmem>>, vector<16x56xf32>,
    %19 = arith.truncf %16 : vector<16x256xf32> to vector<16x256xbf16>
    %c48 = arith.constant 48 : index
    %c0_15 = arith.constant 0 : index
    %20 = vector.load %arg21[%c48, %c0_15] : memref<64x256xbf16, #tpu.memory_space<vmem>>, vector<16x256xbf16>
    tpu.vector_store %arg21[%c48, %c0_15], %19 {strides = array<i32>} : memref<64x256xbf16, #tpu.memory_space<vmem>>, vector<16x256xbf16>,
    %21 = vector.extract_strided_slice %14 {offsets = [0, 0], sizes = [16, 256], strides = [1, 1]} : vector<64x256xf32> to vector<16x256xf32>
    %c0_16 = arith.constant 0 : index
    %c256 = arith.constant 256 : index
    %22 = vector.load %arg20[%c0_16, %c256] : memref<16x1024xf32, #tpu.memory_space<vmem>>, vector<16x256xf32>
    tpu.vector_store %arg20[%c0_16, %c256], %21 {strides = array<i32>} : memref<16x1024xf32, #tpu.memory_space<vmem>>, vector<16x256xf32>,
    %c0_17 = arith.constant 0 : index
    %c456 = arith.constant 456 : index
    %23 = vector.load %arg20[%c0_17, %c456] : memref<16x1024xf32, #tpu.memory_space<vmem>>, vector<16x56xf32>
    tpu.vector_store %arg20[%c0_17, %c456], %15 {strides = array<i32>} : memref<16x1024xf32, #tpu.memory_space<vmem>>, vector<16x56xf32>,
    %c0_18 = arith.constant 0 : index
    %c0_19 = arith.constant 0 : index
    %24 = vector.load %arg20[%c0_18, %c0_19] : memref<16x1024xf32, #tpu.memory_space<vmem>>, vector<16x512xf32>
    %c2_i32 = arith.constant 2 : i32
    %25 = tpu.dynamic_rotate %24 by %c2_i32 dim 1 : vector<16x512xf32>, i32 -> vector<16x512xf32>
    %c510_i32 = arith.constant 510 : i32
    %26 = tpu.dynamic_rotate %24 by %c510_i32 dim 1 : vector<16x512xf32>, i32 -> vector<16x512xf32>
    %27 = tpu.concatenate %25, %24, %26 in 0 : vector<16x512xf32>, vector<16x512xf32>, vector<16x512xf32> -> vector<48x512xf32>
    %c0_20 = arith.constant 0 : index
    %c0_21 = arith.constant 0 : index
    %c0_22 = arith.constant 0 : index
    %28 = vector.load %arg7[%c0_20, %c0_21, %c0_22] : memref<3x16x48xf32, #tpu.memory_space<vmem>>, vector<1x16x48xf32>
    %29 = vector.shape_cast %28 : vector<1x16x48xf32> to vector<16x48xf32>
    %cst_23 = arith.constant dense<0.000000e+00> : vector<16x512xf32>
    %30 = tpu.matmul %29, %27, %cst_23 {dimension_numbers = #tpu.dot_dimension_numbers<[1], [0], [0], [1], [0, 0, 1, 1], [], []>} : vector<16x48xf32>, vector<48x512xf32>, vector<16x512xf32> -> vector<16x512xf32>
    %c0_24 = arith.constant 0 : index
    %c0_25 = arith.constant 0 : index
    %c0_26 = arith.constant 0 : index
    %31 = vector.load %arg8[%c0_24, %c0_25, %c0_26] : memref<3x16x1xf32, #tpu.memory_space<vmem>>, vector<1x16x1xf32>
    %32 = vector.shape_cast %31 : vector<1x16x1xf32> to vector<16x1xf32>
    %33 = vector.broadcast %32 : vector<16x1xf32> to vector<16x512xf32>
    %34 = arith.addf %30, %33 : vector<16x512xf32>
    %cst_27 = arith.constant 0.000000e+00 : f32
    %35 = vector.broadcast %cst_27 : f32 to vector<16x512xf32>
    %36 = arith.maximumf %34, %35 : vector<16x512xf32>
    %c0_28 = arith.constant 0 : index
    %c0_29 = arith.constant 0 : index
    %c0_30 = arith.constant 0 : index
    %37 = vector.load %arg9[%c0_28, %c0_29, %c0_30] : memref<3x16x1xf32, #tpu.memory_space<vmem>>, vector<1x16x1xf32>
    %38 = vector.shape_cast %37 : vector<1x16x1xf32> to vector<16x1xf32>
    %39 = vector.broadcast %38 : vector<16x1xf32> to vector<16x512xf32>
    %40 = arith.mulf %36, %39 : vector<16x512xf32>
    %c0_31 = arith.constant 0 : index
    %c0_32 = arith.constant 0 : index
    %c0_33 = arith.constant 0 : index
    %41 = vector.load %arg10[%c0_31, %c0_32, %c0_33] : memref<3x16x1xf32, #tpu.memory_space<vmem>>, vector<1x16x1xf32>
    %42 = vector.shape_cast %41 : vector<1x16x1xf32> to vector<16x1xf32>
    %43 = vector.broadcast %42 : vector<16x1xf32> to vector<16x512xf32>
    %44 = arith.addf %40, %43 : vector<16x512xf32>
    %c0_34 = arith.constant 0 : index
    %c0_35 = arith.constant 0 : index
    %45 = vector.load %arg20[%c0_34, %c0_35] : memref<16x1024xf32, #tpu.memory_space<vmem>>, vector<16x512xf32>
    tpu.vector_store %arg20[%c0_34, %c0_35], %44 {strides = array<i32>} : memref<16x1024xf32, #tpu.memory_space<vmem>>, vector<16x512xf32>,
    %c0_36 = arith.constant 0 : index
    %c200_37 = arith.constant 200 : index
    %46 = vector.load %arg20[%c0_36, %c200_37] : memref<16x1024xf32, #tpu.memory_space<vmem>>, vector<16x56xf32>
    tpu.vector_store %arg20[%c0_36, %c200_37], %15 {strides = array<i32>} : memref<16x1024xf32, #tpu.memory_space<vmem>>, vector<16x56xf32>,
    %c0_38 = arith.constant 0 : index
    %c456_39 = arith.constant 456 : index
    %47 = vector.load %arg20[%c0_38, %c456_39] : memref<16x1024xf32, #tpu.memory_space<vmem>>, vector<16x56xf32>
    tpu.vector_store %arg20[%c0_38, %c456_39], %15 {strides = array<i32>} : memref<16x1024xf32, #tpu.memory_space<vmem>>, vector<16x56xf32>,
    %48 = vector.extract_strided_slice %44 {offsets = [0, 0], sizes = [16, 256], strides = [1, 1]} : vector<16x512xf32> to vector<16x256xf32>
    %c0_40 = arith.constant 0 : index
    %c0_41 = arith.constant 0 : index
    %49 = memref.load %arg1[%c0_40, %c0_41] : memref<3x4xf32, #tpu.memory_space<smem>>
    %50 = vector.broadcast %49 : f32 to vector<16x256xf32>
    %51 = arith.mulf %48, %50 : vector<16x256xf32>
    %52 = vector.extract_strided_slice %44 {offsets = [0, 256], sizes = [16, 256], strides = [1, 1]} : vector<16x512xf32> to vector<16x256xf32>
    %c0_42 = arith.constant 0 : index
    %c1 = arith.constant 1 : index
    %53 = memref.load %arg1[%c0_42, %c1] : memref<3x4xf32, #tpu.memory_space<smem>>
    %54 = vector.broadcast %53 : f32 to vector<16x256xf32>
    %55 = arith.mulf %52, %54 : vector<16x256xf32>
    %56 = arith.addf %51, %55 : vector<16x256xf32>
    %57 = arith.truncf %56 : vector<16x256xf32> to vector<16x256xbf16>
    %c0_43 = arith.constant 0 : index
    %c0_44 = arith.constant 0 : index
    %58 = vector.load %arg21[%c0_43, %c0_44] : memref<64x256xbf16, #tpu.memory_space<vmem>>, vector<16x256xbf16>
    tpu.vector_store %arg21[%c0_43, %c0_44], %57 {strides = array<i32>} : memref<64x256xbf16, #tpu.memory_space<vmem>>, vector<16x256xbf16>,
    %59 = vector.extract_strided_slice %14 {offsets = [16, 0], sizes = [16, 256], strides = [1, 1]} : vector<64x256xf32> to vector<16x256xf32>
    %c0_45 = arith.constant 0 : index
    %c512 = arith.constant 512 : index
    %60 = vector.load %arg20[%c0_45, %c512] : memref<16x1024xf32, #tpu.memory_space<vmem>>, vector<16x256xf32>
    tpu.vector_store %arg20[%c0_45, %c512], %59 {strides = array<i32>} : memref<16x1024xf32, #tpu.memory_space<vmem>>, vector<16x256xf32>,
    %c0_46 = arith.constant 0 : index
    %c712 = arith.constant 712 : index
    %61 = vector.load %arg20[%c0_46, %c712] : memref<16x1024xf32, #tpu.memory_space<vmem>>, vector<16x56xf32>
    tpu.vector_store %arg20[%c0_46, %c712], %15 {strides = array<i32>} : memref<16x1024xf32, #tpu.memory_space<vmem>>, vector<16x56xf32>,
    %c0_47 = arith.constant 0 : index
    %c0_48 = arith.constant 0 : index
    %62 = vector.load %arg20[%c0_47, %c0_48] : memref<16x1024xf32, #tpu.memory_space<vmem>>, vector<16x768xf32>
    %c2_i32_49 = arith.constant 2 : i32
    %63 = tpu.dynamic_rotate %62 by %c2_i32_49 dim 1 : vector<16x768xf32>, i32 -> vector<16x768xf32>
    %c766_i32 = arith.constant 766 : i32
    %64 = tpu.dynamic_rotate %62 by %c766_i32 dim 1 : vector<16x768xf32>, i32 -> vector<16x768xf32>
    %65 = tpu.concatenate %63, %62, %64 in 0 : vector<16x768xf32>, vector<16x768xf32>, vector<16x768xf32> -> vector<48x768xf32>
    %c1_50 = arith.constant 1 : index
    %c0_51 = arith.constant 0 : index
    %c0_52 = arith.constant 0 : index
    %66 = vector.load %arg7[%c1_50, %c0_51, %c0_52] : memref<3x16x48xf32, #tpu.memory_space<vmem>>, vector<1x16x48xf32>
    %67 = vector.shape_cast %66 : vector<1x16x48xf32> to vector<16x48xf32>
    %cst_53 = arith.constant dense<0.000000e+00> : vector<16x768xf32>
    %68 = tpu.matmul %67, %65, %cst_53 {dimension_numbers = #tpu.dot_dimension_numbers<[1], [0], [0], [1], [0, 0, 1, 1], [], []>} : vector<16x48xf32>, vector<48x768xf32>, vector<16x768xf32> -> vector<16x768xf32>
    %c1_54 = arith.constant 1 : index
    %c0_55 = arith.constant 0 : index
    %c0_56 = arith.constant 0 : index
    %69 = vector.load %arg8[%c1_54, %c0_55, %c0_56] : memref<3x16x1xf32, #tpu.memory_space<vmem>>, vector<1x16x1xf32>
    %70 = vector.shape_cast %69 : vector<1x16x1xf32> to vector<16x1xf32>
    %71 = vector.broadcast %70 : vector<16x1xf32> to vector<16x768xf32>
    %72 = arith.addf %68, %71 : vector<16x768xf32>
    %cst_57 = arith.constant 0.000000e+00 : f32
    %73 = vector.broadcast %cst_57 : f32 to vector<16x768xf32>
    %74 = arith.maximumf %72, %73 : vector<16x768xf32>
    %c1_58 = arith.constant 1 : index
    %c0_59 = arith.constant 0 : index
    %c0_60 = arith.constant 0 : index
    %75 = vector.load %arg9[%c1_58, %c0_59, %c0_60] : memref<3x16x1xf32, #tpu.memory_space<vmem>>, vector<1x16x1xf32>
    %76 = vector.shape_cast %75 : vector<1x16x1xf32> to vector<16x1xf32>
    %77 = vector.broadcast %76 : vector<16x1xf32> to vector<16x768xf32>
    %78 = arith.mulf %74, %77 : vector<16x768xf32>
    %c1_61 = arith.constant 1 : index
    %c0_62 = arith.constant 0 : index
    %c0_63 = arith.constant 0 : index
    %79 = vector.load %arg10[%c1_61, %c0_62, %c0_63] : memref<3x16x1xf32, #tpu.memory_space<vmem>>, vector<1x16x1xf32>
    %80 = vector.shape_cast %79 : vector<1x16x1xf32> to vector<16x1xf32>
    %81 = vector.broadcast %80 : vector<16x1xf32> to vector<16x768xf32>
    %82 = arith.addf %78, %81 : vector<16x768xf32>
    %c0_64 = arith.constant 0 : index
    %c0_65 = arith.constant 0 : index
    %83 = vector.load %arg20[%c0_64, %c0_65] : memref<16x1024xf32, #tpu.memory_space<vmem>>, vector<16x768xf32>
    tpu.vector_store %arg20[%c0_64, %c0_65], %82 {strides = array<i32>} : memref<16x1024xf32, #tpu.memory_space<vmem>>, vector<16x768xf32>,
    %c0_66 = arith.constant 0 : index
    %c200_67 = arith.constant 200 : index
    %84 = vector.load %arg20[%c0_66, %c200_67] : memref<16x1024xf32, #tpu.memory_space<vmem>>, vector<16x56xf32>
    tpu.vector_store %arg20[%c0_66, %c200_67], %15 {strides = array<i32>} : memref<16x1024xf32, #tpu.memory_space<vmem>>, vector<16x56xf32>,
    %c0_68 = arith.constant 0 : index
    %c456_69 = arith.constant 456 : index
    %85 = vector.load %arg20[%c0_68, %c456_69] : memref<16x1024xf32, #tpu.memory_space<vmem>>, vector<16x56xf32>
    tpu.vector_store %arg20[%c0_68, %c456_69], %15 {strides = array<i32>} : memref<16x1024xf32, #tpu.memory_space<vmem>>, vector<16x56xf32>,
    %c0_70 = arith.constant 0 : index
    %c712_71 = arith.constant 712 : index
    %86 = vector.load %arg20[%c0_70, %c712_71] : memref<16x1024xf32, #tpu.memory_space<vmem>>, vector<16x56xf32>
    tpu.vector_store %arg20[%c0_70, %c712_71], %15 {strides = array<i32>} : memref<16x1024xf32, #tpu.memory_space<vmem>>, vector<16x56xf32>,
    %87 = vector.extract_strided_slice %82 {offsets = [0, 0], sizes = [16, 256], strides = [1, 1]} : vector<16x768xf32> to vector<16x256xf32>
    %c1_72 = arith.constant 1 : index
    %c0_73 = arith.constant 0 : index
    %88 = memref.load %arg1[%c1_72, %c0_73] : memref<3x4xf32, #tpu.memory_space<smem>>
    %89 = vector.broadcast %88 : f32 to vector<16x256xf32>
    %90 = arith.mulf %87, %89 : vector<16x256xf32>
    %91 = vector.extract_strided_slice %82 {offsets = [0, 256], sizes = [16, 256], strides = [1, 1]} : vector<16x768xf32> to vector<16x256xf32>
    %c1_74 = arith.constant 1 : index
    %c1_75 = arith.constant 1 : index
    %92 = memref.load %arg1[%c1_74, %c1_75] : memref<3x4xf32, #tpu.memory_space<smem>>
    %93 = vector.broadcast %92 : f32 to vector<16x256xf32>
    %94 = arith.mulf %91, %93 : vector<16x256xf32>
    %95 = arith.addf %90, %94 : vector<16x256xf32>
    %96 = vector.extract_strided_slice %82 {offsets = [0, 512], sizes = [16, 256], strides = [1, 1]} : vector<16x768xf32> to vector<16x256xf32>
    %c1_76 = arith.constant 1 : index
    %c2 = arith.constant 2 : index
    %97 = memref.load %arg1[%c1_76, %c2] : memref<3x4xf32, #tpu.memory_space<smem>>
    %98 = vector.broadcast %97 : f32 to vector<16x256xf32>
    %99 = arith.mulf %96, %98 : vector<16x256xf32>
    %100 = arith.addf %95, %99 : vector<16x256xf32>
    %101 = arith.truncf %100 : vector<16x256xf32> to vector<16x256xbf16>
    %c16 = arith.constant 16 : index
    %c0_77 = arith.constant 0 : index
    %102 = vector.load %arg21[%c16, %c0_77] : memref<64x256xbf16, #tpu.memory_space<vmem>>, vector<16x256xbf16>
    tpu.vector_store %arg21[%c16, %c0_77], %101 {strides = array<i32>} : memref<64x256xbf16, #tpu.memory_space<vmem>>, vector<16x256xbf16>,
    %103 = vector.extract_strided_slice %14 {offsets = [32, 0], sizes = [16, 256], strides = [1, 1]} : vector<64x256xf32> to vector<16x256xf32>
    %c0_78 = arith.constant 0 : index
    %c768 = arith.constant 768 : index
    %104 = vector.load %arg20[%c0_78, %c768] : memref<16x1024xf32, #tpu.memory_space<vmem>>, vector<16x256xf32>
    tpu.vector_store %arg20[%c0_78, %c768], %103 {strides = array<i32>} : memref<16x1024xf32, #tpu.memory_space<vmem>>, vector<16x256xf32>,
    %c0_79 = arith.constant 0 : index
    %c968 = arith.constant 968 : index
    %105 = vector.load %arg20[%c0_79, %c968] : memref<16x1024xf32, #tpu.memory_space<vmem>>, vector<16x56xf32>
    tpu.vector_store %arg20[%c0_79, %c968], %15 {strides = array<i32>} : memref<16x1024xf32, #tpu.memory_space<vmem>>, vector<16x56xf32>,
    %c0_80 = arith.constant 0 : index
    %c0_81 = arith.constant 0 : index
    %106 = vector.load %arg20[%c0_80, %c0_81] : memref<16x1024xf32, #tpu.memory_space<vmem>>, vector<16x1024xf32>
    %c2_i32_82 = arith.constant 2 : i32
    %107 = tpu.dynamic_rotate %106 by %c2_i32_82 dim 1 : vector<16x1024xf32>, i32 -> vector<16x1024xf32>
    %c1022_i32 = arith.constant 1022 : i32
    %108 = tpu.dynamic_rotate %106 by %c1022_i32 dim 1 : vector<16x1024xf32>, i32 -> vector<16x1024xf32>
    %109 = tpu.concatenate %107, %106, %108 in 0 : vector<16x1024xf32>, vector<16x1024xf32>, vector<16x1024xf32> -> vector<48x1024xf32>
    %c2_83 = arith.constant 2 : index
    %c0_84 = arith.constant 0 : index
    %c0_85 = arith.constant 0 : index
    %110 = vector.load %arg7[%c2_83, %c0_84, %c0_85] : memref<3x16x48xf32, #tpu.memory_space<vmem>>, vector<1x16x48xf32>
    %111 = vector.shape_cast %110 : vector<1x16x48xf32> to vector<16x48xf32>
    %cst_86 = arith.constant dense<0.000000e+00> : vector<16x1024xf32>
    %112 = tpu.matmul %111, %109, %cst_86 {dimension_numbers = #tpu.dot_dimension_numbers<[1], [0], [0], [1], [0, 0, 1, 1], [], []>} : vector<16x48xf32>, vector<48x1024xf32>, vector<16x1024xf32> -> vector<16x1024xf32>
    %c2_87 = arith.constant 2 : index
    %c0_88 = arith.constant 0 : index
    %c0_89 = arith.constant 0 : index
    %113 = vector.load %arg8[%c2_87, %c0_88, %c0_89] : memref<3x16x1xf32, #tpu.memory_space<vmem>>, vector<1x16x1xf32>
    %114 = vector.shape_cast %113 : vector<1x16x1xf32> to vector<16x1xf32>
    %115 = vector.broadcast %114 : vector<16x1xf32> to vector<16x1024xf32>
    %116 = arith.addf %112, %115 : vector<16x1024xf32>
    %cst_90 = arith.constant 0.000000e+00 : f32
    %117 = vector.broadcast %cst_90 : f32 to vector<16x1024xf32>
    %118 = arith.maximumf %116, %117 : vector<16x1024xf32>
    %c2_91 = arith.constant 2 : index
    %c0_92 = arith.constant 0 : index
    %c0_93 = arith.constant 0 : index
    %119 = vector.load %arg9[%c2_91, %c0_92, %c0_93] : memref<3x16x1xf32, #tpu.memory_space<vmem>>, vector<1x16x1xf32>
    %120 = vector.shape_cast %119 : vector<1x16x1xf32> to vector<16x1xf32>
    %121 = vector.broadcast %120 : vector<16x1xf32> to vector<16x1024xf32>
    %122 = arith.mulf %118, %121 : vector<16x1024xf32>
    %c2_94 = arith.constant 2 : index
    %c0_95 = arith.constant 0 : index
    %c0_96 = arith.constant 0 : index
    %123 = vector.load %arg10[%c2_94, %c0_95, %c0_96] : memref<3x16x1xf32, #tpu.memory_space<vmem>>, vector<1x16x1xf32>
    %124 = vector.shape_cast %123 : vector<1x16x1xf32> to vector<16x1xf32>
    %125 = vector.broadcast %124 : vector<16x1xf32> to vector<16x1024xf32>
    %126 = arith.addf %122, %125 : vector<16x1024xf32>
    %c0_97 = arith.constant 0 : index
    %c0_98 = arith.constant 0 : index
    %127 = vector.load %arg20[%c0_97, %c0_98] : memref<16x1024xf32, #tpu.memory_space<vmem>>, vector<16x1024xf32>
    tpu.vector_store %arg20[%c0_97, %c0_98], %126 {strides = array<i32>} : memref<16x1024xf32, #tpu.memory_space<vmem>>, vector<16x1024xf32>,
    %c0_99 = arith.constant 0 : index
    %c200_100 = arith.constant 200 : index
    %128 = vector.load %arg20[%c0_99, %c200_100] : memref<16x1024xf32, #tpu.memory_space<vmem>>, vector<16x56xf32>
    tpu.vector_store %arg20[%c0_99, %c200_100], %15 {strides = array<i32>} : memref<16x1024xf32, #tpu.memory_space<vmem>>, vector<16x56xf32>,
    %c0_101 = arith.constant 0 : index
    %c456_102 = arith.constant 456 : index
    %129 = vector.load %arg20[%c0_101, %c456_102] : memref<16x1024xf32, #tpu.memory_space<vmem>>, vector<16x56xf32>
    tpu.vector_store %arg20[%c0_101, %c456_102], %15 {strides = array<i32>} : memref<16x1024xf32, #tpu.memory_space<vmem>>, vector<16x56xf32>,
    %c0_103 = arith.constant 0 : index
    %c712_104 = arith.constant 712 : index
    %130 = vector.load %arg20[%c0_103, %c712_104] : memref<16x1024xf32, #tpu.memory_space<vmem>>, vector<16x56xf32>
    tpu.vector_store %arg20[%c0_103, %c712_104], %15 {strides = array<i32>} : memref<16x1024xf32, #tpu.memory_space<vmem>>, vector<16x56xf32>,
    %c0_105 = arith.constant 0 : index
    %c968_106 = arith.constant 968 : index
    %131 = vector.load %arg20[%c0_105, %c968_106] : memref<16x1024xf32, #tpu.memory_space<vmem>>, vector<16x56xf32>
    tpu.vector_store %arg20[%c0_105, %c968_106], %15 {strides = array<i32>} : memref<16x1024xf32, #tpu.memory_space<vmem>>, vector<16x56xf32>,
    %132 = vector.extract_strided_slice %126 {offsets = [0, 0], sizes = [16, 256], strides = [1, 1]} : vector<16x1024xf32> to vector<16x256xf32>
    %c2_107 = arith.constant 2 : index
    %c0_108 = arith.constant 0 : index
    %133 = memref.load %arg1[%c2_107, %c0_108] : memref<3x4xf32, #tpu.memory_space<smem>>
    %134 = vector.broadcast %133 : f32 to vector<16x256xf32>
    %135 = arith.mulf %132, %134 : vector<16x256xf32>
    %136 = vector.extract_strided_slice %126 {offsets = [0, 256], sizes = [16, 256], strides = [1, 1]} : vector<16x1024xf32> to vector<16x256xf32>
    %c2_109 = arith.constant 2 : index
    %c1_110 = arith.constant 1 : index
    %137 = memref.load %arg1[%c2_109, %c1_110] : memref<3x4xf32, #tpu.memory_space<smem>>
    %138 = vector.broadcast %137 : f32 to vector<16x256xf32>
    %139 = arith.mulf %136, %138 : vector<16x256xf32>
    %140 = arith.addf %135, %139 : vector<16x256xf32>
    %141 = vector.extract_strided_slice %126 {offsets = [0, 512], sizes = [16, 256], strides = [1, 1]} : vector<16x1024xf32> to vector<16x256xf32>
    %c2_111 = arith.constant 2 : index
    %c2_112 = arith.constant 2 : index
    %142 = memref.load %arg1[%c2_111, %c2_112] : memref<3x4xf32, #tpu.memory_space<smem>>
    %143 = vector.broadcast %142 : f32 to vector<16x256xf32>
    %144 = arith.mulf %141, %143 : vector<16x256xf32>
    %145 = arith.addf %140, %144 : vector<16x256xf32>
    %146 = vector.extract_strided_slice %126 {offsets = [0, 768], sizes = [16, 256], strides = [1, 1]} : vector<16x1024xf32> to vector<16x256xf32>
    %c2_113 = arith.constant 2 : index
    %c3 = arith.constant 3 : index
    %147 = memref.load %arg1[%c2_113, %c3] : memref<3x4xf32, #tpu.memory_space<smem>>
    %148 = vector.broadcast %147 : f32 to vector<16x256xf32>
    %149 = arith.mulf %146, %148 : vector<16x256xf32>
    %150 = arith.addf %145, %149 : vector<16x256xf32>
    %151 = arith.truncf %150 : vector<16x256xf32> to vector<16x256xbf16>
    %c32 = arith.constant 32 : index
    %c0_114 = arith.constant 0 : index
    %152 = vector.load %arg21[%c32, %c0_114] : memref<64x256xbf16, #tpu.memory_space<vmem>>, vector<16x256xbf16>
    tpu.vector_store %arg21[%c32, %c0_114], %151 {strides = array<i32>} : memref<64x256xbf16, #tpu.memory_space<vmem>>, vector<16x256xbf16>,
    %c0_115 = arith.constant 0 : index
    %c0_116 = arith.constant 0 : index
    %153 = vector.load %arg11[%c0_115, %c0_116] : memref<64x64xbf16, #tpu.memory_space<vmem>>, vector<64x64xbf16>
    %c0_117 = arith.constant 0 : index
    %c0_118 = arith.constant 0 : index
    %154 = vector.load %arg21[%c0_117, %c0_118] : memref<64x256xbf16, #tpu.memory_space<vmem>>, vector<64x256xbf16>
    %cst_119 = arith.constant dense<0.000000e+00> : vector<64x256xf32>
    %155 = tpu.matmul %153, %154, %cst_119 {dimension_numbers = #tpu.dot_dimension_numbers<[1], [0], [0], [1], [0, 0, 1, 1], [], []>} : vector<64x64xbf16>, vector<64x256xbf16>, vector<64x256xf32> -> vector<64x256xf32>
    %c0_120 = arith.constant 0 : index
    %c0_121 = arith.constant 0 : index
    %156 = vector.load %arg12[%c0_120, %c0_121] : memref<64x1xf32, #tpu.memory_space<vmem>>, vector<64x1xf32>
    %157 = vector.broadcast %156 : vector<64x1xf32> to vector<64x256xf32>
    %158 = arith.addf %155, %157 : vector<64x256xf32>
    %cst_122 = arith.constant 0.000000e+00 : f32
    %159 = vector.broadcast %cst_122 : f32 to vector<64x256xf32>
    %160 = arith.maximumf %158, %159 : vector<64x256xf32>
    %c0_123 = arith.constant 0 : index
    %c0_124 = arith.constant 0 : index
    %161 = vector.load %arg13[%c0_123, %c0_124] : memref<64x1xf32, #tpu.memory_space<vmem>>, vector<64x1xf32>
    %162 = vector.broadcast %161 : vector<64x1xf32> to vector<64x256xf32>
    %163 = arith.mulf %160, %162 : vector<64x256xf32>
    %c0_125 = arith.constant 0 : index
    %c0_126 = arith.constant 0 : index
    %164 = vector.load %arg14[%c0_125, %c0_126] : memref<64x1xf32, #tpu.memory_space<vmem>>, vector<64x1xf32>
    %165 = vector.broadcast %164 : vector<64x1xf32> to vector<64x256xf32>
    %166 = arith.addf %163, %165 : vector<64x256xf32>
    %167 = tpu.iota {dimensions = array<i32: 1>} : vector<1x256xi32>
    %c200_i32 = arith.constant 200 : i32
    %168 = vector.broadcast %c200_i32 : i32 to vector<1x256xi32>
    %169 = arith.cmpi slt, %167, %168 : vector<1x256xi32>
    %170 = arith.extui %169 : vector<1x256xi1> to vector<1x256xi32>
    %171 = arith.sitofp %170 : vector<1x256xi32> to vector<1x256xf32>
    %172 = vector.broadcast %171 : vector<1x256xf32> to vector<64x256xf32>
    %173 = arith.mulf %166, %172 : vector<64x256xf32>
    %cst_127 = arith.constant dense<0.000000e+00> : vector<64xf32>
    %174 = vector.multi_reduction <add>, %173, %cst_127 [1] : vector<64x256xf32> to vector<64xf32>
    %175 = vector.shape_cast %174 : vector<64xf32> to vector<64x1xf32>
    %cst_128 = arith.constant 5.000000e-03 : f32
    %176 = vector.broadcast %cst_128 : f32 to vector<64x1xf32>
    %177 = arith.mulf %175, %176 : vector<64x1xf32>
    %c0_129 = arith.constant 0 : index
    %c0_130 = arith.constant 0 : index
    %178 = vector.load %arg15[%c0_129, %c0_130] : memref<8x64xf32, #tpu.memory_space<vmem>>, vector<8x64xf32>
    %cst_131 = arith.constant dense<0.000000e+00> : vector<8x1xf32>
    %179 = tpu.matmul %178, %177, %cst_131 {dimension_numbers = #tpu.dot_dimension_numbers<[1], [0], [0], [1], [0, 0, 1, 1], [], []>} : vector<8x64xf32>, vector<64x1xf32>, vector<8x1xf32> -> vector<8x1xf32>
    %c0_132 = arith.constant 0 : index
    %c0_133 = arith.constant 0 : index
    %180 = vector.load %arg16[%c0_132, %c0_133] : memref<8x1xf32, #tpu.memory_space<vmem>>, vector<8x1xf32>
    %181 = arith.addf %179, %180 : vector<8x1xf32>
    %cst_134 = arith.constant 0.000000e+00 : f32
    %182 = vector.broadcast %cst_134 : f32 to vector<8x1xf32>
    %183 = arith.maximumf %181, %182 : vector<8x1xf32>
    %c0_135 = arith.constant 0 : index
    %c0_136 = arith.constant 0 : index
    %184 = vector.load %arg17[%c0_135, %c0_136] : memref<64x8xf32, #tpu.memory_space<vmem>>, vector<64x8xf32>
    %cst_137 = arith.constant dense<0.000000e+00> : vector<64x1xf32>
    %185 = tpu.matmul %184, %183, %cst_137 {dimension_numbers = #tpu.dot_dimension_numbers<[1], [0], [0], [1], [0, 0, 1, 1], [], []>} : vector<64x8xf32>, vector<8x1xf32>, vector<64x1xf32> -> vector<64x1xf32>
    %c0_138 = arith.constant 0 : index
    %c0_139 = arith.constant 0 : index
    %186 = vector.load %arg18[%c0_138, %c0_139] : memref<64x1xf32, #tpu.memory_space<vmem>>, vector<64x1xf32>
    %187 = arith.addf %185, %186 : vector<64x1xf32>
    %cst_140 = arith.constant 0.000000e+00 : f32
    %188 = vector.broadcast %cst_140 : f32 to vector<64x1xf32>
    %189 = arith.subf %188, %187 : vector<64x1xf32>
    %190 = math.exp %189 : vector<64x1xf32>
    %cst_141 = arith.constant 1.000000e+00 : f32
    %191 = vector.broadcast %cst_141 : f32 to vector<64x1xf32>
    %192 = arith.addf %191, %190 : vector<64x1xf32>
    %193 = tpu.reciprocal %192 {approx = true} : vector<64x1xf32> -> vector<64x1xf32>
    %194 = vector.broadcast %193 : vector<64x1xf32> to vector<64x256xf32>
    %195 = arith.mulf %166, %194 : vector<64x256xf32>
    %196 = arith.addf %195, %1 : vector<64x256xf32>
    %c0_142 = arith.constant 0 : index
    %c0_143 = arith.constant 0 : index
    %c0_144 = arith.constant 0 : index
    %197 = vector.load %arg19[%c0_142, %c0_143, %c0_144] : memref<1x64x256xf32, #tpu.memory_space<vmem>>, vector<1x64x256xf32>
    %198 = vector.shape_cast %197 : vector<1x64x256xf32> to vector<64x256xf32>
    %199 = vector.shape_cast %196 : vector<64x256xf32> to vector<1x64x256xf32>
    tpu.vector_store %arg19[%c0_142, %c0_143, %c0_144], %199 {strides = array<i32>} : memref<1x64x256xf32, #tpu.memory_space<vmem>>, vector<1x64x256xf32>,
    return
  }
  func.func @transform_0(%arg0: i32) -> (i32, i32) {
    %c0_i32 = arith.constant 0 : i32
    %c0_i32_0 = arith.constant 0 : i32
    %c0_i32_1 = arith.constant 0 : i32
    return %c0_i32, %c0_i32_0 : i32, i32
  }
  func.func @transform_1(%arg0: i32) -> (i32, i32, i32) {
    %c0_i32 = arith.constant 0 : i32
    %c0_i32_0 = arith.constant 0 : i32
    %c0_i32_1 = arith.constant 0 : i32
    return %arg0, %c0_i32, %c0_i32_0 : i32, i32, i32
  }
  func.func @transform_2(%arg0: i32) -> (i32, i32) {
    %c0_i32 = arith.constant 0 : i32
    %c0_i32_0 = arith.constant 0 : i32
    %c0_i32_1 = arith.constant 0 : i32
    return %c0_i32, %c0_i32_0 : i32, i32
  }
  func.func @transform_3(%arg0: i32) -> (i32, i32) {
    %c0_i32 = arith.constant 0 : i32
    %c0_i32_0 = arith.constant 0 : i32
    %c0_i32_1 = arith.constant 0 : i32
    return %c0_i32, %c0_i32_0 : i32, i32
  }
  func.func @transform_4(%arg0: i32) -> (i32, i32) {
    %c0_i32 = arith.constant 0 : i32
    %c0_i32_0 = arith.constant 0 : i32
    %c0_i32_1 = arith.constant 0 : i32
    return %c0_i32, %c0_i32_0 : i32, i32
  }
  func.func @transform_5(%arg0: i32) -> (i32, i32) {
    %c0_i32 = arith.constant 0 : i32
    %c0_i32_0 = arith.constant 0 : i32
    %c0_i32_1 = arith.constant 0 : i32
    return %c0_i32, %c0_i32_0 : i32, i32
  }
  func.func @transform_6(%arg0: i32) -> (i32, i32, i32) {
    %c0_i32 = arith.constant 0 : i32
    %c0_i32_0 = arith.constant 0 : i32
    %c0_i32_1 = arith.constant 0 : i32
    %c0_i32_2 = arith.constant 0 : i32
    return %c0_i32, %c0_i32_0, %c0_i32_1 : i32, i32, i32
  }
  func.func @transform_7(%arg0: i32) -> (i32, i32, i32) {
    %c0_i32 = arith.constant 0 : i32
    %c0_i32_0 = arith.constant 0 : i32
    %c0_i32_1 = arith.constant 0 : i32
    %c0_i32_2 = arith.constant 0 : i32
    return %c0_i32, %c0_i32_0, %c0_i32_1 : i32, i32, i32
  }
  func.func @transform_8(%arg0: i32) -> (i32, i32, i32) {
    %c0_i32 = arith.constant 0 : i32
    %c0_i32_0 = arith.constant 0 : i32
    %c0_i32_1 = arith.constant 0 : i32
    %c0_i32_2 = arith.constant 0 : i32
    return %c0_i32, %c0_i32_0, %c0_i32_1 : i32, i32, i32
  }
  func.func @transform_9(%arg0: i32) -> (i32, i32, i32) {
    %c0_i32 = arith.constant 0 : i32
    %c0_i32_0 = arith.constant 0 : i32
    %c0_i32_1 = arith.constant 0 : i32
    %c0_i32_2 = arith.constant 0 : i32
    return %c0_i32, %c0_i32_0, %c0_i32_1 : i32, i32, i32
  }
  func.func @transform_10(%arg0: i32) -> (i32, i32) {
    %c0_i32 = arith.constant 0 : i32
    %c0_i32_0 = arith.constant 0 : i32
    %c0_i32_1 = arith.constant 0 : i32
    return %c0_i32, %c0_i32_0 : i32, i32
  }
  func.func @transform_11(%arg0: i32) -> (i32, i32) {
    %c0_i32 = arith.constant 0 : i32
    %c0_i32_0 = arith.constant 0 : i32
    %c0_i32_1 = arith.constant 0 : i32
    return %c0_i32, %c0_i32_0 : i32, i32
  }
  func.func @transform_12(%arg0: i32) -> (i32, i32) {
    %c0_i32 = arith.constant 0 : i32
    %c0_i32_0 = arith.constant 0 : i32
    %c0_i32_1 = arith.constant 0 : i32
    return %c0_i32, %c0_i32_0 : i32, i32
  }
  func.func @transform_13(%arg0: i32) -> (i32, i32) {
    %c0_i32 = arith.constant 0 : i32
    %c0_i32_0 = arith.constant 0 : i32
    %c0_i32_1 = arith.constant 0 : i32
    return %c0_i32, %c0_i32_0 : i32, i32
  }
  func.func @transform_14(%arg0: i32) -> (i32, i32) {
    %c0_i32 = arith.constant 0 : i32
    %c0_i32_0 = arith.constant 0 : i32
    %c0_i32_1 = arith.constant 0 : i32
    return %c0_i32, %c0_i32_0 : i32, i32
  }
  func.func @transform_15(%arg0: i32) -> (i32, i32) {
    %c0_i32 = arith.constant 0 : i32
    %c0_i32_0 = arith.constant 0 : i32
    %c0_i32_1 = arith.constant 0 : i32
    return %c0_i32, %c0_i32_0 : i32, i32
  }
  func.func @transform_16(%arg0: i32) -> (i32, i32) {
    %c0_i32 = arith.constant 0 : i32
    %c0_i32_0 = arith.constant 0 : i32
    %c0_i32_1 = arith.constant 0 : i32
    return %c0_i32, %c0_i32_0 : i32, i32
  }
  func.func @transform_17(%arg0: i32) -> (i32, i32) {
    %c0_i32 = arith.constant 0 : i32
    %c0_i32_0 = arith.constant 0 : i32
    %c0_i32_1 = arith.constant 0 : i32
    return %c0_i32, %c0_i32_0 : i32, i32
  }
  func.func @transform_18(%arg0: i32) -> (i32, i32, i32) {
    %c0_i32 = arith.constant 0 : i32
    %c0_i32_0 = arith.constant 0 : i32
    %c0_i32_1 = arith.constant 0 : i32
    return %arg0, %c0_i32, %c0_i32_0 : i32, i32, i32
  }
}

</mosaic_0001>

<bundles_post_ra>
// kernel: tpu_custom_call.1
= control target key start
LH: loop header
LB: loop body
LE: loop exit
PB: predicated region body
PF: predicated region fallthrough
CT: control target
= control target key end

     0   :  { %s5223_s0 = inlined_call_operand.vmem [shape: f32[3,4], index: 0, kind: input, shape index: {}]   ;;  %s5224_s1 = inlined_call_operand.vmem [shape: f32[2,64,256], index: 1, kind: input, shape index: {}]   ;;  %s5225_s2 = inlined_call_operand.vmem [shape: f32[64,64], index: 2, kind: input, shape index: {}]   ;;  %s5226_s3 = inlined_call_operand.vmem [shape: f32[64,1], index: 3, kind: input, shape index: {}]   ;;  %s5227_s4 = inlined_call_operand.vmem [shape: f32[64,1], index: 4, kind: input, shape index: {}]   ;;  %s5228_s5 = inlined_call_operand.vmem [shape: f32[64,1], index: 5, kind: input, shape index: {}]   ;;  %s5229_s6 = inlined_call_operand.vmem [shape: f32[3,16,48], index: 6, kind: input, shape index: {}]   ;;  %s5230_s7 = inlined_call_operand.vmem [shape: f32[3,16,1], index: 7, kind: input, shape index: {}]   ;;  %s5231_s8 = inlined_call_operand.vmem [shape: f32[3,16,1], index: 8, kind: input, shape index: {}]   ;;  %s5232_s9 = inlined_call_operand.vmem [shape: f32[3,16,1], index: 9, kind: input, shape index: {}]   ;;  %s5233_s10 = inlined_call_operand.vmem [shape: bf16[64,64], index: 10, kind: input, shape index: {}]   ;;  %s5234_s11 = inlined_call_operand.vmem [shape: f32[64,1], index: 11, kind: input, shape index: {}]   ;;  %s5235_s12 = inlined_call_operand.vmem [shape: f32[64,1], index: 12, kind: input, shape index: {}]   ;;  %s5236_s13 = inlined_call_operand.vmem [shape: f32[64,1], index: 13, kind: input, shape index: {}]   ;;  %s5237_s14 = inlined_call_operand.vmem [shape: f32[8,64], index: 14, kind: input, shape index: {}]   ;;  %s5238_s15 = inlined_call_operand.vmem [shape: f32[8,1], index: 15, kind: input, shape index: {}]   ;;  %s5239_s16 = inlined_call_operand.vmem [shape: f32[64,8], index: 16, kind: input, shape index: {}]   ;;  %s5240_s17 = inlined_call_operand.vmem [shape: f32[64,1], index: 17, kind: input, shape index: {}]   ;;  %s5241_s18 = inlined_call_operand.hbm [shape: f32[2,64,256], index: 18, kind: output, shape index: {}]  }
   0x1   :  { %5255 = sst [smem:[#allocation16_spill]] %s5223_s0 }
   0x2   :  { %5256 = sst [smem:[#allocation17_spill]] %s5224_s1 }
   0x3   :  { %5257 = sst [smem:[#allocation18_spill]] %s5225_s2 }
   0x4   :  { %5258 = sst [smem:[#allocation19_spill]] %s5241_s18 }
   0x5   :  { %23 = vsyncpa [#allocation6], 0 }
   0x6   :  { %24 = vsyncpa [#allocation5], 0 }
   0x7   :  { %26 = vsyncpa [#allocation5 + $0x1], 0  ;;  %s3871_s27 = smov 0   ;;  %s3873_s28 = smov 0  }
   0x8   :  { %s3875_s29 = smov 0   ;;  %s3877_s30 = smov 0  }
   0x9 LB: > { %5259 = sst [smem:[#allocation10_spill]] %s3752_s27  ;;  %s3892_s0 = sadd.s32 4294967295, %s3764_s30   ;;  %s3764_s30 = sphi %s3877_s30, %s5277_s30   ;;  %s3760_s29 = sphi %s3875_s29, %s5279_s29   ;;  %s3756_s28 = sphi %s3873_s28, %s5281_s28   ;;  %s3752_s27 = sphi %s3871_s27, %s5280_s27  }
   0xa   : > { %5260 = sst [smem:[#allocation11_spill]] %s3760_s29  ;;  %s3120_s19 = sadd.s32 4294967294, %s3764_s30  }
   0xb   : > { %5261 = sst [smem:[#allocation12_spill]] %s3764_s30  ;;  %s3896_s1 = sadd.s32 1, %s3764_s30  }
   0xc   : > { %5262 = sst [smem:[#allocation13_spill]] %s3896_s1  ;;  %s422_s20 = sadd.s32 1, %s3760_s29 }
   0xd   : > { %s419_s21 = ssub.s32 %s3764_s30, %s3896_s1  ;;  %p432_p0 = scmp.ne.s32.totalorder %s3760_s29, %s3756_s28 }
   0xe   : > { %p420_p1 = scmp.eq.s32.totalorder %s419_s21, 0  ;;  %p433_p2 = scmp.eq.s32.totalorder %s3892_s0, 1 }
   0xf   : > { %p438_p3 = scmp.ne.s32.totalorder %s3756_s28, %s3752_s27  ;;  %p439_p4 = scmp.eq.s32.totalorder %s3120_s19, 1 }
  0x10   : > { %s3907_s22 = scalar_select %p420_p1, %s3760_s29, %s422_s20  }
  0x11   : > { %p3909_p5 = por %p433_p2, %p432_p0  ;;  %p3913_p6 = por %p439_p4, %p438_p3 }
  0x12   : > { %5263 = sst [smem:[#allocation14_spill]] %s3907_s22  ;;  %p3121_p7 = scmp.ge.s32.totalorder %s3764_s30, 1 }
  0x13   : > { %s5265_s23 = scalar_select %p3913_p6, 1, 0 }
  0x14   : > { %p446_p8 = scmp.lt.s32.totalorder %s3764_s30, 3  ;;  %p3405_p9 = scmp.eq.s32.totalorder %s3892_s0, 0 }
  0x15   : > { %5266 = sst [smem:[#allocation15_spill]] %s5265_s23  ;;  %s5268_s19 = sld [smem:[#allocation16_spill]] }
  0x16   : > { %p3920_p10 = pnand %p3121_p7, %p446_p8 }
  0x18   : > { %p3397_p11 = pneg %p3920_p10 }
  0x1a   : > { %p3398_p12 = pnand %p3405_p9, %p3397_p11 }
  0x1b   : > { %s459_s20 = sshll.u32 %s5268_s19, 4  ;;  %s460_s20 = int_to_ptr.vmem [resolvable:$true] %s459_s20 }
  0x1c   : > { %s3683_s21 = scalar_lea.vmem %s460_s20, 64  ;;  %p3685_p0 = pneg %p3398_p12 }
  0x1d   : > { %p3684_p13 = scmp.ne.s32.totalorder %s460_s20, %s3683_s21  ;;  %p3691_p3 = scmp.lt.s32.totalorder %s460_s20, %s460_s20 }
  0x1e   : > { %p3692_p4 = scmp.lt.s32.totalorder %s3683_s21, %s3683_s21 }
  0x1f   : > { %p3686_p1 = pnand %p3685_p0, %p3684_p13 }
  0x20   : > { %p3693_p7 = por %p3692_p4, %p3691_p3 }
  0x21   : > { %p3687_p2 = pneg %p3686_p1 }
  0x23   : > { %p3694_p8 = pnand %p3693_p7, %p3687_p2 }
  0x25   : > { %3697 = shalt.err (!%p3694_p8)
}
  0x26   : > { %s3766_s22 = smov [#allocation4]   ;;  %528 = sbr.rel (%p3920_p10) target bundleno = 2497 (0x9c1), region = 92 }
  0x27   : > { %3400 = dma.vmem_to_smem (!%p3398_p12), %s460_s20, 64, %s3766_s22, [#allocation6]  }
  0x2d   : > { %3743 = dma.done.wait (%p3405_p9), [#allocation6], 64  }
  0x2e   : > { %3745 = vsyncadd (%p3405_p9), [#allocation6], 4294967232 }
  0x2f   : > { %534 = sfence }
  0x30   : > { %p583_p11 = scmp.lt.s32.totalorder %s3892_s0, 1  ;;  %v3767_v0 = vmov 0.0   ;;  %v3768_v1 = vmov 0   ;;  %v619_v2 = vld [vmem:[%s5226_s3 + $0x30] sm:$0xff]  ;;  %v613_v3 = vld [vmem:[%s5226_s3] sm:$0xff]  ;;  %v620_v4 = vld [vmem:[%s5226_s3 + $0x38] sm:$0xff] }
  0x31   : > { %750 = vmatprep.mubr.f32.mxu0 %v3767_v0  ;;  %1105 = vmatprep.mubr.f32.mxu1 %v3767_v0  ;;  %s5269_s27 = sld [smem:[#allocation17_spill]]  ;;  %v614_v5 = vld [vmem:[%s5226_s3 + $0x8] sm:$0xff]  ;;  %v821_v9 = vld [vmem:[%s5227_s4 + $0x30] sm:$0xff]  ;;  %v822_v20 = vld [vmem:[%s5227_s4 + $0x38] sm:$0xff]  ;;  %vm661_vm0 = vcmask 523264   ;;  %vm947_vm1 = vcmask 1048128  }
  0x32   : > { %s584_s25 = scalar_select %p583_p11, %s3892_s0, 1  ;;  %3449 = vset.pattern.permute.xlu0 %v3768_v1  ;;  %3450 = vset.pattern.permute.xlu1 %v3768_v1  ;;  %v815_v23 = vld [vmem:[%s5227_s4] sm:$0xff]  ;;  %v816_v28 = vld [vmem:[%s5227_s4 + $0x8] sm:$0xff]  ;;  %v885_v33 = vld [vmem:[%s5228_s5 + $0x30] sm:$0xff]  ;;  %vm1034_vm4 = vcmask 392192   ;;  %vm3772_vm6 = vmmov 0  }
  0x33   : > { %653 = vperm.xlu0 %3449, %v619_v2   ;;  %623 = vperm.xlu1 %3450, %v613_v3   ;;  %v886_v34 = vld [vmem:[%s5228_s5 + $0x38] sm:$0xff]  ;;  %v879_v36 = vld [vmem:[%s5228_s5] sm:$0xff]  ;;  %v880_v37 = vld [vmem:[%s5228_s5 + $0x8] sm:$0xff]  ;;  %s5251_s1 = smov 126   ;;  %s5271_s23 = smov 2   ;;  %vm2774_vm7 = vcmask 64512  }
  0x34   : > { %s3202_s20 = sshll.u32 %s584_s25, 7  ;;  %s1255_s25 = sld [smem:[#allocation4]] }
  0x35   : > { %s3141_s26 = sld [smem:[#allocation4 + $0x1]]  ;;  %s3156_s19 = sld [smem:[#allocation4 + $0x80]] }
  0x36   : > { %s3158_s18 = sld [smem:[#allocation4 + $0x82]]  ;;  %s3175_s29 = sld [smem:[#allocation4 + $0x100]] }
  0x37   : > { %s3955_s30 = scalar_lea.vmem %s5269_s27, %s3202_s20  ;;  %658 = vperm.xlu0 %3449, %v620_v4   ;;  %628 = vperm.xlu1 %3450, %v614_v5   ;;  %s5270_s20 = sld [smem:[#allocation18_spill]] }
  0x38   : > { %v590_v6 = vld [vmem:[%s3955_s30 + $0x8] sm:$0xff]  ;;  %v592_v7 = vld [vmem:[%s3955_s30 + $0x18] sm:$0xff]  ;;  %v589_v8 = vld [vmem:[%s3955_s30] sm:$0xff]  ;;  %s5249_s27 = smov 2   ;;  %s3773_s22 = smov [#allocation7]  }
  0x39   : > { %v3255_v10 = vpack.c.bf16 %v592_v7, %v590_v6  ;;  %v591_v11 = vld [vmem:[%s3955_s30 + $0x10] sm:$0xff]  ;;  %v594_v12 = vld [vmem:[%s3955_s30 + $0x28] sm:$0xff]  ;;  %v596_v13 = vld [vmem:[%s3955_s30 + $0x38] sm:$0xff]  ;;  %s3702_s24 = sshll.u32 %s3773_s22, 4  ;;  %s3703_s24 = int_to_ptr.vmem [resolvable:$false] %s3702_s24 }
  0x3a   : > { %v3257_v14 = vpack.c.bf16 %v591_v11, %v589_v8  ;;  %v3259_v15 = vpack.c.bf16 %v596_v13, %v594_v12  ;;  %v593_v16 = vld [vmem:[%s3955_s30 + $0x20] sm:$0xff]  ;;  %v595_v17 = vld [vmem:[%s3955_s30 + $0x30] sm:$0xff]  ;;  %v598_v18 = vld [vmem:[%s3955_s30 + $0x48] sm:$0xff] }
  0x3b   : > { %3256 = vmatprep.subr.bf16.mxu0 %v3255_v10  ;;  %v600_v19 = vld [vmem:[%s3955_s30 + $0x58] sm:$0xff]  ;;  %v3261_v21 = vpack.c.bf16 %v595_v17, %v593_v16  ;;  %v597_v22 = vld [vmem:[%s3955_s30 + $0x40] sm:$0xff]  ;;  %v599_v25 = vld [vmem:[%s3955_s30 + $0x50] sm:$0xff]  ;;  %855 = vperm.xlu0 %3449, %v821_v9  }
  0x3c   : > { %3258 = vmatpush1.bf16.msra.mxu0 %v3257_v14  ;;  %v3263_v24 = vpack.c.bf16 %v600_v19, %v598_v18  ;;  %v602_v26 = vld [vmem:[%s3955_s30 + $0x68] sm:$0xff]  ;;  %v604_v27 = vld [vmem:[%s3955_s30 + $0x78] sm:$0xff]  ;;  %860 = vperm.xlu1 %3450, %v822_v20   ;;  %v3265_v29 = vpack.c.bf16 %v599_v25, %v597_v22  ;;  %v601_v31 = vld [vmem:[%s3955_s30 + $0x60] sm:$0xff] }
  0x3d   : > { %3260 = vmatprep.subr.bf16.mxu0 %v3259_v15  ;;  %v3267_v30 = vpack.c.bf16 %v604_v27, %v602_v26  ;;  %v603_v32 = vld [vmem:[%s3955_s30 + $0x70] sm:$0xff]  ;;  %v605_v38 = vld [vmem:[%s5270_s20] sm:$0xff]  ;;  %v606_v39 = vld [vmem:[%s5270_s20 + $0x8] sm:$0xff] }
  0x3e   : > { %v3269_v35 = vpack.c.bf16 %v603_v32, %v601_v31  ;;  %v607_v40 = vld [vmem:[%s5270_s20 + $0x10] sm:$0xff]  ;;  %v608_v41 = vld [vmem:[%s5270_s20 + $0x18] sm:$0xff]  ;;  %v609_v42 = vld [vmem:[%s5270_s20 + $0x20] sm:$0xff] }
  0x3f   : > { %825 = vperm.xlu0 %3449, %v815_v23   ;;  %v610_v43 = vld [vmem:[%s5270_s20 + $0x28] sm:$0xff]  ;;  %v611_v44 = vld [vmem:[%s5270_s20 + $0x30] sm:$0xff]  ;;  %v612_v45 = vld [vmem:[%s5270_s20 + $0x38] sm:$0xff] }
  0x40   : > { %3262 = vmatpush1.bf16.msra.mxu0 %v3261_v21  ;;  %830 = vperm.xlu1 %3450, %v816_v28  }
  0x41   : > { %3264 = vmatprep.subr.bf16.mxu0 %v3263_v24 }
  0x43   : > { %919 = vperm.xlu0 %3449, %v885_v33  }
  0x44   : > { %3266 = vmatpush1.bf16.msra.mxu0 %v3265_v29  ;;  %924 = vperm.xlu1 %3450, %v886_v34  }
  0x45   : > { %3268 = vmatprep.subr.bf16.mxu0 %v3267_v30 }
  0x47   : > { %889 = vperm.xlu0 %3449, %v879_v36  }
  0x48   : > { %3270 = vmatpush1.bf16.msra.mxu0 %v3269_v35  ;;  %894 = vperm.xlu1 %3450, %v880_v37  }
  0x4b   : > { %3129 = vmatmul.mubr.msk.f32.vlgmr.msra.gmra.mrb[0].mxu0 %vm661_vm0, %v605_v38 }
  0x4c   : > { %756 = vmatprep.mubr.f32.mxu0 %v3767_v0 }
  0x4f   : > { %3130 = vmatmul.mubr.msk.f32.gmra.mrb[2].mxu0 %vm661_vm0, %v606_v39 }
  0x50   : > { %762 = vmatprep.mubr.f32.mxu0 %v3767_v0 }
  0x53   : > { %3131 = vmatmul.mubr.msk.f32.gmra.mrb[4].mxu0 %vm661_vm0, %v607_v40 }
  0x54   : > { %768 = vmatprep.mubr.f32.mxu0 %v3767_v0 }
  0x57   : > { %3132 = vmatmul.mubr.msk.f32.gmra.mrb[6].mxu0 %vm661_vm0, %v608_v41 }
  0x58   : > { %774 = vmatprep.mubr.f32.mxu0 %v3767_v0 }
  0x5b   : > { %3133 = vmatmul.mubr.msk.f32.gmra.mrb[8].mxu0 %vm661_vm0, %v609_v42 }
  0x5c   : > { %780 = vmatprep.mubr.f32.mxu0 %v3767_v0 }
  0x5f   : > { %3134 = vmatmul.mubr.msk.f32.gmra.mrb[10].mxu0 %vm661_vm0, %v610_v43 }
  0x60   : > { %786 = vmatprep.mubr.f32.mxu0 %v3767_v0 }
  0x63   : > { %3135 = vmatmul.mubr.msk.f32.gmra.mrb[12].mxu0 %vm661_vm0, %v611_v44 }
  0x64   : > { %792 = vmatprep.mubr.f32.mxu0 %v3767_v0 }
  0x67   : > { %3136 = vmatmul.mubr.msk.f32.gmra.mrb[14].mxu0 %vm661_vm0, %v612_v45 }
  0x68   : > { %1528 = vmatprep.mubr.f32.mxu0 %v3767_v0 }
  0xb2   : > { %v654_v46 = vpop.permute.xlu0 %653  ;;  %v624_v47 = vpop.permute.xlu1 %623 }
  0xb6   : > { %v659_v48 = vpop.permute.xlu0 %658  ;;  %v629_v49 = vpop.permute.xlu1 %628 }
  0xba   : > { %v856_v50 = vpop.permute.xlu0 %855 }
  0xbb   : > { %v861_v51 = vpop.permute.xlu1 %860 }
  0xbe   : > { %v826_v52 = vpop.permute.xlu0 %825 }
  0xbf   : > { %v831_v53 = vpop.permute.xlu1 %830 }
  0xc2   : > { %v920_v54 = vpop.permute.xlu0 %919 }
  0xc3   : > { %v925_v59 = vpop.permute.xlu1 %924 }
  0xc6   : > { %v890_v3 = vpop.permute.xlu0 %889 }
  0xc7   : > { %v895_v11 = vpop.permute.xlu1 %894 }
 0x11e   : > { %v752_v55 = vpop.f32.mrb[0].mxu0 }
 0x11f   : > { %v753_v56 = vadd.f32 %v752_v55, %v624_v47  ;;  %v754_v57 = vpop.f32.mrb[1].mxu0  ;;  %v1022_v55 = vld [vmem:[%s5230_s7] sm:$0xff] }
 0x120   : > { %v755_v58 = vadd.f32 %v754_v57, %v624_v47  ;;  %v1203_v57 = vld [vmem:[%s5231_s8] sm:$0xff] }
 0x121   : > { %v799_v60 = vmax.f32 %v753_v56, 0.0  ;;  %v615_v56 = vld [vmem:[%s5226_s3 + $0x10] sm:$0xff] }
 0x122   : > { %v800_v61 = vmax.f32 %v755_v58, 0.0  ;;  %v758_v62 = vpop.f32.mrb[2].mxu0  ;;  %v1023_v58 = vld [vmem:[%s5230_s7 + $0x8] sm:$0xff] }
 0x123   : > { %v759_v63 = vadd.f32 %v758_v62, %v629_v49  ;;  %v760_v2 = vpop.f32.mrb[3].mxu0  ;;  %v863_v6 = vmul.f32 %v826_v52, %v799_v60  ;;  %v616_v60 = vld [vmem:[%s5226_s3 + $0x18] sm:$0xff]  ;;  %v1204_v62 = vld [vmem:[%s5231_s8 + $0x8] sm:$0xff] }
 0x124   : > { %v864_v4 = vmul.f32 %v826_v52, %v800_v61  ;;  %v761_v5 = vadd.f32 %v760_v2, %v629_v49  ;;  %v1223_v61 = vld [vmem:[%s5232_s9] sm:$0xff]  ;;  %v818_v2 = vld [vmem:[%s5227_s4 + $0x18] sm:$0xff] }
 0x125   : > { %v801_v7 = vmax.f32 %v759_v63, 0.0  ;;  %v4044_v15 = vadd.f32 %v890_v3, %v863_v6  ;;  %v881_v63 = vld [vmem:[%s5228_s5 + $0x10] sm:$0xff]  ;;  %v984_v6 = vlaneseq }
 0x126   : > { %v802_v8 = vmax.f32 %v761_v5, 0.0  ;;  %v928_v9 = vadd.f32 %v890_v3, %v864_v4  ;;  %v4040_v10 = vpop.f32.mrb[4].mxu0  ;;  %v1224_v3 = vld [vmem:[%s5232_s9 + $0x8] sm:$0xff]  ;;  %v882_v4 = vld [vmem:[%s5228_s5 + $0x18] sm:$0xff] }
 0x127   : > { %v865_v12 = vmul.f32 %v831_v53, %v801_v7  ;;  %v4042_v13 = vpop.f32.mrb[5].mxu0 }
 0x128   : > { %v866_v14 = vmul.f32 %v831_v53, %v802_v8  ;;  %955 = vst [vmem:[#allocation2 + $0x18] sm:$0xff] %v928_v9  ;;  %v4138_v8 = vand.u32 127, %v984_v6 }
 0x129   : > { %958 = vst.msk [vmem:[#allocation2 + $0x18] sm:$0xff] %vm947_vm1, %v3767_v0  ;;  %v4048_v16 = vadd.f32 %v895_v11, %v865_v12 }
 0x12a   : > { %v930_v17 = vadd.f32 %v895_v11, %v866_v14  ;;  %v4050_v18 = vpop.f32.mrb[6].mxu0  ;;  %vm986_vm2 = vcmp.lt.s32.totalorder %v4138_v8, 2  ;;  %vm1011_vm3 = vcmp.lt.s32.totalorder %v4138_v8, 126 }
 0x12b   : > { %v4052_v19 = vpop.f32.mrb[7].mxu0  ;;  %v3466_v20 = vpack.i.bf16 %v4048_v16, %v4044_v15  ;;  %v3289_v21 = vpack.c.bf16 %v4048_v16, %v4044_v15 }
 0x12c   : > { %957 = vst [vmem:[#allocation2 + $0x58] sm:$0xff] %v930_v17 }
 0x12d   : > { %959 = vst.msk [vmem:[#allocation2 + $0x58] sm:$0xff] %vm947_vm1, %v3767_v0 }
 0x12e   : > { %v4060_v22 = vpop.f32.mrb[8].mxu0 }
 0x12f   : > { %v4062_v23 = vpop.f32.mrb[9].mxu0 }
 0x132   : > { %v4064_v24 = vpop.f32.mrb[10].mxu0 }
 0x133   : > { %v4066_v25 = vpop.f32.mrb[11].mxu0 }
 0x134   : > { %v4077_v47 = vld [vmem:[#allocation2 + $0x58] sm:$0xff] }
 0x136   : > { %v788_v26 = vpop.f32.mrb[12].mxu0 }
 0x137   : > { %v789_v27 = vadd.f32 %v788_v26, %v654_v46  ;;  %v790_v28 = vpop.f32.mrb[13].mxu0 }
 0x138   : > { %v791_v29 = vadd.f32 %v790_v28, %v654_v46  ;;  %v4075_v46 = vld [vmem:[#allocation2 + $0x18] sm:$0xff] }
 0x139   : > { %v811_v30 = vmax.f32 %v789_v27, 0.0 }
 0x13a   : > { %v812_v31 = vmax.f32 %v791_v29, 0.0  ;;  %v794_v32 = vpop.f32.mrb[14].mxu0 }
 0x13b   : > { %v795_v33 = vadd.f32 %v794_v32, %v659_v48  ;;  %v796_v34 = vpop.f32.mrb[15].mxu0  ;;  %v875_v37 = vmul.f32 %v856_v50, %v811_v30 }
 0x13c   : > { %v876_v35 = vmul.f32 %v856_v50, %v812_v31  ;;  %v797_v36 = vadd.f32 %v796_v34, %v659_v48 }
 0x13d   : > { %v813_v38 = vmax.f32 %v795_v33, 0.0  ;;  %v939_v43 = vadd.f32 %v920_v54, %v875_v37 }
 0x13e   : > { %v4068_v39 = vadd.f32 %v920_v54, %v876_v35  ;;  %v814_v40 = vmax.f32 %v797_v36, 0.0 }
 0x13f   : > { %v877_v41 = vmul.f32 %v861_v51, %v813_v38 }
 0x140   : > { %944 = vst [vmem:[#allocation2 + $0x8] sm:$0xff] %v4068_v39  ;;  %v878_v42 = vmul.f32 %v861_v51, %v814_v40  ;;  %v3461_v51 = vpack.i.bf16 %v4077_v47, %v4075_v46 }
 0x141   : > { %948 = vst.msk [vmem:[#allocation2 + $0x8] sm:$0xff] %vm947_vm1, %v3767_v0  ;;  %v941_v44 = vadd.f32 %v925_v59, %v877_v41 }
 0x142   : > { %v4073_v45 = vadd.f32 %v925_v59, %v878_v42  ;;  %v817_v59 = vld [vmem:[%s5227_s4 + $0x10] sm:$0xff] }
 0x143   : > { %v4079_v48 = vpack.c.bf16 %v941_v44, %v939_v43  ;;  %v3451_v49 = vpack.i.bf16 %v941_v44, %v939_v43 }
 0x144   : > { %946 = vst [vmem:[#allocation2 + $0x48] sm:$0xff] %v4073_v45  ;;  %v951_v50 = vpack.c.bf16 %v4073_v45, %v4068_v39  ;;  %v3633_v39 = vld [vmem:[%s5233_s10 + $0x10] sm:$0xff]   ;;  %v3634_v45 = vld [vmem:[%s5233_s10 + $0x18] sm:$0xff]  }
 0x145   : > { %949 = vst.msk [vmem:[#allocation2 + $0x48] sm:$0xff] %vm947_vm1, %v3767_v0  ;;  %3452 = vrot.lane.b32.xlu0 %v3451_v49, %s5249_s27 }
 0x148   : > { %v4090_v52 = vld [vmem:[#allocation2 + $0x8] sm:$0xff] }
 0x149   : > { %3462 = vrot.lane.b32.xlu0 %v3461_v51, %s5249_s27 }
 0x14c   : > { %v4092_v53 = vld [vmem:[#allocation2 + $0x48] sm:$0xff] }
 0x14d   : > { %v3456_v54 = vpack.i.bf16 %v4092_v53, %v4090_v52  ;;  %3467 = vrot.lane.b32.xlu0 %v3466_v20, %s5251_s1  ;;  %v3275_v36 = vpack.c.bf16 %v4092_v53, %v4090_v52 }
 0x14f   : > { %3457 = vrot.lane.b32.xlu1 %v3456_v54, %s5249_s27 }
 0x151   : > { %3482 = vrot.lane.b32.xlu0 %v3466_v20, %s5249_s27  ;;  %s5272_s27 = smov 126  }
 0x153   : > { %3472 = vrot.lane.b32.xlu1 %v3456_v54, %s5251_s1 }
 0x155   : > { %1026 = vperm.xlu0 %3449, %v1022_v55  }
 0x157   : > { %3477 = vrot.lane.b32.xlu1 %v3451_v49, %s5251_s1 }
 0x159   : > { %633 = vperm.xlu0 %3449, %v615_v56  }
 0x15b   : > { %3487 = vrot.lane.b32.xlu1 %v3461_v51, %s5251_s1  ;;  %s3157_s1 = sld [smem:[#allocation4 + $0x81]] }
 0x15d   : > { %1207 = vperm.xlu0 %3449, %v1203_v57  }
 0x15f   : > { %1031 = vperm.xlu1 %3450, %v1023_v58  }
 0x161   : > { %835 = vperm.xlu0 %3449, %v817_v59  }
 0x163   : > { %638 = vperm.xlu1 %3450, %v616_v60  }
 0x165   : > { %1227 = vperm.xlu0 %3449, %v1223_v61  }
 0x167   : > { %1212 = vperm.xlu1 %3450, %v1204_v62  }
 0x169   : > { %899 = vperm.xlu0 %3449, %v881_v63  }
 0x16b   : > { %840 = vperm.xlu1 %3450, %v818_v2  }
 0x16f   : > { %1232 = vperm.xlu1 %3450, %v1224_v3  }
 0x173   : > { %904 = vperm.xlu1 %3450, %v882_v4   ;;  %v1020_v4 = vld [vmem:[%s5229_s6] sm:$0xff] }
 0x1b7   : > { %v3453_v5 = vpop.permute.xlu0 %3452 }
 0x1b8   : > { %v3455_v14 = vunpack.i.h.bf16 %v3453_v5  ;;  %v3454_v17 = vunpack.i.l.bf16 %v3453_v5  ;;  %v3287_v5 = vpack.c.bf16 %v4077_v47, %v4075_v46 }
 0x1bb   : > { %v3463_v7 = vpop.permute.xlu0 %3462 }
 0x1bc   : > { %v3465_v9 = vunpack.i.h.bf16 %v3463_v7  ;;  %v3464_v11 = vunpack.i.l.bf16 %v3463_v7  ;;  %v1021_v7 = vld [vmem:[%s5229_s6 + $0x8] sm:$0xff] }
 0x1be   : > { %v993_v28 = vsel %vm986_vm2, %v3464_v11, %v3454_v17  ;;  %v994_v29 = vsel %vm986_vm2, %v3465_v9, %v3455_v14 }
 0x1bf   : > { %v3468_v12 = vpop.permute.xlu0 %3467  ;;  %v3273_v34 = vpack.c.bf16 %v994_v29, %v993_v28 }
 0x1c0   : > { %v3470_v40 = vunpack.i.h.bf16 %v3468_v12  ;;  %v3469_v41 = vunpack.i.l.bf16 %v3468_v12 }
 0x1c1   : > { %v3458_v20 = vpop.permute.xlu1 %3457 }
 0x1c2   : > { %v3460_v26 = vunpack.i.h.bf16 %v3458_v20  ;;  %v3459_v27 = vunpack.i.l.bf16 %v3458_v20 }
 0x1c3   : > { %v3483_v35 = vpop.permute.xlu0 %3482 }
 0x1c4   : > { %v991_v30 = vsel %vm986_vm2, %v3454_v17, %v3459_v27  ;;  %v992_v31 = vsel %vm986_vm2, %v3455_v14, %v3460_v26  ;;  %v3485_v42 = vunpack.i.h.bf16 %v3483_v35  ;;  %v3484_v43 = vunpack.i.l.bf16 %v3483_v35 }
 0x1c5   : > { %v3473_v32 = vpop.permute.xlu1 %3472  ;;  %v3271_v33 = vpack.c.bf16 %v992_v31, %v991_v30 }
 0x1c6   : > { %v3475_v37 = vunpack.i.h.bf16 %v3473_v32  ;;  %v3474_v38 = vunpack.i.l.bf16 %v3473_v32  ;;  %v987_v57 = vsel %vm986_vm2, %v3484_v43, %v3464_v11  ;;  %v988_v58 = vsel %vm986_vm2, %v3485_v42, %v3465_v9 }
 0x1c7   : > { %3272 = vmatprep.subr.bf16.mxu1 %v3271_v33  ;;  %v990_v61 = vsel %vm986_vm2, %v3460_v26, %v3485_v42  ;;  %v989_v62 = vsel %vm986_vm2, %v3459_v27, %v3484_v43  ;;  %v3283_v63 = vpack.c.bf16 %v988_v58, %v987_v57 }
 0x1c8   : > { %3274 = vmatpush1.bf16.msra.mxu1 %v3273_v34  ;;  %v1014_v44 = vsel %vm1011_vm3, %v3474_v38, %v3469_v41  ;;  %v1015_v49 = vsel %vm1011_vm3, %v3475_v37, %v3470_v40  ;;  %v3285_v6 = vpack.c.bf16 %v990_v61, %v989_v62 }
 0x1c9   : > { %v3478_v51 = vpop.permute.xlu1 %3477  ;;  %3276 = vmatprep.subr.bf16.mxu1 %v3275_v36  ;;  %v3279_v53 = vpack.c.bf16 %v1015_v49, %v1014_v44 }
 0x1ca   : > { %v3480_v54 = vunpack.i.h.bf16 %v3478_v51  ;;  %v3479_v52 = vunpack.i.l.bf16 %v3478_v51 }
 0x1cc   : > { %3278 = vmatpush1.bf16.msra.mxu1 %v4079_v48  ;;  %v1016_v55 = vsel %vm1011_vm3, %v3479_v52, %v3474_v38  ;;  %v1017_v56 = vsel %vm1011_vm3, %v3480_v54, %v3475_v37 }
 0x1cd   : > { %v3488_v59 = vpop.permute.xlu1 %3487  ;;  %3280 = vmatprep.subr.bf16.mxu1 %v3279_v53  ;;  %v3281_v60 = vpack.c.bf16 %v1017_v56, %v1016_v55 }
 0x1ce   : > { %v3490_v2 = vunpack.i.h.bf16 %v3488_v59  ;;  %v3489_v3 = vunpack.i.l.bf16 %v3488_v59 }
 0x1d0   : > { %3282 = vmatpush1.bf16.msra.mxu1 %v3281_v60  ;;  %v1018_v9 = vsel %vm1011_vm3, %v3489_v3, %v3479_v52  ;;  %v1019_v11 = vsel %vm1011_vm3, %v3490_v2, %v3480_v54  ;;  %v1012_v46 = vsel %vm1011_vm3, %v3469_v41, %v3489_v3  ;;  %v1013_v47 = vsel %vm1011_vm3, %v3470_v40, %v3490_v2 }
 0x1d1   : > { %3284 = vmatprep.subr.bf16.mxu1 %v3283_v63  ;;  %v3291_v14 = vpack.c.bf16 %v1019_v11, %v1018_v9  ;;  %v3293_v26 = vpack.c.bf16 %v1013_v47, %v1012_v46 }
 0x1d3   : > { %3137 = vmatmul.mubr.msk.f32.vlgmr.msra.gmra.mrb[0].mxu1 %vm1034_vm4, %v1020_v4 }
 0x1d4   : > { %3286 = vmatpush1.bf16.msra.mxu1 %v3285_v6  ;;  %1111 = vmatprep.mubr.f32.mxu1 %v3767_v0  ;;  %v4183_v12 = vpop.permute.xlu0 %1026 }
 0x1d5   : > { %3288 = vmatprep.subr.bf16.mxu1 %v3287_v5 }
 0x1d7   : > { %3138 = vmatmul.mubr.msk.f32.gmra.mrb[2].mxu1 %vm1034_vm4, %v1021_v7 }
 0x1d8   : > { %3290 = vmatpush1.bf16.msra.mxu1 %v3289_v21  ;;  %1182 = vmatprep.mubr.f32.mxu1 %v3767_v0  ;;  %v634_v17 = vpop.permute.xlu0 %633 }
 0x1d9   : > { %3292 = vmatprep.subr.bf16.mxu1 %v3291_v14  ;;  %v765_v20 = vadd.f32 %v4040_v10, %v634_v17  ;;  %v767_v15 = vadd.f32 %v4042_v13, %v634_v17 }
 0x1db   : > { %v803_v29 = vmax.f32 %v765_v20, 0.0  ;;  %v804_v32 = vmax.f32 %v767_v15, 0.0 }
 0x1dc   : > { %3294 = vmatpush1.bf16.msra.mxu1 %v3293_v26  ;;  %v4195_v27 = vpop.permute.xlu0 %1207 }
 0x1de   : > { %v4197_v28 = vpop.permute.xlu1 %1031 }
 0x1df   : > { %3139 = vmatmul.mubr.msk.f32.vlgmr.msra.gmra.mrb[4].mxu1 %vm1034_vm4, %v1020_v4 }
 0x1e0   : > { %1188 = vmatprep.mubr.f32.mxu1 %v3767_v0  ;;  %v836_v30 = vpop.permute.xlu0 %835 }
 0x1e1   : > { %v867_v16 = vmul.f32 %v836_v30, %v803_v29  ;;  %v868_v34 = vmul.f32 %v836_v30, %v804_v32 }
 0x1e2   : > { %v639_v21 = vpop.permute.xlu1 %638 }
 0x1e3   : > { %v771_v31 = vadd.f32 %v4050_v18, %v639_v21  ;;  %3140 = vmatmul.mubr.msk.f32.gmra.mrb[6].mxu1 %vm1034_vm4, %v1021_v7  ;;  %v773_v13 = vadd.f32 %v4052_v19, %v639_v21 }
 0x1e4   : > { %v4204_v10 = vpop.permute.xlu0 %1227  ;;  %1451 = vmatprep.mubr.f32.mxu1 %v3767_v0 }
 0x1e5   : > { %v805_v36 = vmax.f32 %v771_v31, 0.0  ;;  %v806_v41 = vmax.f32 %v773_v13, 0.0 }
 0x1e6   : > { %v4207_v33 = vpop.permute.xlu1 %1212 }
 0x1e8   : > { %v900_v35 = vpop.permute.xlu0 %899 }
 0x1e9   : > { %v932_v37 = vadd.f32 %v900_v35, %v868_v34  ;;  %v4214_v44 = vadd.f32 %v900_v35, %v867_v16 }
 0x1ea   : > { %v841_v38 = vpop.permute.xlu1 %840 }
 0x1eb   : > { %v869_v40 = vmul.f32 %v841_v38, %v805_v36  ;;  %1276 = vst [vmem:[#allocation2 + $0x28] sm:$0xff] %v932_v37  ;;  %v870_v42 = vmul.f32 %v841_v38, %v806_v41  ;;  %v1256_v37 = vstv %s1255_s25  ;;  %v1262_v38 = vstv %s3141_s26  ;;  %s4907_s25 = sld [smem:[#allocation4 + $0x102]]  ;;  %s4910_s26 = sld [smem:[#allocation4 + $0x103]] }
 0x1ec   : > { %1279 = vst.msk [vmem:[#allocation2 + $0x28] sm:$0xff] %vm947_vm1, %v3767_v0 }
 0x1ee   : > { %v4212_v18 = vpop.permute.xlu1 %1232 }
 0x1f2   : > { %v905_v43 = vpop.permute.xlu1 %904 }
 0x1f3   : > { %v4216_v49 = vadd.f32 %v905_v43, %v869_v40  ;;  %v934_v51 = vadd.f32 %v905_v43, %v870_v42  ;;  %v4226_v52 = vld [vmem:[#allocation2 + $0x28] sm:$0xff] }
 0x1f5   : > { %1278 = vst [vmem:[#allocation2 + $0x68] sm:$0xff] %v934_v51  ;;  %v4220_v54 = vpack.i.bf16 %v4216_v49, %v4214_v44  ;;  %v3325_v19 = vpack.c.bf16 %v4216_v49, %v4214_v44 }
 0x1f6   : > { %1280 = vst.msk [vmem:[#allocation2 + $0x68] sm:$0xff] %vm947_vm1, %v3767_v0 }
 0x1fd   : > { %v4228_v53 = vld [vmem:[#allocation2 + $0x68] sm:$0xff] }
 0x1fe   : > { %v4232_v55 = vpack.i.bf16 %v4228_v53, %v4226_v52 }
 0x200   : > { %3492 = vrot.lane.b32.xlu0 %v4232_v55, %s5271_s23 }
 0x2a6   : > { %v1107_v56 = vpop.f32.mrb[0].mxu1 }
 0x2a7   : > { %v1108_v57 = vadd.f32 %v1107_v56, %v4183_v12  ;;  %v1109_v58 = vpop.f32.mrb[1].mxu1 }
 0x2a8   : > { %v1110_v59 = vadd.f32 %v1109_v58, %v4183_v12 }
 0x2a9   : > { %v1195_v60 = vmax.f32 %v1108_v57, 0.0 }
 0x2aa   : > { %v1196_v61 = vmax.f32 %v1110_v59, 0.0  ;;  %v1113_v62 = vpop.f32.mrb[2].mxu1 }
 0x2ab   : > { %v1114_v63 = vadd.f32 %v1113_v62, %v4197_v28  ;;  %v1115_v2 = vpop.f32.mrb[3].mxu1  ;;  %v1215_v5 = vmul.f32 %v4195_v27, %v1195_v60 }
 0x2ac   : > { %v1216_v3 = vmul.f32 %v4195_v27, %v1196_v61  ;;  %v1116_v4 = vadd.f32 %v1115_v2, %v4197_v28 }
 0x2ad   : > { %v1199_v6 = vmax.f32 %v1114_v63, 0.0  ;;  %v4246_v47 = vadd.f32 %v4204_v10, %v1215_v5 }
 0x2ae   : > { %v1236_v7 = vadd.f32 %v4204_v10, %v1216_v3  ;;  %v1200_v9 = vmax.f32 %v1116_v4, 0.0 }
 0x2af   : > { %v1219_v11 = vmul.f32 %v4207_v33, %v1199_v6  ;;  %v1257_v56 = vmul.f32 %v1256_v37, %v4246_v47 }
 0x2b0   : > { %1244 = vst [vmem:[#allocation2 + $0x8] sm:$0xff] %v1236_v7  ;;  %v1220_v46 = vmul.f32 %v4207_v33, %v1200_v9  ;;  %v1258_v59 = vmul.f32 %v1256_v37, %v1236_v7 }
 0x2b1   : > { %1251 = vst.msk [vmem:[#allocation2 + $0x8] sm:$0xff] %vm947_vm1, %v3767_v0  ;;  %v4251_v14 = vadd.f32 %v4212_v18, %v1219_v11 }
 0x2b2   : > { %v1240_v17 = vadd.f32 %v4212_v18, %v1220_v46  ;;  %v1184_v20 = vpop.f32.mrb[4].mxu1 }
 0x2b3   : > { %v1185_v26 = vadd.f32 %v1184_v20, %v4183_v12  ;;  %v1186_v29 = vpop.f32.mrb[5].mxu1  ;;  %v3496_v30 = vpack.i.bf16 %v4251_v14, %v4246_v47  ;;  %v3301_v15 = vpack.c.bf16 %v4251_v14, %v4246_v47  ;;  %v1259_v63 = vmul.f32 %v1256_v37, %v4251_v14 }
 0x2b4   : > { %1248 = vst [vmem:[#allocation2 + $0x48] sm:$0xff] %v1240_v17  ;;  %v1187_v16 = vadd.f32 %v1186_v29, %v4183_v12  ;;  %v1260_v6 = vmul.f32 %v1256_v37, %v1240_v17  ;;  %v3145_v29 = vld [vmem:[%s5230_s7 + $0x18] sm:$0xff]  ;;  %v883_v37 = vld [vmem:[%s5228_s5 + $0x20] sm:$0xff] }
 0x2b5   : > { %1252 = vst.msk [vmem:[#allocation2 + $0x48] sm:$0xff] %vm947_vm1, %v3767_v0  ;;  %v1197_v21 = vmax.f32 %v1185_v26, 0.0  ;;  %3497 = vrot.lane.b32.xlu0 %v3496_v30, %s5271_s23 }
 0x2b6   : > { %v1198_v31 = vmax.f32 %v1187_v16, 0.0  ;;  %v1190_v32 = vpop.f32.mrb[6].mxu1  ;;  %v618_v16 = vld [vmem:[%s5226_s3 + $0x28] sm:$0xff] }
 0x2b7   : > { %v1217_v34 = vmul.f32 %v4195_v27, %v1197_v21  ;;  %v1191_v35 = vadd.f32 %v1190_v32, %v4197_v28  ;;  %v1192_v36 = vpop.f32.mrb[7].mxu1  ;;  %v3153_v21 = vld [vmem:[%s5231_s8 + $0x18] sm:$0xff]  ;;  %v819_v32 = vld [vmem:[%s5227_s4 + $0x20] sm:$0xff] }
 0x2b8   : > { %v1218_v13 = vmul.f32 %v4195_v27, %v1198_v31  ;;  %v1193_v40 = vadd.f32 %v1192_v36, %v4197_v28  ;;  %v4271_v51 = vld [vmem:[#allocation2 + $0x8] sm:$0xff] }
 0x2b9   : > { %v4268_v12 = vadd.f32 %v4204_v10, %v1217_v34  ;;  %v1201_v41 = vmax.f32 %v1191_v35, 0.0  ;;  %v820_v31 = vld [vmem:[%s5227_s4 + $0x28] sm:$0xff]  ;;  %v3155_v34 = vld [vmem:[%s5232_s9 + $0x18] sm:$0xff]  ;;  %v3154_v35 = vld [vmem:[%s5232_s9 + $0x10] sm:$0xff] }
 0x2ba   : > { %v1238_v42 = vadd.f32 %v4204_v10, %v1218_v13  ;;  %v1202_v43 = vmax.f32 %v1193_v40, 0.0  ;;  %v884_v36 = vld [vmem:[%s5228_s5 + $0x28] sm:$0xff] }
 0x2bb   : > { %v1263_v57 = vmul.f32 %v1262_v38, %v4268_v12  ;;  %v1221_v58 = vmul.f32 %v4207_v33, %v1201_v41 }
 0x2bc   : > { %1246 = vst [vmem:[#allocation2 + $0x18] sm:$0xff] %v1238_v42  ;;  %v1264_v27 = vmul.f32 %v1262_v38, %v1238_v42  ;;  %v1222_v28 = vmul.f32 %v4207_v33, %v1202_v43  ;;  %v4277_v60 = vld [vmem:[#allocation2 + $0x48] sm:$0xff] }
 0x2bd   : > { %v4279_v61 = vadd.f32 %v1263_v57, %v1257_v56  ;;  %1253 = vst.msk [vmem:[#allocation2 + $0x18] sm:$0xff] %vm947_vm1, %v3767_v0  ;;  %v4284_v10 = vadd.f32 %v4212_v18, %v1221_v58  ;;  %v3501_v62 = vpack.i.bf16 %v4277_v60, %v4271_v51 }
 0x2be   : > { %v1242_v2 = vadd.f32 %v4212_v18, %v1222_v28  ;;  %v4290_v3 = vadd.f32 %v1264_v27, %v1258_v59 }
 0x2bf   : > { %v1265_v33 = vmul.f32 %v1262_v38, %v4284_v10  ;;  %3502 = vrot.lane.b32.xlu1 %v3501_v62, %s5271_s23  ;;  %v3511_v4 = vpack.i.bf16 %v4284_v10, %v4268_v12  ;;  %v3313_v5 = vpack.c.bf16 %v4284_v10, %v4268_v12  ;;  %v3143_v10 = vld [vmem:[%s5229_s6 + $0x18] sm:$0xff] }
 0x2c0   : > { %1250 = vst [vmem:[#allocation2 + $0x58] sm:$0xff] %v1242_v2  ;;  %v1266_v7 = vmul.f32 %v1262_v38, %v1242_v2  ;;  %v4362_v38 = vpop.permute.xlu0 %3492 }
 0x2c1   : > { %v4298_v9 = vadd.f32 %v1265_v33, %v1259_v63  ;;  %1254 = vst.msk [vmem:[#allocation2 + $0x58] sm:$0xff] %vm947_vm1, %v3767_v0  ;;  %v3495_v40 = vunpack.i.h.bf16 %v4362_v38  ;;  %v3494_v41 = vunpack.i.l.bf16 %v4362_v38  ;;  %v3299_v33 = vpack.c.bf16 %v4277_v60, %v4271_v51 }
 0x2c2   : > { %v4302_v18 = vadd.f32 %v1266_v7, %v1260_v6 }
 0x2c3   : > { %3507 = vrot.lane.b32.xlu1 %v3501_v62, %s5272_s27  ;;  %v1271_v11 = vpack.c.bf16 %v4298_v9, %v4279_v61 }
 0x2c4   : > { %v1272_v46 = vpack.c.bf16 %v4302_v18, %v4290_v3  ;;  %v4309_v20 = vld [vmem:[#allocation2 + $0x18] sm:$0xff] }
 0x2c7   : > { %3512 = vrot.lane.b32.xlu1 %v3511_v4, %s5271_s23 }
 0x2c8   : > { %v4312_v17 = vld [vmem:[#allocation2 + $0x58] sm:$0xff] }
 0x2c9   : > { %v3516_v26 = vpack.i.bf16 %v4312_v17, %v4309_v20 }
 0x2cb   : > { %3517 = vrot.lane.b32.xlu0 %v3516_v26, %s5271_s23  ;;  %3527 = vrot.lane.b32.xlu1 %v3496_v30, %s5272_s27  ;;  %v3144_v30 = vld [vmem:[%s5230_s7 + $0x10] sm:$0xff] }
 0x2cf   : > { %3522 = vrot.lane.b32.xlu0 %v3511_v4, %s5272_s27  ;;  %3532 = vrot.lane.b32.xlu1 %v4220_v54, %s5272_s27 }
 0x2d3   : > { %3537 = vrot.lane.b32.xlu0 %v3516_v26, %s5272_s27  ;;  %3547 = vrot.lane.b32.xlu1 %v4232_v55, %s5272_s27  ;;  %v617_v55 = vld [vmem:[%s5226_s3 + $0x20] sm:$0xff] }
 0x2d7   : > { %3542 = vrot.lane.b32.xlu0 %v4220_v54, %s5271_s23  ;;  %1378 = vperm.xlu1 %3450, %v3145_v29   ;;  %v3152_v54 = vld [vmem:[%s5231_s8 + $0x10] sm:$0xff] }
 0x2db   : > { %1373 = vperm.xlu0 %3449, %v3144_v30   ;;  %648 = vperm.xlu1 %3450, %v618_v16  }
 0x2df   : > { %643 = vperm.xlu0 %3449, %v617_v55   ;;  %1640 = vperm.xlu1 %3450, %v3153_v21  }
 0x2e3   : > { %1635 = vperm.xlu0 %3449, %v3152_v54   ;;  %850 = vperm.xlu1 %3450, %v820_v31  }
 0x2e7   : > { %845 = vperm.xlu0 %3449, %v819_v32   ;;  %1665 = vperm.xlu1 %3450, %v3155_v34  }
 0x2eb   : > { %1660 = vperm.xlu0 %3449, %v3154_v35   ;;  %914 = vperm.xlu1 %3450, %v884_v36   ;;  %v3311_v35 = vpack.c.bf16 %v4312_v17, %v4309_v20 }
 0x2ef   : > { %909 = vperm.xlu0 %3449, %v883_v37  }
 0x327   : > { %v3498_v13 = vpop.permute.xlu0 %3497 }
 0x328   : > { %v3500_v42 = vunpack.i.h.bf16 %v3498_v13  ;;  %v3499_v43 = vunpack.i.l.bf16 %v3498_v13 }
 0x32a   : > { %v1328_v59 = vsel %vm986_vm2, %v3495_v40, %v3500_v42  ;;  %v1327_v27 = vsel %vm986_vm2, %v3494_v41, %v3499_v43 }
 0x32b   : > { %v3297_v4 = vpack.c.bf16 %v1328_v59, %v1327_v27 }
 0x331   : > { %v3503_v56 = vpop.permute.xlu1 %3502 }
 0x332   : > { %v3505_v57 = vunpack.i.h.bf16 %v3503_v56  ;;  %v3504_v58 = vunpack.i.l.bf16 %v3503_v56 }
 0x334   : > { %v1325_v28 = vsel %vm986_vm2, %v3499_v43, %v3504_v58  ;;  %v1326_v62 = vsel %vm986_vm2, %v3500_v42, %v3505_v57 }
 0x335   : > { %v3508_v63 = vpop.permute.xlu1 %3507  ;;  %v3295_v2 = vpack.c.bf16 %v1326_v62, %v1325_v28 }
 0x336   : > { %v3510_v14 = vunpack.i.h.bf16 %v3508_v63 }
 0x337   : > { %3296 = vmatprep.subr.bf16.mxu1 %v3295_v2 }
 0x338   : > { %3298 = vmatpush1.bf16.msra.mxu1 %v3297_v4  ;;  %v3142_v4 = vld [vmem:[%s5229_s6 + $0x10] sm:$0xff] }
 0x339   : > { %3300 = vmatprep.subr.bf16.mxu1 %v3299_v33  ;;  %v3513_v6 = vpop.permute.xlu1 %3512 }
 0x33a   : > { %v3515_v7 = vunpack.i.h.bf16 %v3513_v6  ;;  %v3514_v26 = vunpack.i.l.bf16 %v3513_v6 }
 0x33c   : > { %3302 = vmatpush1.bf16.msra.mxu1 %v3301_v15  ;;  %v1324_v21 = vsel %vm986_vm2, %v3505_v57, %v3515_v7  ;;  %v1323_v51 = vsel %vm986_vm2, %v3504_v58, %v3514_v26  ;;  %v3509_v15 = vunpack.i.l.bf16 %v3508_v63 }
 0x33d   : > { %v3518_v29 = vpop.permute.xlu0 %3517  ;;  %v4383_v30 = vpop.permute.xlu1 %3527  ;;  %v3309_v36 = vpack.c.bf16 %v1324_v21, %v1323_v51 }
 0x33e   : > { %v3520_v16 = vunpack.i.h.bf16 %v3518_v29  ;;  %v3519_v55 = vunpack.i.l.bf16 %v3518_v29  ;;  %v3530_v60 = vunpack.i.h.bf16 %v4383_v30  ;;  %v3529_v54 = vunpack.i.l.bf16 %v4383_v30 }
 0x340   : > { %v1321_v31 = vsel %vm986_vm2, %v3514_v26, %v3519_v55  ;;  %v1322_v47 = vsel %vm986_vm2, %v3515_v7, %v3520_v16  ;;  %v1362_v42 = vsel %vm1011_vm3, %v3530_v60, %v3510_v14  ;;  %v1361_v43 = vsel %vm1011_vm3, %v3529_v54, %v3509_v15 }
 0x341   : > { %v3523_v32 = vpop.permute.xlu0 %3522  ;;  %v3307_v34 = vpack.c.bf16 %v1322_v47, %v1321_v31  ;;  %v3533_v56 = vpop.permute.xlu1 %3532  ;;  %v3305_v17 = vpack.c.bf16 %v1362_v42, %v1361_v43 }
 0x342   : > { %v3525_v37 = vunpack.i.h.bf16 %v3523_v32  ;;  %v3524_v13 = vunpack.i.l.bf16 %v3523_v32  ;;  %v3535_v62 = vunpack.i.h.bf16 %v3533_v56  ;;  %v3534_v63 = vunpack.i.l.bf16 %v3533_v56 }
 0x343   : > { %3308 = vmatprep.subr.bf16.mxu0 %v3307_v34  ;;  %v3323_v34 = vpack.c.bf16 %v4228_v53, %v4226_v52 }
 0x344   : > { %3310 = vmatpush1.bf16.msra.mxu0 %v3309_v36  ;;  %v1359_v57 = vsel %vm1011_vm3, %v3509_v15, %v3524_v13  ;;  %v1360_v58 = vsel %vm1011_vm3, %v3510_v14, %v3525_v37 }
 0x345   : > { %v3538_v59 = vpop.permute.xlu0 %3537  ;;  %v3303_v20 = vpack.c.bf16 %v1360_v58, %v1359_v57  ;;  %3312 = vmatprep.subr.bf16.mxu0 %v3311_v35  ;;  %v3548_v30 = vpop.permute.xlu1 %3547 }
 0x346   : > { %v3540_v27 = vunpack.i.h.bf16 %v3538_v59  ;;  %v3539_v28 = vunpack.i.l.bf16 %v3538_v59  ;;  %v3550_v14 = vunpack.i.h.bf16 %v3548_v30  ;;  %v3549_v15 = vunpack.i.l.bf16 %v3548_v30 }
 0x347   : > { %3304 = vmatprep.subr.bf16.mxu1 %v3303_v20 }
 0x348   : > { %v1357_v2 = vsel %vm1011_vm3, %v3524_v13, %v3539_v28  ;;  %v1358_v33 = vsel %vm1011_vm3, %v3525_v37, %v3540_v27  ;;  %3306 = vmatpush1.bf16.msra.mxu1 %v3305_v17  ;;  %3314 = vmatpush1.bf16.msra.mxu0 %v3313_v5  ;;  %v1355_v26 = vsel %vm1011_vm3, %v3539_v28, %v3534_v63 }
 0x349   : > { %v3317_v6 = vpack.c.bf16 %v1358_v33, %v1357_v2  ;;  %v3543_v7 = vpop.permute.xlu0 %3542  ;;  %v1356_v29 = vsel %vm1011_vm3, %v3540_v27, %v3535_v62  ;;  %v1364_v38 = vsel %vm1011_vm3, %v3550_v14, %v3530_v60  ;;  %v1353_v52 = vsel %vm1011_vm3, %v3534_v63, %v3549_v15 }
 0x34a   : > { %v3545_v21 = vunpack.i.h.bf16 %v3543_v7  ;;  %v3544_v51 = vunpack.i.l.bf16 %v3543_v7  ;;  %v3315_v31 = vpack.c.bf16 %v1356_v29, %v1355_v26  ;;  %v1354_v53 = vsel %vm1011_vm3, %v3535_v62, %v3550_v14 }
 0x34b   : > { %3146 = vmatmul.mubr.msk.f32.vlgmr.msra.gmra.mrb[8].mxu1 %vm1034_vm4, %v3142_v4 }
 0x34c   : > { %v1320_v47 = vsel %vm986_vm2, %v3520_v16, %v3545_v21  ;;  %v1319_v12 = vsel %vm986_vm2, %v3519_v55, %v3544_v51  ;;  %3316 = vmatprep.subr.bf16.mxu0 %v3315_v31  ;;  %1457 = vmatprep.mubr.f32.mxu1 %v3767_v0  ;;  %v1317_v5 = vsel %vm986_vm2, %v3544_v51, %v3494_v41 }
 0x34d   : > { %v3321_v32 = vpack.c.bf16 %v1320_v47, %v1319_v12  ;;  %3318 = vmatpush1.bf16.msra.mxu0 %v3317_v6  ;;  %v1318_v16 = vsel %vm986_vm2, %v3545_v21, %v3495_v40  ;;  %v1363_v41 = vsel %vm1011_vm3, %v3549_v15, %v3529_v54  ;;  %v3329_v54 = vpack.c.bf16 %v1354_v53, %v1353_v52 }
 0x34e   : > { %v3319_v55 = vpack.c.bf16 %v1318_v16, %v1317_v5  ;;  %v3327_v40 = vpack.c.bf16 %v1364_v38, %v1363_v41 }
 0x34f   : > { %3147 = vmatmul.mubr.msk.f32.gmra.mrb[10].mxu1 %vm1034_vm4, %v3143_v10 }
 0x350   : > { %3148 = vmatmul.mubr.msk.f32.vlgmr.msra.gmra.mrb[16].mxu0 %vm1034_vm4, %v3142_v4  ;;  %3320 = vmatprep.subr.bf16.mxu1 %v3319_v55 }
 0x351   : > { %3322 = vmatpush1.bf16.msra.mxu1 %v3321_v32  ;;  %1534 = vmatprep.mubr.f32.mxu0 %v3767_v0 }
 0x352   : > { %3324 = vmatprep.subr.bf16.mxu1 %v3323_v34  ;;  %1605 = vmatprep.mubr.f32.mxu1 %v3767_v0 }
 0x354   : > { %3149 = vmatmul.mubr.msk.f32.gmra.mrb[18].mxu0 %vm1034_vm4, %v3143_v10 }
 0x355   : > { %3326 = vmatpush1.bf16.msra.mxu1 %v3325_v19  ;;  %1932 = vmatprep.mubr.f32.mxu0 %v3767_v0 }
 0x356   : > { %3328 = vmatprep.subr.bf16.mxu1 %v3327_v40  ;;  %v4455_v60 = vpop.permute.xlu1 %1378 }
 0x359   : > { %3330 = vmatpush1.bf16.msra.mxu1 %v3329_v54 }
 0x35a   : > { %v4457_v35 = vpop.permute.xlu0 %1373  ;;  %v649_v36 = vpop.permute.xlu1 %648 }
 0x35b   : > { %v783_v37 = vadd.f32 %v4064_v24, %v649_v36  ;;  %v785_v56 = vadd.f32 %v4066_v25, %v649_v36 }
 0x35c   : > { %3150 = vmatmul.mubr.msk.f32.vlgmr.msra.gmra.mrb[12].mxu1 %vm1034_vm4, %v3142_v4 }
 0x35d   : > { %1611 = vmatprep.mubr.f32.mxu1 %v3767_v0  ;;  %v809_v49 = vmax.f32 %v783_v37, 0.0  ;;  %v810_v20 = vmax.f32 %v785_v56, 0.0 }
 0x35e   : > { %v644_v13 = vpop.permute.xlu0 %643  ;;  %v4462_v42 = vpop.permute.xlu1 %1640 }
 0x35f   : > { %v777_v44 = vadd.f32 %v4060_v22, %v644_v13  ;;  %v779_v17 = vadd.f32 %v4062_v23, %v644_v13  ;;  %v1699_v13 = vstv %s3156_s19 }
 0x360   : > { %3151 = vmatmul.mubr.msk.f32.gmra.mrb[14].mxu1 %vm1034_vm4, %v3143_v10 }
 0x361   : > { %2009 = vmatprep.mubr.f32.mxu1 %v3767_v0  ;;  %v807_v57 = vmax.f32 %v777_v44, 0.0  ;;  %v808_v63 = vmax.f32 %v779_v17, 0.0 }
 0x362   : > { %v4467_v19 = vpop.permute.xlu0 %1635  ;;  %v851_v43 = vpop.permute.xlu1 %850 }
 0x363   : > { %v873_v24 = vmul.f32 %v851_v43, %v809_v49  ;;  %v874_v22 = vmul.f32 %v851_v43, %v810_v20 }
 0x366   : > { %v846_v58 = vpop.permute.xlu0 %845  ;;  %v4470_v59 = vpop.permute.xlu1 %1665 }
 0x367   : > { %v871_v27 = vmul.f32 %v846_v58, %v807_v57  ;;  %v872_v33 = vmul.f32 %v846_v58, %v808_v63 }
 0x36a   : > { %v4473_v28 = vpop.permute.xlu0 %1660  ;;  %v915_v62 = vpop.permute.xlu1 %914 }
 0x36b   : > { %v938_v2 = vadd.f32 %v915_v62, %v874_v22  ;;  %v4477_v4 = vadd.f32 %v915_v62, %v873_v24 }
 0x36d   : > { %1731 = vst [vmem:[#allocation2 + $0x78] sm:$0xff] %v938_v2 }
 0x36e   : > { %1733 = vst.msk [vmem:[#allocation2 + $0x78] sm:$0xff] %vm947_vm1, %v3767_v0  ;;  %v910_v25 = vpop.permute.xlu0 %909 }
 0x36f   : > { %v4479_v6 = vadd.f32 %v910_v25, %v871_v27  ;;  %v936_v7 = vadd.f32 %v910_v25, %v872_v33  ;;  %v1705_v27 = vstv %s3157_s1 }
 0x371   : > { %1729 = vst [vmem:[#allocation2 + $0x38] sm:$0xff] %v936_v7  ;;  %v4483_v23 = vpack.i.bf16 %v4477_v4, %v4479_v6  ;;  %v3373_v26 = vpack.c.bf16 %v4477_v4, %v4479_v6 }
 0x372   : > { %1732 = vst.msk [vmem:[#allocation2 + $0x38] sm:$0xff] %vm947_vm1, %v3767_v0 }
 0x375   : > { %v4491_v30 = vld [vmem:[#allocation2 + $0x78] sm:$0xff] }
 0x379   : > { %v4489_v29 = vld [vmem:[#allocation2 + $0x38] sm:$0xff] }
 0x37a   : > { %v4495_v21 = vpack.i.bf16 %v4491_v30, %v4489_v29 }
 0x37c   : > { %3552 = vrot.lane.b32.xlu0 %v4495_v21, %s5271_s23 }
 0x41e   : > { %v1453_v51 = vpop.f32.mrb[8].mxu1 }
 0x41f   : > { %v1454_v31 = vadd.f32 %v1453_v51, %v4457_v35  ;;  %v1455_v47 = vpop.f32.mrb[9].mxu1 }
 0x420   : > { %v1456_v12 = vadd.f32 %v1455_v47, %v4457_v35 }
 0x421   : > { %v1618_v10 = vmax.f32 %v1454_v31, 0.0 }
 0x422   : > { %v1619_v5 = vmax.f32 %v1456_v12, 0.0  ;;  %v1459_v14 = vpop.f32.mrb[10].mxu1 }
 0x423   : > { %v1460_v15 = vadd.f32 %v1459_v14, %v4455_v60  ;;  %v1530_v32 = vpop.f32.mrb[16].mxu0  ;;  %v1461_v16 = vpop.f32.mrb[11].mxu1  ;;  %v1643_v55 = vmul.f32 %v4467_v19, %v1618_v10 }
 0x424   : > { %v1644_v34 = vmul.f32 %v4467_v19, %v1619_v5  ;;  %v1531_v41 = vadd.f32 %v1530_v32, %v4457_v35  ;;  %v1462_v38 = vadd.f32 %v1461_v16, %v4455_v60  ;;  %v1532_v52 = vpop.f32.mrb[17].mxu0 }
 0x425   : > { %v1624_v53 = vmax.f32 %v1460_v15, 0.0  ;;  %v1533_v40 = vadd.f32 %v1532_v52, %v4457_v35  ;;  %v4510_v56 = vadd.f32 %v4473_v28, %v1643_v55 }
 0x426   : > { %v1669_v54 = vadd.f32 %v4473_v28, %v1644_v34  ;;  %v1620_v36 = vmax.f32 %v1531_v41, 0.0  ;;  %v1625_v37 = vmax.f32 %v1462_v38, 0.0 }
 0x427   : > { %v1649_v44 = vmul.f32 %v4462_v42, %v1624_v53  ;;  %v1621_v49 = vmax.f32 %v1533_v40, 0.0  ;;  %v1536_v43 = vpop.f32.mrb[18].mxu0  ;;  %v1700_v31 = vmul.f32 %v1699_v13, %v4510_v56 }
 0x428   : > { %1681 = vst [vmem:[#allocation2 + $0x8] sm:$0xff] %v1669_v54  ;;  %v1645_v24 = vmul.f32 %v4467_v19, %v1620_v36  ;;  %v1650_v57 = vmul.f32 %v4462_v42, %v1625_v37  ;;  %v1537_v58 = vadd.f32 %v1536_v43, %v4455_v60  ;;  %v1538_v20 = vpop.f32.mrb[19].mxu0  ;;  %v1701_v5 = vmul.f32 %v1699_v13, %v1669_v54 }
 0x429   : > { %1692 = vst.msk [vmem:[#allocation2 + $0x8] sm:$0xff] %vm947_vm1, %v3767_v0  ;;  %v4518_v17 = vadd.f32 %v4470_v59, %v1649_v44  ;;  %v1646_v22 = vmul.f32 %v4467_v19, %v1621_v49  ;;  %v1539_v62 = vadd.f32 %v1538_v20, %v4455_v60 }
 0x42a   : > { %v4523_v63 = vadd.f32 %v4473_v28, %v1645_v24  ;;  %v1675_v2 = vadd.f32 %v4470_v59, %v1650_v57  ;;  %v1626_v33 = vmax.f32 %v1537_v58, 0.0 }
 0x42b   : > { %v1671_v25 = vadd.f32 %v4473_v28, %v1646_v22  ;;  %v1627_v7 = vmax.f32 %v1539_v62, 0.0  ;;  %v4529_v51 = vpack.i.bf16 %v4518_v17, %v4510_v56  ;;  %v3337_v10 = vpack.c.bf16 %v4518_v17, %v4510_v56 }
 0x42c   : > { %v1706_v47 = vmul.f32 %v1705_v27, %v4523_v63  ;;  %1687 = vst [vmem:[#allocation2 + $0x48] sm:$0xff] %v1675_v2  ;;  %v1651_v12 = vmul.f32 %v4462_v42, %v1626_v33  ;;  %v1702_v55 = vmul.f32 %v1699_v13, %v4518_v17  ;;  %v1703_v37 = vmul.f32 %v1699_v13, %v1675_v2 }
 0x42d   : > { %1693 = vst.msk [vmem:[#allocation2 + $0x48] sm:$0xff] %vm947_vm1, %v3767_v0  ;;  %1683 = vst [vmem:[#allocation2 + $0x18] sm:$0xff] %v1671_v25  ;;  %v1707_v14 = vmul.f32 %v1705_v27, %v1671_v25  ;;  %v1652_v15 = vmul.f32 %v4462_v42, %v1627_v7  ;;  %3557 = vrot.lane.b32.xlu0 %v4529_v51, %s5271_s23 }
 0x42e   : > { %v1710_v32 = vadd.f32 %v1706_v47, %v1700_v31  ;;  %1694 = vst.msk [vmem:[#allocation2 + $0x18] sm:$0xff] %vm947_vm1, %v3767_v0  ;;  %v4544_v16 = vadd.f32 %v4470_v59, %v1651_v12 }
 0x42f   : > { %v1677_v34 = vadd.f32 %v4470_v59, %v1652_v15  ;;  %v1607_v41 = vpop.f32.mrb[12].mxu1  ;;  %v1711_v38 = vadd.f32 %v1707_v14, %v1701_v5 }
 0x430   : > { %v1708_v52 = vmul.f32 %v1705_v27, %v4544_v16  ;;  %v1608_v53 = vadd.f32 %v1607_v41, %v4457_v35  ;;  %v1609_v40 = vpop.f32.mrb[13].mxu1  ;;  %v3581_v54 = vpack.i.bf16 %v4544_v16, %v4523_v63  ;;  %v3349_v36 = vpack.c.bf16 %v4544_v16, %v4523_v63  ;;  %v4557_v57 = vld [vmem:[#allocation2 + $0x8] sm:$0xff] }
 0x431   : > { %1689 = vst [vmem:[#allocation2 + $0x58] sm:$0xff] %v1677_v34  ;;  %v1709_v44 = vmul.f32 %v1705_v27, %v1677_v34  ;;  %v1610_v49 = vadd.f32 %v1609_v40, %v4457_v35  ;;  %v1715_v35 = vstv %s3158_s18 }
 0x432   : > { %v1712_v43 = vadd.f32 %v1708_v52, %v1702_v55  ;;  %1695 = vst.msk [vmem:[#allocation2 + $0x58] sm:$0xff] %vm947_vm1, %v3767_v0  ;;  %v1622_v24 = vmax.f32 %v1608_v53, 0.0  ;;  %3582 = vrot.lane.b32.xlu0 %v3581_v54, %s5272_s27 }
 0x433   : > { %v1623_v58 = vmax.f32 %v1610_v49, 0.0  ;;  %v1613_v20 = vpop.f32.mrb[14].mxu1  ;;  %v1713_v22 = vadd.f32 %v1709_v44, %v1703_v37 }
 0x434   : > { %v1647_v62 = vmul.f32 %v4467_v19, %v1622_v24  ;;  %v1614_v13 = vadd.f32 %v1613_v20, %v4455_v60  ;;  %v1615_v2 = vpop.f32.mrb[15].mxu1  ;;  %v4562_v27 = vld [vmem:[#allocation2 + $0x48] sm:$0xff]  ;;  %v3171_v20 = vld [vmem:[%s5231_s8 + $0x20] sm:$0xff] }
 0x435   : > { %v1648_v33 = vmul.f32 %v4467_v19, %v1623_v58  ;;  %v1616_v25 = vadd.f32 %v1615_v2, %v4455_v60  ;;  %v3561_v7 = vpack.i.bf16 %v4562_v27, %v4557_v57  ;;  %v4573_v14 = vld [vmem:[#allocation2 + $0x18] sm:$0xff]  ;;  %v2332_v2 = vld [vmem:[%s5234_s11 + $0x10] sm:$0xff] }
 0x436   : > { %v4569_v31 = vadd.f32 %v4473_v28, %v1647_v62  ;;  %v1628_v47 = vmax.f32 %v1614_v13, 0.0  ;;  %v3172_v62 = vld [vmem:[%s5231_s8 + $0x28] sm:$0xff]  ;;  %v2330_v13 = vld [vmem:[%s5234_s11] sm:$0xff] }
 0x437   : > { %v1673_v12 = vadd.f32 %v4473_v28, %v1648_v33  ;;  %v1629_v5 = vmax.f32 %v1616_v25, 0.0  ;;  %3562 = vrot.lane.b32.xlu1 %v3561_v7, %s5271_s23  ;;  %v2499_v33 = vld [vmem:[%s5235_s12] sm:$0xff]  ;;  %v2333_v25 = vld [vmem:[%s5234_s11 + $0x18] sm:$0xff] }
 0x438   : > { %v1716_v15 = vmul.f32 %v1715_v35, %v4569_v31  ;;  %v1653_v19 = vmul.f32 %v4462_v42, %v1628_v47  ;;  %v2500_v47 = vld [vmem:[%s5235_s12 + $0x8] sm:$0xff] }
 0x439   : > { %1685 = vst [vmem:[#allocation2 + $0x28] sm:$0xff] %v1673_v12  ;;  %v1717_v60 = vmul.f32 %v1715_v35, %v1673_v12  ;;  %v1654_v55 = vmul.f32 %v4462_v42, %v1629_v5  ;;  %v4578_v34 = vld [vmem:[#allocation2 + $0x58] sm:$0xff]  ;;  %v2334_v12 = vld [vmem:[%s5234_s11 + $0x20] sm:$0xff]  ;;  %v2564_v5 = vld [vmem:[%s5236_s13 + $0x8] sm:$0xff] }
 0x43a   : > { %v4580_v41 = vadd.f32 %v1716_v15, %v1710_v32  ;;  %1696 = vst.msk [vmem:[#allocation2 + $0x28] sm:$0xff] %vm947_vm1, %v3767_v0  ;;  %v4585_v28 = vadd.f32 %v4470_v59, %v1653_v19  ;;  %v3586_v52 = vpack.i.bf16 %v4578_v34, %v4573_v14  ;;  %v2501_v15 = vld [vmem:[%s5235_s12 + $0x10] sm:$0xff]  ;;  %v2335_v19 = vld [vmem:[%s5234_s11 + $0x28] sm:$0xff] }
 0x43b   : > { %v1679_v53 = vadd.f32 %v4470_v59, %v1654_v55  ;;  %3567 = vrot.lane.b32.xlu1 %v3561_v7, %s5272_s27  ;;  %v4591_v40 = vadd.f32 %v1717_v60, %v1711_v38  ;;  %v2563_v7 = vld [vmem:[%s5236_s13] sm:$0xff]  ;;  %v2565_v60 = vld [vmem:[%s5236_s13 + $0x10] sm:$0xff]  ;;  %v2502_v55 = vld [vmem:[%s5235_s12 + $0x18] sm:$0xff] }
 0x43c   : > { %v1718_v42 = vmul.f32 %v1715_v35, %v4585_v28  ;;  %3587 = vrot.lane.b32.xlu0 %v3586_v52, %s5271_s23  ;;  %v3601_v32 = vpack.i.bf16 %v4585_v28, %v4569_v31  ;;  %v3361_v37 = vpack.c.bf16 %v4585_v28, %v4569_v31 }
 0x43d   : > { %1691 = vst [vmem:[#allocation2 + $0x68] sm:$0xff] %v1679_v53  ;;  %v1719_v44 = vmul.f32 %v1715_v35, %v1679_v53  ;;  %v2331_v35 = vld [vmem:[%s5234_s11 + $0x8] sm:$0xff]  ;;  %v2566_v53 = vld [vmem:[%s5236_s13 + $0x18] sm:$0xff] }
 0x43e   : > { %v4599_v49 = vadd.f32 %v1718_v42, %v1712_v43  ;;  %1697 = vst.msk [vmem:[#allocation2 + $0x68] sm:$0xff] %vm947_vm1, %v3767_v0  ;;  %v2503_v42 = vld [vmem:[%s5235_s12 + $0x20] sm:$0xff] }
 0x43f   : > { %3572 = vrot.lane.b32.xlu1 %v3581_v54, %s5271_s23  ;;  %v4604_v59 = vadd.f32 %v1719_v44, %v1713_v22  ;;  %v3162_v22 = vld [vmem:[%s5230_s7 + $0x28] sm:$0xff]  ;;  %v2567_v44 = vld [vmem:[%s5236_s13 + $0x20] sm:$0xff] }
 0x440   : > { %3592 = vrot.lane.b32.xlu0 %v3586_v52, %s5272_s27  ;;  %v1724_v38 = vpack.c.bf16 %v4599_v49, %v4580_v41  ;;  %v2336_v52 = vld [vmem:[%s5234_s11 + $0x30] sm:$0xff] }
 0x441   : > { %v1725_v24 = vpack.c.bf16 %v4604_v59, %v4591_v40  ;;  %v4614_v43 = vld [vmem:[#allocation2 + $0x28] sm:$0xff] }
 0x443   : > { %3577 = vrot.lane.b32.xlu1 %v4529_v51, %s5272_s27  ;;  %v3161_v51 = vld [vmem:[%s5230_s7 + $0x20] sm:$0xff] }
 0x444   : > { %3602 = vrot.lane.b32.xlu0 %v3601_v32, %s5271_s23 }
 0x445   : > { %v4616_v58 = vld [vmem:[#allocation2 + $0x68] sm:$0xff] }
 0x446   : > { %v3606_v54 = vpack.i.bf16 %v4616_v58, %v4614_v43 }
 0x447   : > { %3597 = vrot.lane.b32.xlu1 %v3601_v32, %s5272_s27  ;;  %v2337_v32 = vld [vmem:[%s5234_s11 + $0x38] sm:$0xff] }
 0x448   : > { %3612 = vrot.lane.b32.xlu0 %v4483_v23, %s5271_s23 }
 0x44b   : > { %3607 = vrot.lane.b32.xlu1 %v3606_v54, %s5271_s23  ;;  %s4878_s23 = sld [smem:[#allocation4 + $0x101]] }
 0x44c   : > { %3617 = vrot.lane.b32.xlu0 %v4483_v23, %s5272_s27  ;;  %v3173_v23 = vld [vmem:[%s5232_s9 + $0x20] sm:$0xff] }
 0x44f   : > { %3622 = vrot.lane.b32.xlu1 %v3606_v54, %s5272_s27  ;;  %v2504_v54 = vld [vmem:[%s5235_s12 + $0x28] sm:$0xff] }
 0x450   : > { %1854 = vperm.xlu0 %3449, %v3161_v51   ;;  %v2505_v51 = vld [vmem:[%s5235_s12 + $0x30] sm:$0xff] }
 0x453   : > { %3627 = vrot.lane.b32.xlu1 %v4495_v21, %s5272_s27  ;;  %v3174_v21 = vld [vmem:[%s5232_s9 + $0x28] sm:$0xff] }
 0x454   : > { %2197 = vperm.xlu0 %3449, %v3171_v20   ;;  %v2568_v20 = vld [vmem:[%s5236_s13 + $0x28] sm:$0xff] }
 0x457   : > { %1859 = vperm.xlu1 %3450, %v3162_v22   ;;  %v2569_v22 = vld [vmem:[%s5236_s13 + $0x30] sm:$0xff] }
 0x458   : > { %2226 = vperm.xlu0 %3449, %v3173_v23   ;;  %v2506_v23 = vld [vmem:[%s5235_s12 + $0x38] sm:$0xff] }
 0x45b   : > { %2202 = vperm.xlu1 %3450, %v3172_v62   ;;  %v2570_v62 = vld [vmem:[%s5236_s13 + $0x38] sm:$0xff] }
 0x45c   : > { %2340 = vperm.xlu0 %3449, %v2330_v13   ;;  %v4719_v13 = vpop.permute.xlu0 %3552 }
 0x45f   : > { %2231 = vperm.xlu1 %3450, %v3174_v21  }
 0x460   : > { %2350 = vperm.xlu0 %3449, %v2332_v2   ;;  %v3555_v2 = vunpack.i.h.bf16 %v4719_v13 }
 0x463   : > { %2345 = vperm.xlu1 %3450, %v2331_v35   ;;  %v3554_v35 = vunpack.i.l.bf16 %v4719_v13 }
 0x464   : > { %2509 = vperm.xlu0 %3449, %v2499_v33  }
 0x467   : > { %2355 = vperm.xlu1 %3450, %v2333_v25  }
 0x468   : > { %2573 = vperm.xlu0 %3449, %v2563_v7  }
 0x46b   : > { %2514 = vperm.xlu1 %3450, %v2500_v47  }
 0x46c   : > { %2360 = vperm.xlu0 %3449, %v2334_v12  }
 0x46f   : > { %2578 = vperm.xlu1 %3450, %v2564_v5  }
 0x470   : > { %2519 = vperm.xlu0 %3449, %v2501_v15  }
 0x473   : > { %2365 = vperm.xlu1 %3450, %v2335_v19  }
 0x474   : > { %2583 = vperm.xlu0 %3449, %v2565_v60  }
 0x477   : > { %2524 = vperm.xlu1 %3450, %v2502_v55  }
 0x478   : > { %2370 = vperm.xlu0 %3449, %v2336_v52  }
 0x47b   : > { %2588 = vperm.xlu1 %3450, %v2566_v53  }
 0x47c   : > { %2529 = vperm.xlu0 %3449, %v2503_v42  }
 0x47f   : > { %2375 = vperm.xlu1 %3450, %v2337_v32   ;;  %v3335_v32 = vpack.c.bf16 %v4562_v27, %v4557_v57 }
 0x480   : > { %2593 = vperm.xlu0 %3449, %v2567_v44  }
 0x483   : > { %2534 = vperm.xlu1 %3450, %v2504_v54  }
 0x484   : > { %2539 = vperm.xlu0 %3449, %v2505_v51  }
 0x487   : > { %2598 = vperm.xlu1 %3450, %v2568_v20  }
 0x488   : > { %2603 = vperm.xlu0 %3449, %v2569_v22  }
 0x48b   : > { %2544 = vperm.xlu1 %3450, %v2506_v23  }
 0x48f   : > { %2608 = vperm.xlu1 %3450, %v2570_v62  }
 0x49f   : > { %v3558_v21 = vpop.permute.xlu0 %3557 }
 0x4a0   : > { %v3560_v33 = vunpack.i.h.bf16 %v3558_v21  ;;  %v3559_v25 = vunpack.i.l.bf16 %v3558_v21 }
 0x4a2   : > { %v1797_v47 = vsel %vm986_vm2, %v3555_v2, %v3560_v33  ;;  %v1796_v12 = vsel %vm986_vm2, %v3554_v35, %v3559_v25 }
 0x4a3   : > { %v3333_v52 = vpack.c.bf16 %v1797_v47, %v1796_v12 }
 0x4a4   : > { %v3583_v19 = vpop.permute.xlu0 %3582 }
 0x4a5   : > { %v3585_v44 = vunpack.i.h.bf16 %v3583_v19  ;;  %v3584_v54 = vunpack.i.l.bf16 %v3583_v19 }
 0x4a9   : > { %v3563_v7 = vpop.permute.xlu1 %3562 }
 0x4aa   : > { %v3565_v5 = vunpack.i.h.bf16 %v3563_v7  ;;  %v3564_v15 = vunpack.i.l.bf16 %v3563_v7 }
 0x4ac   : > { %v1794_v60 = vsel %vm986_vm2, %v3559_v25, %v3564_v15  ;;  %v1795_v55 = vsel %vm986_vm2, %v3560_v33, %v3565_v5 }
 0x4ad   : > { %v3568_v53 = vpop.permute.xlu1 %3567  ;;  %v3331_v42 = vpack.c.bf16 %v1795_v55, %v1794_v60 }
 0x4ae   : > { %v3570_v51 = vunpack.i.h.bf16 %v3568_v53  ;;  %v3569_v20 = vunpack.i.l.bf16 %v3568_v53  ;;  %v3588_v22 = vpop.permute.xlu0 %3587 }
 0x4af   : > { %3332 = vmatprep.subr.bf16.mxu0 %v3331_v42  ;;  %v3590_v23 = vunpack.i.h.bf16 %v3588_v22  ;;  %v3589_v62 = vunpack.i.l.bf16 %v3588_v22 }
 0x4b0   : > { %3334 = vmatpush1.bf16.msra.mxu0 %v3333_v52  ;;  %v1840_v21 = vsel %vm1011_vm3, %v3569_v20, %v3584_v54  ;;  %v1841_v33 = vsel %vm1011_vm3, %v3570_v51, %v3585_v44 }
 0x4b1   : > { %v3573_v25 = vpop.permute.xlu1 %3572  ;;  %3336 = vmatprep.subr.bf16.mxu0 %v3335_v32  ;;  %v3339_v27 = vpack.c.bf16 %v1841_v33, %v1840_v21 }
 0x4b2   : > { %v3575_v7 = vunpack.i.h.bf16 %v3573_v25  ;;  %v3574_v47 = vunpack.i.l.bf16 %v3573_v25  ;;  %v3593_v57 = vpop.permute.xlu0 %3592 }
 0x4b3   : > { %v3595_v32 = vunpack.i.h.bf16 %v3593_v57 }
 0x4b4   : > { %v1793_v12 = vsel %vm986_vm2, %v3565_v5, %v3575_v7  ;;  %v1792_v19 = vsel %vm986_vm2, %v3564_v15, %v3574_v47  ;;  %3338 = vmatpush1.bf16.msra.mxu0 %v3337_v10  ;;  %v1790_v60 = vsel %vm986_vm2, %v3574_v47, %v3589_v62  ;;  %v1791_v55 = vsel %vm986_vm2, %v3575_v7, %v3590_v23 }
 0x4b5   : > { %v3345_v52 = vpack.c.bf16 %v1793_v12, %v1792_v19  ;;  %3340 = vmatprep.subr.bf16.mxu0 %v3339_v27  ;;  %v4752_v53 = vpop.permute.xlu1 %3577  ;;  %v3343_v42 = vpack.c.bf16 %v1791_v55, %v1790_v60  ;;  %v3347_v5 = vpack.c.bf16 %v4578_v34, %v4573_v14  ;;  %v3594_v15 = vunpack.i.l.bf16 %v3593_v57  ;;  %v4777_v19 = vld [vmem:[%s5229_s6 + $0x20] sm:$0xff] }
 0x4b6   : > { %v3580_v22 = vunpack.i.h.bf16 %v4752_v53  ;;  %v3579_v56 = vunpack.i.l.bf16 %v4752_v53  ;;  %v3603_v17 = vpop.permute.xlu0 %3602  ;;  %v1839_v25 = vsel %vm1011_vm3, %v3585_v44, %v3595_v32 }
 0x4b7   : > { %3344 = vmatprep.subr.bf16.mxu1 %v3343_v42  ;;  %v1838_v33 = vsel %vm1011_vm3, %v3584_v54, %v3594_v15  ;;  %v3605_v57 = vunpack.i.h.bf16 %v3603_v17  ;;  %v3604_v27 = vunpack.i.l.bf16 %v3603_v17 }
 0x4b8   : > { %v1843_v10 = vsel %vm1011_vm3, %v3580_v22, %v3570_v51  ;;  %v1842_v21 = vsel %vm1011_vm3, %v3579_v56, %v3569_v20  ;;  %3346 = vmatpush1.bf16.msra.mxu1 %v3345_v52  ;;  %v3353_v63 = vpack.c.bf16 %v1839_v25, %v1838_v33  ;;  %v3371_v33 = vpack.c.bf16 %v4491_v30, %v4489_v29 }
 0x4b9   : > { %v3341_v14 = vpack.c.bf16 %v1843_v10, %v1842_v21  ;;  %v4766_v34 = vpop.permute.xlu1 %3597  ;;  %3348 = vmatprep.subr.bf16.mxu1 %v3347_v5  ;;  %v1788_v5 = vsel %vm986_vm2, %v3589_v62, %v3604_v27 }
 0x4ba   : > { %v3600_v7 = vunpack.i.h.bf16 %v4766_v34  ;;  %v3599_v51 = vunpack.i.l.bf16 %v4766_v34  ;;  %v3613_v47 = vpop.permute.xlu0 %3612  ;;  %v3359_v34 = vpack.c.bf16 %v4616_v58, %v4614_v43 }
 0x4bb   : > { %v3615_v12 = vunpack.i.h.bf16 %v3613_v47  ;;  %v3614_v20 = vunpack.i.l.bf16 %v3613_v47  ;;  %3342 = vmatpush1.bf16.msra.mxu0 %v3341_v14 }
 0x4bc   : > { %3350 = vmatpush1.bf16.msra.mxu1 %v3349_v36  ;;  %v1836_v44 = vsel %vm1011_vm3, %v3594_v15, %v3599_v51  ;;  %v1837_v54 = vsel %vm1011_vm3, %v3595_v32, %v3600_v7  ;;  %v1789_v32 = vsel %vm986_vm2, %v3590_v23, %v3605_v57 }
 0x4bd   : > { %v3608_v60 = vpop.permute.xlu1 %3607  ;;  %v3351_v55 = vpack.c.bf16 %v1837_v54, %v1836_v44  ;;  %v1782_v52 = vsel %vm986_vm2, %v3614_v20, %v3554_v35  ;;  %v1783_v42 = vsel %vm986_vm2, %v3615_v12, %v3555_v2  ;;  %v3160_v2 = vld [vmem:[%s5229_s6 + $0x28] sm:$0xff]  ;;  %v3357_v25 = vpack.c.bf16 %v1789_v32, %v1788_v5 }
 0x4be   : > { %v3610_v16 = vunpack.i.h.bf16 %v3608_v60  ;;  %v3609_v36 = vunpack.i.l.bf16 %v3608_v60  ;;  %3163 = vmatmul.mubr.msk.f32.vlgmr.msra.gmra.mrb[20].mxu0 %vm1034_vm4, %v4777_v19  ;;  %v3618_v15 = vpop.permute.xlu0 %3617  ;;  %v3367_v13 = vpack.c.bf16 %v1783_v42, %v1782_v52 }
 0x4bf   : > { %3352 = vmatprep.subr.bf16.mxu1 %v3351_v55  ;;  %1938 = vmatprep.mubr.f32.mxu0 %v3767_v0  ;;  %v3619_v47 = vunpack.i.l.bf16 %v3618_v15 }
 0x4c0   : > { %v1785_v35 = vsel %vm986_vm2, %v3610_v16, %v3615_v12  ;;  %v1784_v17 = vsel %vm986_vm2, %v3609_v36, %v3614_v20  ;;  %3354 = vmatpush1.bf16.msra.mxu1 %v3353_v63  ;;  %v1786_v62 = vsel %vm986_vm2, %v3604_v27, %v3609_v36  ;;  %v1787_v23 = vsel %vm986_vm2, %v3605_v57, %v3610_v16 }
 0x4c1   : > { %v3369_v10 = vpack.c.bf16 %v1785_v35, %v1784_v17  ;;  %v3623_v21 = vpop.permute.xlu1 %3622  ;;  %3368 = vmatprep.subr.bf16.mxu1 %v3367_v13  ;;  %v3355_v14 = vpack.c.bf16 %v1787_v23, %v1786_v62  ;;  %v3620_v27 = vunpack.i.h.bf16 %v3618_v15  ;;  %v2275_v62 = vstv %s3175_s29  ;;  %s580_s29 = sand.u32 1, %s3756_s28  }
 0x4c2   : > { %v3625_v12 = vunpack.i.h.bf16 %v3623_v21  ;;  %v3624_v20 = vunpack.i.l.bf16 %v3623_v21  ;;  %3164 = vmatmul.mubr.msk.f32.gmra.mrb[22].mxu0 %vm1034_vm4, %v3160_v2  ;;  %s5182_s27 = scalar_lea.sflag [#allocation5], %s580_s29 }
 0x4c3   : > { %3165 = vmatmul.mubr.msk.f32.vlgmr.msra.gmra.mrb[16].mxu1 %vm1034_vm4, %v4777_v19  ;;  %3356 = vmatprep.subr.bf16.mxu0 %v3355_v14 }
 0x4c4   : > { %3358 = vmatpush1.bf16.msra.mxu0 %v3357_v25  ;;  %3370 = vmatpush1.bf16.msra.mxu1 %v3369_v10  ;;  %v1832_v57 = vsel %vm1011_vm3, %v3624_v20, %v3619_v47  ;;  %v1833_v29 = vsel %vm1011_vm3, %v3625_v12, %v3620_v27  ;;  %v1834_v44 = vsel %vm1011_vm3, %v3599_v51, %v3624_v20 }
 0x4c5   : > { %v3628_v43 = vpop.permute.xlu1 %3627  ;;  %2015 = vmatprep.mubr.f32.mxu1 %v3767_v0  ;;  %3360 = vmatprep.subr.bf16.mxu0 %v3359_v34  ;;  %v1835_v54 = vsel %vm1011_vm3, %v3600_v7, %v3625_v12  ;;  %v3363_v60 = vpack.c.bf16 %v1833_v29, %v1832_v57 }
 0x4c6   : > { %v3630_v30 = vunpack.i.h.bf16 %v3628_v43  ;;  %v3629_v58 = vunpack.i.l.bf16 %v3628_v43  ;;  %3372 = vmatprep.subr.bf16.mxu1 %v3371_v33  ;;  %2086 = vmatprep.mubr.f32.mxu0 %v3767_v0  ;;  %v3365_v31 = vpack.c.bf16 %v1835_v54, %v1834_v44  ;;  %v2281_v33 = vstv %s4878_s23  ;;  %s3126_s23 = sshll.u32 %s580_s29, 7 }
 0x4c7   : > { %3166 = vmatmul.mubr.msk.f32.gmra.mrb[18].mxu1 %vm1034_vm4, %v3160_v2 }
 0x4c8   : > { %v1831_v55 = vsel %vm1011_vm3, %v3620_v27, %v3630_v30  ;;  %v1830_v52 = vsel %vm1011_vm3, %v3619_v47, %v3629_v58  ;;  %3362 = vmatpush1.bf16.msra.mxu0 %v3361_v37  ;;  %3374 = vmatpush1.bf16.msra.mxu1 %v3373_v26  ;;  %v1844_v7 = vsel %vm1011_vm3, %v3629_v58, %v3579_v56 }
 0x4c9   : > { %v3377_v51 = vpack.c.bf16 %v1831_v55, %v1830_v52  ;;  %3364 = vmatprep.subr.bf16.mxu0 %v3363_v60  ;;  %v1845_v42 = vsel %vm1011_vm3, %v3630_v30, %v3580_v22  ;;  %2163 = vmatprep.mubr.f32.mxu1 %v3767_v0 }
 0x4ca   : > { %v3375_v28 = vpack.c.bf16 %v1845_v42, %v1844_v7 }
 0x4cc   : > { %3376 = vmatprep.subr.bf16.mxu1 %v3375_v28  ;;  %3366 = vmatpush1.bf16.msra.mxu0 %v3365_v31 }
 0x4cd   : > { %3378 = vmatpush1.bf16.msra.mxu1 %v3377_v51  ;;  %2410 = vmatprep.subr.bf16.mxu0 %v1272_v46 }
 0x4cf   : > { %3167 = vmatmul.mubr.msk.f32.vlgmr.msra.gmra.mrb[24].mxu0 %vm1034_vm4, %v4777_v19  ;;  %v4870_v61 = vpop.permute.xlu0 %1854 }
 0x4d0   : > { %3169 = vmatmul.mubr.msk.f32.vlgmr.msra.gmra.mrb[20].mxu1 %vm1034_vm4, %v4777_v19  ;;  %2411 = vmatpush1.bf16.msra.mxu0 %v1271_v11 }
 0x4d1   : > { %2412 = vmatprep.subr.bf16.mxu0 %v1725_v24  ;;  %2092 = vmatprep.mubr.f32.mxu0 %v3767_v0 }
 0x4d2   : > { %2169 = vmatprep.mubr.f32.mxu1 %v3767_v0 }
 0x4d3   : > { %3168 = vmatmul.mubr.msk.f32.gmra.mrb[26].mxu0 %vm1034_vm4, %v3160_v2  ;;  %v4874_v9 = vpop.permute.xlu0 %2197 }
 0x4d4   : > { %3170 = vmatmul.mubr.msk.f32.gmra.mrb[22].mxu1 %vm1034_vm4, %v3160_v2  ;;  %2413 = vmatpush1.bf16.msra.mxu0 %v1724_v38 }
 0x4d5   : > { %2442 = vmatprep.mubr.bf16.mxu0 %v3768_v1  ;;  %3238 = vmatprep.mubr.msk.f32.mxu1 %vm3772_vm6, %v3767_v0 }
 0x4d6   : > { %v4872_v3 = vpop.permute.xlu1 %1859 }
 0x4d7   : > { %v4884_v24 = vpop.permute.xlu0 %2226 }
 0x4da   : > { %v4880_v26 = vpop.permute.xlu1 %2202 }
 0x4de   : > { %v4893_v17 = vpop.permute.xlu1 %2231 }
 0x591   : > { %v1934_v18 = vpop.f32.mrb[20].mxu0 }
 0x592   : > { %v1935_v11 = vadd.f32 %v1934_v18, %v4870_v61  ;;  %v1936_v46 = vpop.f32.mrb[21].mxu0 }
 0x593   : > { %v1937_v4 = vadd.f32 %v1936_v46, %v4870_v61 }
 0x594   : > { %v2176_v6 = vmax.f32 %v1935_v11, 0.0 }
 0x595   : > { %v2177_v41 = vmax.f32 %v1937_v4, 0.0  ;;  %v1940_v40 = vpop.f32.mrb[22].mxu0 }
 0x596   : > { %v2205_v37 = vmul.f32 %v4874_v9, %v2176_v6  ;;  %v1941_v49 = vadd.f32 %v1940_v40, %v4872_v3  ;;  %v1942_v59 = vpop.f32.mrb[23].mxu0  ;;  %v2011_v38 = vpop.f32.mrb[16].mxu1 }
 0x597   : > { %v2206_v53 = vmul.f32 %v4874_v9, %v2177_v41  ;;  %v1943_v22 = vadd.f32 %v1942_v59, %v4872_v3  ;;  %v2012_v56 = vadd.f32 %v2011_v38, %v4870_v61  ;;  %v2013_v19 = vpop.f32.mrb[17].mxu1 }
 0x598   : > { %v2234_v63 = vadd.f32 %v4884_v24, %v2205_v37  ;;  %v2184_v16 = vmax.f32 %v1941_v49, 0.0  ;;  %v2014_v36 = vadd.f32 %v2013_v19, %v4870_v61 }
 0x599   : > { %v2235_v5 = vadd.f32 %v4884_v24, %v2206_v53  ;;  %v2185_v32 = vmax.f32 %v1943_v22, 0.0  ;;  %v2178_v15 = vmax.f32 %v2012_v56, 0.0  ;;  %v2291_v22 = vstv %s4907_s25  ;;  %s5129_s25 = scalar_lea.vmem [#allocation7], %s3126_s23  ;;  %s3704_s23 = scalar_lea.vmem %s3703_s24, 4096 }
 0x59a   : > { %v2213_v13 = vmul.f32 %v4880_v26, %v2184_v16  ;;  %v2179_v2 = vmax.f32 %v2014_v36, 0.0  ;;  %v2017_v35 = vpop.f32.mrb[18].mxu1  ;;  %v2276_v29 = vmul.f32 %v2275_v62, %v2234_v63  ;;  %v2301_v36 = vstv %s4910_s26  ;;  %s3203_s26 = sshll.u32 %s3892_s0, 11  ;;  %s3046_s19 = sshll.u32 %s5129_s25, 4  ;;  %s5172_s19 = int_to_ptr.vmem [resolvable:$true] %s3046_s19 }
 0x59b   : > { %2251 = vst [vmem:[#allocation2 + $0x8] sm:$0xff] %v2235_v5  ;;  %v2214_v23 = vmul.f32 %v4880_v26, %v2185_v32  ;;  %v2207_v10 = vmul.f32 %v4874_v9, %v2178_v15  ;;  %v2018_v21 = vadd.f32 %v2017_v35, %v4872_v3  ;;  %v2019_v14 = vpop.f32.mrb[19].mxu1  ;;  %v2277_v44 = vmul.f32 %v2275_v62, %v2235_v5  ;;  %s5273_s0 = sld [smem:[#allocation19_spill]]  ;;  %s3698_s21 = scalar_lea.vmem %s5172_s19, 2048 }
 0x59c   : > { %2266 = vst.msk [vmem:[#allocation2 + $0x8] sm:$0xff] %vm947_vm1, %v3767_v0  ;;  %v2242_v34 = vadd.f32 %v4893_v17, %v2213_v13  ;;  %v2208_v25 = vmul.f32 %v4874_v9, %v2179_v2  ;;  %v2020_v47 = vadd.f32 %v2019_v14, %v4872_v3  ;;  %p3699_p9 = scmp.ne.s32.totalorder %s5172_s19, %s3698_s21  ;;  %p3705_p13 = scmp.lt.s32.totalorder %s5172_s19, %s3703_s24 }
 0x59d   : > { %v2243_v12 = vadd.f32 %v4893_v17, %v2214_v23  ;;  %v2236_v20 = vadd.f32 %v4884_v24, %v2207_v10  ;;  %v2186_v27 = vmax.f32 %v2018_v21, 0.0  ;;  %p3706_p0 = scmp.lt.s32.totalorder %s3704_s23, %s3698_s21 }
 0x59e   : > { %v2237_v57 = vadd.f32 %v4884_v24, %v2208_v25  ;;  %v2187_v43 = vmax.f32 %v2020_v47, 0.0  ;;  %v2278_v31 = vmul.f32 %v2275_v62, %v2242_v34  ;;  %p3700_p10 = pnand %p3699_p9, %p3909_p5 }
 0x59f   : > { %2259 = vst [vmem:[#allocation2 + $0x48] sm:$0xff] %v2243_v12  ;;  %v2282_v30 = vmul.f32 %v2281_v33, %v2236_v20  ;;  %v2215_v58 = vmul.f32 %v4880_v26, %v2186_v27  ;;  %v2279_v4 = vmul.f32 %v2275_v62, %v2243_v12  ;;  %p3707_p1 = por %p3706_p0, %p3705_p13 }
 0x5a0   : > { %2267 = vst.msk [vmem:[#allocation2 + $0x48] sm:$0xff] %vm947_vm1, %v3767_v0  ;;  %2253 = vst [vmem:[#allocation2 + $0x18] sm:$0xff] %v2237_v57  ;;  %v2283_v54 = vmul.f32 %v2281_v33, %v2237_v57  ;;  %v2216_v60 = vmul.f32 %v4880_v26, %v2187_v43  ;;  %p3701_p12 = pneg %p3700_p10 }
 0x5a1   : > { %v2286_v55 = vadd.f32 %v2282_v30, %v2276_v29  ;;  %2268 = vst.msk [vmem:[#allocation2 + $0x18] sm:$0xff] %vm947_vm1, %v3767_v0  ;;  %v2244_v52 = vadd.f32 %v4893_v17, %v2215_v58  ;;  %s5170_s20 = scalar_lea.hbm %s5273_s0, %s3203_s26 }
 0x5a2   : > { %v2287_v7 = vadd.f32 %v2283_v54, %v2277_v44  ;;  %v2245_v51 = vadd.f32 %v4893_v17, %v2216_v60  ;;  %v2088_v42 = vpop.f32.mrb[24].mxu0  ;;  %p3708_p2 = pnand %p3707_p1, %p3701_p12 }
 0x5a3   : > { %v2284_v28 = vmul.f32 %v2281_v33, %v2244_v52  ;;  %v2089_v18 = vadd.f32 %v2088_v42, %v4870_v61  ;;  %v2165_v11 = vpop.f32.mrb[20].mxu1  ;;  %v2090_v46 = vpop.f32.mrb[25].mxu0 }
 0x5a4   : > { %2261 = vst [vmem:[#allocation2 + $0x58] sm:$0xff] %v2245_v51  ;;  %v2285_v6 = vmul.f32 %v2281_v33, %v2245_v51  ;;  %v2166_v41 = vadd.f32 %v2165_v11, %v4870_v61  ;;  %v2091_v40 = vadd.f32 %v2090_v46, %v4870_v61  ;;  %v2167_v37 = vpop.f32.mrb[21].mxu1 }
 0x5a5   : > { %v2288_v49 = vadd.f32 %v2284_v28, %v2278_v31  ;;  %2269 = vst.msk [vmem:[#allocation2 + $0x58] sm:$0xff] %vm947_vm1, %v3767_v0  ;;  %v2180_v59 = vmax.f32 %v2089_v18, 0.0  ;;  %v2168_v38 = vadd.f32 %v2167_v37, %v4870_v61  ;;  %v3632_v37 = vld [vmem:[%s5233_s10 + $0x8] sm:$0xff]  }
 0x5a6   : > { %v2289_v53 = vadd.f32 %v2285_v6, %v2279_v4  ;;  %v2182_v56 = vmax.f32 %v2166_v41, 0.0  ;;  %v2181_v19 = vmax.f32 %v2091_v40, 0.0  ;;  %v2094_v63 = vpop.f32.mrb[26].mxu0 }
 0x5a7   : > { %v2209_v16 = vmul.f32 %v4874_v9, %v2180_v59  ;;  %v2183_v5 = vmax.f32 %v2168_v38, 0.0  ;;  %v2095_v32 = vadd.f32 %v2094_v63, %v4872_v3  ;;  %v2171_v15 = vpop.f32.mrb[22].mxu1  ;;  %v2096_v13 = vpop.f32.mrb[27].mxu0 }
 0x5a8   : > { %v2211_v2 = vmul.f32 %v4874_v9, %v2182_v56  ;;  %v2210_v35 = vmul.f32 %v4874_v9, %v2181_v19  ;;  %v2172_v62 = vadd.f32 %v2171_v15, %v4872_v3  ;;  %v2097_v61 = vadd.f32 %v2096_v13, %v4872_v3  ;;  %v2173_v23 = vpop.f32.mrb[23].mxu1 }
 0x5a9   : > { %v2238_v10 = vadd.f32 %v4884_v24, %v2209_v16  ;;  %v2212_v21 = vmul.f32 %v4874_v9, %v2183_v5  ;;  %v2188_v14 = vmax.f32 %v2095_v32, 0.0  ;;  %v2174_v34 = vadd.f32 %v2173_v23, %v4872_v3 }
 0x5aa   : > { %v2240_v33 = vadd.f32 %v4884_v24, %v2211_v2  ;;  %v2239_v25 = vadd.f32 %v4884_v24, %v2210_v35  ;;  %v2190_v47 = vmax.f32 %v2172_v62, 0.0  ;;  %v2189_v12 = vmax.f32 %v2097_v61, 0.0 }
 0x5ab   : > { %v2292_v20 = vmul.f32 %v2291_v22, %v2238_v10  ;;  %v2241_v27 = vadd.f32 %v4884_v24, %v2212_v21  ;;  %v2217_v57 = vmul.f32 %v4880_v26, %v2188_v14  ;;  %v2191_v43 = vmax.f32 %v2174_v34, 0.0 }
 0x5ac   : > { %2255 = vst [vmem:[#allocation2 + $0x28] sm:$0xff] %v2239_v25  ;;  %v2293_v29 = vmul.f32 %v2291_v22, %v2239_v25  ;;  %v2219_v30 = vmul.f32 %v4880_v26, %v2190_v47  ;;  %v2218_v9 = vmul.f32 %v4880_v26, %v2189_v12  ;;  %v2302_v3 = vmul.f32 %v2301_v36, %v2240_v33 }
 0x5ad   : > { %v2296_v58 = vadd.f32 %v2292_v20, %v2286_v55  ;;  %2270 = vst.msk [vmem:[#allocation2 + $0x28] sm:$0xff] %vm947_vm1, %v3767_v0  ;;  %2257 = vst [vmem:[#allocation2 + $0x38] sm:$0xff] %v2241_v27  ;;  %v2246_v44 = vadd.f32 %v4893_v17, %v2217_v57  ;;  %v2220_v54 = vmul.f32 %v4880_v26, %v2191_v43  ;;  %v2627_v5 = vadd.s32 128, %v4138_v8 }
 0x5ae   : > { %2272 = vst.msk [vmem:[#allocation2 + $0x38] sm:$0xff] %vm947_vm1, %v3767_v0  ;;  %v2303_v24 = vmul.f32 %v2301_v36, %v2241_v27  ;;  %v2248_v60 = vadd.f32 %v4893_v17, %v2219_v30  ;;  %v2247_v52 = vadd.f32 %v4893_v17, %v2218_v9  ;;  %v2297_v51 = vadd.f32 %v2293_v29, %v2287_v7 }
 0x5af   : > { %v2306_v42 = vadd.f32 %v2302_v3, %v2296_v58  ;;  %v2294_v55 = vmul.f32 %v2291_v22, %v2246_v44  ;;  %v2249_v31 = vadd.f32 %v4893_v17, %v2220_v54  ;;  %v3631_v17 = vld [vmem:[%s5233_s10] sm:$0xff]   ;;  %vm2629_vm5 = vcmp.lt.s32.totalorder %v2627_v5, 200 }
 0x5b0   : > { %2263 = vst [vmem:[#allocation2 + $0x68] sm:$0xff] %v2247_v52  ;;  %v2295_v28 = vmul.f32 %v2291_v22, %v2247_v52  ;;  %v2307_v18 = vadd.f32 %v2303_v24, %v2297_v51  ;;  %v2304_v46 = vmul.f32 %v2301_v36, %v2248_v60  ;;  %v4986_v20 = vsel %vm2629_vm5, 1.0, %v3767_v0 }
 0x5b1   : > { %v2298_v11 = vadd.f32 %v2294_v55, %v2288_v49  ;;  %2271 = vst.msk [vmem:[#allocation2 + $0x68] sm:$0xff] %vm947_vm1, %v3767_v0  ;;  %2265 = vst [vmem:[#allocation2 + $0x78] sm:$0xff] %v2249_v31  ;;  %v2305_v26 = vmul.f32 %v2301_v36, %v2249_v31 }
 0x5b2   : > { %2273 = vst.msk [vmem:[#allocation2 + $0x78] sm:$0xff] %vm947_vm1, %v3767_v0  ;;  %v2299_v4 = vadd.f32 %v2295_v28, %v2289_v53 }
 0x5b3   : > { %v2308_v6 = vadd.f32 %v2304_v46, %v2298_v11 }
 0x5b4   : > { %v2309_v7 = vadd.f32 %v2305_v26, %v2299_v4 }
 0x5b5   : > { %v2310_v41 = vpack.c.bf16 %v2308_v6, %v2306_v42 }
 0x5b6   : > { %v2311_v40 = vpack.c.bf16 %v2309_v7, %v2307_v18 }
 0x5b8   : > { %2414 = vmatprep.subr.bf16.mxu0 %v2311_v40 }
 0x5b9   : > { %2415 = vmatpush1.bf16.msra.mxu0 %v2310_v41 }
 0x5ba   : > { %2416 = vmatprep.subr.bf16.mxu0 %v951_v50  ;;  %v2346_v50 = vpop.permute.xlu1 %2345 }
 0x5bd   : > { %2417 = vmatpush1.bf16.msra.mxu0 %v4079_v48  ;;  %v2341_v48 = vpop.permute.xlu0 %2340 }
 0x5be   : > { %v2356_v59 = vpop.permute.xlu1 %2355 }
 0x5c0   : > { %3183 = vmatmul.mubr.msk.bf16.vlgmr.msra.gmra.mrb[28].mxu0 %vm661_vm0, %v3631_v17 }
 0x5c1   : > { %2452 = vmatprep.mubr.bf16.mxu0 %v3768_v1  ;;  %v2351_v49 = vpop.permute.xlu0 %2350 }
 0x5c2   : > { %v2515_v53 = vpop.permute.xlu1 %2514 }
 0x5c5   : > { %v2510_v38 = vpop.permute.xlu0 %2509 }
 0x5c6   : > { %v2579_v56 = vpop.permute.xlu1 %2578 }
 0x5c8   : > { %3184 = vmatmul.mubr.msk.bf16.gmra.mrb[32].mxu0 %vm661_vm0, %v3632_v37 }
 0x5c9   : > { %2462 = vmatprep.mubr.bf16.mxu0 %v3768_v1  ;;  %v2574_v22 = vpop.permute.xlu0 %2573 }
 0x5ca   : > { %v4978_v63 = vpop.permute.xlu1 %2365 }
 0x5cd   : > { %v2361_v19 = vpop.permute.xlu0 %2360 }
 0x5ce   : > { %v2525_v36 = vpop.permute.xlu1 %2524 }
 0x5d0   : > { %3185 = vmatmul.mubr.msk.bf16.gmra.mrb[36].mxu0 %vm661_vm0, %v3633_v39 }
 0x5d1   : > { %2472 = vmatprep.mubr.bf16.mxu0 %v3768_v1  ;;  %v2520_v16 = vpop.permute.xlu0 %2519 }
 0x5d2   : > { %v4981_v62 = vpop.permute.xlu1 %2588 }
 0x5d5   : > { %v2584_v32 = vpop.permute.xlu0 %2583 }
 0x5d6   : > { %v4990_v29 = vpop.permute.xlu1 %2375 }
 0x5d8   : > { %3186 = vmatmul.mubr.msk.bf16.gmra.mrb[40].mxu0 %vm661_vm0, %v3634_v45 }
 0x5d9   : > { %v4983_v12 = vpop.permute.xlu0 %2370 }
 0x5da   : > { %v2535_v41 = vpop.permute.xlu1 %2534 }
 0x5dd   : > { %v2530_v11 = vpop.permute.xlu0 %2529 }
 0x693   : > { %v2444_v1 = vpop.f32.mrb[28].mxu0 }
 0x694   : > { %v2445_v15 = vadd.f32 %v2444_v1, %v2341_v48  ;;  %v2446_v13 = vpop.f32.mrb[29].mxu0 }
 0x695   : > { %v2447_v2 = vadd.f32 %v2446_v13, %v2341_v48  ;;  %v2448_v35 = vpop.f32.mrb[30].mxu0  ;;  %v2599_v13 = vpop.permute.xlu1 %2598 }
 0x696   : > { %v2483_v61 = vmax.f32 %v2445_v15, 0.0  ;;  %v2449_v23 = vadd.f32 %v2448_v35, %v2346_v50  ;;  %v2450_v10 = vpop.f32.mrb[31].mxu0 }
 0x697   : > { %v2484_v21 = vmax.f32 %v2447_v2, 0.0  ;;  %v2451_v14 = vadd.f32 %v2450_v10, %v2346_v50 }
 0x698   : > { %v2485_v34 = vmax.f32 %v2449_v23, 0.0  ;;  %v2547_v33 = vmul.f32 %v2510_v38, %v2483_v61 }
 0x699   : > { %v2548_v25 = vmul.f32 %v2510_v38, %v2484_v21  ;;  %v2486_v47 = vmax.f32 %v2451_v14, 0.0 }
 0x69a   : > { %v2549_v8 = vmul.f32 %v2515_v53, %v2485_v34  ;;  %v4992_v58 = vadd.f32 %v2574_v22, %v2547_v33 }
 0x69b   : > { %v4988_v27 = vadd.f32 %v2574_v22, %v2548_v25  ;;  %v2550_v57 = vmul.f32 %v2515_v53, %v2486_v47  ;;  %v2454_v43 = vpop.f32.mrb[32].mxu0  ;;  %v2594_v22 = vpop.permute.xlu0 %2593 }
 0x69c   : > { %v2455_v30 = vadd.f32 %v2454_v43, %v2351_v49  ;;  %v2456_v9 = vpop.f32.mrb[33].mxu0  ;;  %v4998_v60 = vadd.f32 %v2579_v56, %v2549_v8 }
 0x69d   : > { %v4994_v3 = vadd.f32 %v2579_v56, %v2550_v57  ;;  %v2457_v44 = vadd.f32 %v2456_v9, %v2351_v49  ;;  %v2458_v54 = vpop.f32.mrb[34].mxu0  ;;  %v2635_v24 = vmul.f32 %v4986_v20, %v4988_v27  ;;  %v2545_v9 = vpop.permute.xlu1 %2544 }
 0x69e   : > { %v2487_v52 = vmax.f32 %v2455_v30, 0.0  ;;  %v2459_v51 = vadd.f32 %v2458_v54, %v2356_v59  ;;  %v2460_v42 = vpop.f32.mrb[35].mxu0 }
 0x69f   : > { %v2488_v55 = vmax.f32 %v2457_v44, 0.0  ;;  %v2461_v31 = vadd.f32 %v2460_v42, %v2356_v59  ;;  %v2650_v28 = vadd.f32 %v2635_v24, %v4992_v58  ;;  %v2637_v18 = vmul.f32 %v4986_v20, %v4994_v3  ;;  %v2540_v33 = vpop.permute.xlu0 %2539 }
 0x6a0   : > { %v2551_v46 = vmul.f32 %v2520_v16, %v2487_v52  ;;  %v2489_v4 = vmax.f32 %v2459_v51, 0.0 }
 0x6a1   : > { %v2552_v26 = vmul.f32 %v2520_v16, %v2488_v55  ;;  %v2490_v6 = vmax.f32 %v2461_v31, 0.0  ;;  %2651 = vadd.xlane.f32.xlu0 %v2650_v28  ;;  %v2653_v7 = vadd.f32 %v2637_v18, %v4998_v60 }
 0x6a2   : > { %v5006_v39 = vadd.f32 %v2584_v32, %v2551_v46  ;;  %v2553_v50 = vmul.f32 %v2525_v36, %v2489_v4 }
 0x6a3   : > { %v5004_v40 = vadd.f32 %v2584_v32, %v2552_v26  ;;  %v2554_v17 = vmul.f32 %v2525_v36, %v2490_v6  ;;  %v2464_v37 = vpop.f32.mrb[36].mxu0  ;;  %2654 = vadd.xlane.f32.xlu1 %v2653_v7  ;;  %v2604_v26 = vpop.permute.xlu0 %2603 }
 0x6a4   : > { %v2465_v45 = vadd.f32 %v2464_v37, %v2361_v19  ;;  %v2466_v48 = vpop.f32.mrb[37].mxu0 }
 0x6a5   : > { %v5009_v49 = vadd.f32 %v4981_v62, %v2554_v17  ;;  %v2467_v59 = vadd.f32 %v2466_v48, %v2361_v19  ;;  %v2468_v38 = vpop.f32.mrb[38].mxu0  ;;  %v2639_v53 = vmul.f32 %v4986_v20, %v5004_v40  ;;  %v5019_v19 = vadd.f32 %v4981_v62, %v2553_v50 }
 0x6a6   : > { %v2491_v56 = vmax.f32 %v2465_v45, 0.0  ;;  %v2469_v16 = vadd.f32 %v2468_v38, %v4978_v63  ;;  %v2470_v1 = vpop.f32.mrb[39].mxu0 }
 0x6a7   : > { %v2492_v5 = vmax.f32 %v2467_v59, 0.0  ;;  %v2471_v32 = vadd.f32 %v2470_v1, %v4978_v63  ;;  %v2656_v15 = vadd.f32 %v2639_v53, %v5006_v39  ;;  %v2641_v36 = vmul.f32 %v4986_v20, %v5009_v49 }
 0x6a8   : > { %v2493_v2 = vmax.f32 %v2469_v16, 0.0  ;;  %v2555_v35 = vmul.f32 %v2530_v11, %v2491_v56 }
 0x6a9   : > { %v2556_v61 = vmul.f32 %v2530_v11, %v2492_v5  ;;  %v2494_v23 = vmax.f32 %v2471_v32, 0.0  ;;  %2657 = vadd.xlane.f32.xlu0 %v2656_v15  ;;  %v2659_v63 = vadd.f32 %v2641_v36, %v5019_v19 }
 0x6aa   : > { %v2557_v10 = vmul.f32 %v2535_v41, %v2493_v2  ;;  %v5025_v8 = vadd.f32 %v2594_v22, %v2555_v35 }
 0x6ab   : > { %v5021_v21 = vadd.f32 %v2594_v22, %v2556_v61  ;;  %v2558_v14 = vmul.f32 %v2535_v41, %v2494_v23  ;;  %v2474_v34 = vpop.f32.mrb[40].mxu0  ;;  %v2609_v41 = vpop.permute.xlu1 %2608 }
 0x6ac   : > { %v2475_v25 = vadd.f32 %v2474_v34, %v4983_v12  ;;  %v2476_v47 = vpop.f32.mrb[41].mxu0  ;;  %v5032_v44 = vadd.f32 %v2599_v13, %v2557_v10 }
 0x6ad   : > { %v5027_v57 = vadd.f32 %v2599_v13, %v2558_v14  ;;  %v2477_v62 = vadd.f32 %v2476_v47, %v4983_v12  ;;  %v2478_v43 = vpop.f32.mrb[42].mxu0  ;;  %2660 = vadd.xlane.f32.xlu0 %v2659_v63  ;;  %v2643_v30 = vmul.f32 %v4986_v20, %v5021_v21  ;;  %v2683_v47 = vld [vmem:[%s5238_s15] sm:$0xff] }
 0x6ae   : > { %v2495_v54 = vmax.f32 %v2475_v25, 0.0  ;;  %v2479_v24 = vadd.f32 %v2478_v43, %v4990_v29  ;;  %v2480_v52 = vpop.f32.mrb[43].mxu0  ;;  %v2758_v25 = vld [vmem:[%s5239_s16] sm:$0xff] }
 0x6af   : > { %v2496_v51 = vmax.f32 %v2477_v62, 0.0  ;;  %v2481_v42 = vadd.f32 %v2480_v52, %v4990_v29  ;;  %v2662_v55 = vadd.f32 %v2643_v30, %v5025_v8  ;;  %v2645_v12 = vmul.f32 %v4986_v20, %v5027_v57  ;;  %v2761_v52 = vld [vmem:[%s5239_s16 + $0x18] sm:$0xff] }
 0x6b0   : > { %v2497_v31 = vmax.f32 %v2479_v24, 0.0  ;;  %v2559_v28 = vmul.f32 %v2540_v33, %v2495_v54  ;;  %v3771_v29 = vmov 0.0|0.0   ;;  %v2759_v54 = vld [vmem:[%s5239_s16 + $0x8] sm:$0xff]  ;;  %v2760_v24 = vld [vmem:[%s5239_s16 + $0x10] sm:$0xff] }
 0x6b1   : > { %v2560_v18 = vmul.f32 %v2540_v33, %v2496_v51  ;;  %v2498_v11 = vmax.f32 %v2481_v42, 0.0  ;;  %2663 = vadd.xlane.f32.xlu1 %v2662_v55  ;;  %v2665_v46 = vadd.f32 %v2645_v12, %v5032_v44  ;;  %3379 = vmatprep.subr.bf16.mxu1 %v3771_v29  ;;  %v2682_v33 = vld [vmem:[%s5237_s14] sm:$0xff]  ;;  %v2763_v42 = vld [vmem:[%s5239_s16 + $0x28] sm:$0xff]  ;;  %v2764_v55 = vld [vmem:[%s5239_s16 + $0x30] sm:$0xff] }
 0x6b2   : > { %v2561_v6 = vmul.f32 %v2545_v9, %v2497_v31  ;;  %v5042_v17 = vadd.f32 %v2604_v26, %v2559_v28  ;;  %v2762_v51 = vld [vmem:[%s5239_s16 + $0x20] sm:$0xff]  ;;  %v2765_v12 = vld [vmem:[%s5239_s16 + $0x38] sm:$0xff]  ;;  %v2767_v31 = vld [vmem:[%s5240_s17 + $0x8] sm:$0xff] }
 0x6b3   : > { %v5040_v4 = vadd.f32 %v2604_v26, %v2560_v18  ;;  %v2562_v7 = vmul.f32 %v2545_v9, %v2498_v11  ;;  %2666 = vadd.xlane.f32.xlu0 %v2665_v46  ;;  %v2766_v28 = vld [vmem:[%s5240_s17] sm:$0xff] }
 0x6b4   : > { %v5048_v48 = vadd.f32 %v2609_v41, %v2561_v6  ;;  %v2769_v6 = vld [vmem:[%s5240_s17 + $0x18] sm:$0xff] }
 0x6b5   : > { %v5044_v37 = vadd.f32 %v2609_v41, %v2562_v7  ;;  %v2647_v45 = vmul.f32 %v4986_v20, %v5040_v4  ;;  %v2768_v41 = vld [vmem:[%s5240_s17 + $0x10] sm:$0xff] }
 0x6b7   : > { %v2668_v50 = vadd.f32 %v2647_v45, %v5042_v17  ;;  %v2649_v59 = vmul.f32 %v4986_v20, %v5044_v37 }
 0x6b9   : > { %2669 = vadd.xlane.f32.xlu1 %v2668_v50  ;;  %v2671_v38 = vadd.f32 %v2649_v59, %v5048_v48 }
 0x6bb   : > { %2672 = vadd.xlane.f32.xlu0 %v2671_v38 }
 0x72e   : > { %v2652_v53 = vpop.xlane.xlu0 %2651 }
 0x72f   : > { %v2674_v56 = vmul.f32 0.005, %v2652_v53 }
 0x730   : > { %v2655_v22 = vpop.xlane.xlu1 %2654 }
 0x731   : > { %v2675_v16 = vmul.f32 0.005, %v2655_v22 }
 0x733   : > { %v3380_v1 = vpack.c.bf16 %v2675_v16, %v2674_v56  ;;  %v2771_v56 = vld [vmem:[%s5240_s17 + $0x28] sm:$0xff] }
 0x735   : > { %3381 = vmatpush3.bf16.msra.mxu1 %v3380_v1  ;;  %v2770_v1 = vld [vmem:[%s5240_s17 + $0x20] sm:$0xff] }
 0x736   : > { %v2658_v5 = vpop.xlane.xlu0 %2657  ;;  %3382 = vmatprep.subr.bf16.mxu1 %v3771_v29 }
 0x737   : > { %v2676_v15 = vmul.f32 0.005, %v2658_v5 }
 0x73a   : > { %v2661_v32 = vpop.xlane.xlu0 %2660 }
 0x73b   : > { %v2677_v36 = vmul.f32 0.005, %v2661_v32 }
 0x73d   : > { %v3383_v13 = vpack.c.bf16 %v2677_v36, %v2676_v15 }
 0x73e   : > { %v2664_v20 = vpop.xlane.xlu1 %2663 }
 0x73f   : > { %3384 = vmatpush3.bf16.msra.mxu1 %v3383_v13  ;;  %v2678_v35 = vmul.f32 0.005, %v2664_v20 }
 0x740   : > { %v2667_v2 = vpop.xlane.xlu0 %2666  ;;  %3385 = vmatprep.subr.bf16.mxu1 %v3771_v29 }
 0x741   : > { %v2679_v61 = vmul.f32 0.005, %v2667_v2 }
 0x743   : > { %v3386_v23 = vpack.c.bf16 %v2679_v61, %v2678_v35  ;;  %v2773_v35 = vld [vmem:[%s5240_s17 + $0x38] sm:$0xff] }
 0x745   : > { %3387 = vmatpush3.bf16.msra.mxu1 %v3386_v23  ;;  %v2772_v23 = vld [vmem:[%s5240_s17 + $0x30] sm:$0xff] }
 0x746   : > { %v2670_v0 = vpop.xlane.xlu1 %2669  ;;  %3388 = vmatprep.subr.bf16.mxu1 %v3771_v29 }
 0x747   : > { %v2680_v14 = vmul.f32 0.005, %v2670_v0 }
 0x748   : > { %v2673_v10 = vpop.xlane.xlu0 %2672 }
 0x749   : > { %v2681_v34 = vmul.f32 0.005, %v2673_v10 }
 0x74b   : > { %v3389_v63 = vpack.c.bf16 %v2681_v34, %v2680_v14 }
 0x74d   : > { %3390 = vmatpush3.bf16.msra.mxu1 %v3389_v63 }
 0x750   : > { %3239 = vmatmul.mubr.msk.f32.vlgmr.msra.gmra.mrb[24].mxu1 %vm661_vm0, %v2682_v33 }
 0x751   : > { %3243 = vmatprep.mubr.msk.f32.mxu1 %vm2774_vm7, %v2758_v25 }
 0x823   : > { %v2753_v62 = vpop.f32.mrb[24].mxu1 }
 0x824   : > { %v2754_v43 = vadd.f32 %v2753_v62, %v2683_v47  ;;  %v3240_v30 = vpop.f32.mrb[25].mxu1 }
 0x826   : > { %v2757_v9 = vmax.f32 %v2754_v43, 0.0 }
 0x828   : > { %3241 = vmatprep.subr.mxu1 %v2757_v9 }
 0x829   : > { %3242 = vmatpush3.msra.mxu1 %v2757_v9 }
 0x82a   : > { %3244 = vmatmul.mubr.msk.f32.vlgmr.msra.gmra.mrb[26].mxu1 %vm2774_vm7, %v2759_v54 }
 0x82b   : > { %3246 = vmatprep.mubr.msk.f32.mxu1 %vm2774_vm7, %v2760_v24 }
 0x82e   : > { %3247 = vmatmul.mubr.msk.f32.gmra.mrb[28].mxu1 %vm2774_vm7, %v2761_v52 }
 0x82f   : > { %3249 = vmatprep.mubr.msk.f32.mxu1 %vm2774_vm7, %v2762_v51 }
 0x832   : > { %3250 = vmatmul.mubr.msk.f32.gmra.mrb[30].mxu1 %vm2774_vm7, %v2763_v42 }
 0x833   : > { %3252 = vmatprep.mubr.msk.f32.mxu1 %vm2774_vm7, %v2764_v55 }
 0x836   : > { %3253 = vmatmul.mubr.msk.f32.gmra.mrb[32].mxu1 %vm2774_vm7, %v2765_v12 }
 0x8fd   : > { %v3245_v18 = vpop.f32.mrb[26].mxu1 }
 0x8fe   : > { %v2871_v11 = vadd.f32 %v3245_v18, %v2767_v31  ;;  %v2865_v46 = vpop.f32.mrb[27].mxu1 }
 0x8ff   : > { %v2866_v26 = vadd.f32 %v2865_v46, %v2766_v28 }
 0x900   : > { %v2905_v7 = vsub.f32 0.0, %v2871_v11 }
 0x901   : > { %v2904_v29 = vsub.f32 0.0, %v2866_v26  ;;  %v3248_v45 = vpop.f32.mrb[28].mxu1 }
 0x902   : > { %v2914_v50 = vmul.f32 1.442695, %v2905_v7  ;;  %v2881_v59 = vadd.f32 %v3248_v45, %v2769_v6  ;;  %v2875_v38 = vpop.f32.mrb[29].mxu1 }
 0x903   : > { %v2912_v53 = vmul.f32 1.442695, %v2904_v29  ;;  %v2876_v22 = vadd.f32 %v2875_v38, %v2768_v41 }
 0x904   : > { %3635 = vpow2.f32 %v2914_v50  ;;  %v2907_v16 = vsub.f32 0.0, %v2881_v59 }
 0x905   : > { %3637 = vpow2.f32 %v2912_v53  ;;  %v2906_v5 = vsub.f32 0.0, %v2876_v22  ;;  %v3251_v32 = vpop.f32.mrb[30].mxu1 }
 0x906   : > { %v2918_v15 = vmul.f32 1.442695, %v2907_v16  ;;  %v2891_v36 = vadd.f32 %v3251_v32, %v2771_v56  ;;  %v2885_v13 = vpop.f32.mrb[31].mxu1 }
 0x907   : > { %v2916_v20 = vmul.f32 1.442695, %v2906_v5  ;;  %v2886_v2 = vadd.f32 %v2885_v13, %v2770_v1 }
 0x908   : > { %3639 = vpow2.f32 %v2918_v15  ;;  %v2909_v61 = vsub.f32 0.0, %v2891_v36  ;;  %v3667_v36 = vld [vmem:[%s3955_s30 + $0x10] sm:$0xff] }
 0x909   : > { %3641 = vpow2.f32 %v2916_v20  ;;  %v2908_v0 = vsub.f32 0.0, %v2886_v2  ;;  %v3254_v10 = vpop.f32.mrb[32].mxu1  ;;  %v3668_v20 = vld [vmem:[%s3955_s30 + $0x18] sm:$0xff] }
 0x90a   : > { %v2922_v14 = vmul.f32 1.442695, %v2909_v61  ;;  %v2901_v34 = vadd.f32 %v3254_v10, %v2773_v35  ;;  %v2895_v63 = vpop.f32.mrb[33].mxu1  ;;  %v3669_v35 = vld [vmem:[%s3955_s30] sm:$0xff] }
 0x90b   : > { %v2920_v33 = vmul.f32 1.442695, %v2908_v0  ;;  %v2896_v25 = vadd.f32 %v2895_v63, %v2772_v23  ;;  %v3670_v23 = vld [vmem:[%s3955_s30 + $0x8] sm:$0xff] }
 0x90c   : > { %3643 = vpow2.f32 %v2922_v14  ;;  %v2911_v47 = vsub.f32 0.0, %v2901_v34  ;;  %v3672_v14 = vld [vmem:[%s3955_s30 + $0x38] sm:$0xff] }
 0x90d   : > { %3645 = vpow2.f32 %v2920_v33  ;;  %v2910_v62 = vsub.f32 0.0, %v2896_v25 }
 0x90e   : > { %v3636_v43 = vpop.eup %3635  ;;  %v2926_v30 = vmul.f32 1.442695, %v2911_v47 }
 0x90f   : > { %v3638_v9 = vpop.eup %3637  ;;  %v2929_v54 = vadd.f32 1.0, %v3636_v43  ;;  %v2924_v24 = vmul.f32 1.442695, %v2910_v62  ;;  %v3673_v62 = vld [vmem:[%s3955_s30 + $0x40] sm:$0xff] }
 0x910   : > { %v2928_v52 = vadd.f32 1.0, %v3638_v9  ;;  %3647 = vpow2.f32 %v2926_v30  ;;  %v3674_v30 = vld [vmem:[%s3955_s30 + $0x48] sm:$0xff] }
 0x911   : > { %3649 = vrcp.f32 %v2929_v54  ;;  %v3675_v54 = vld [vmem:[%s3955_s30 + $0x20] sm:$0xff] }
 0x912   : > { %v3640_v51 = vpop.eup %3639  ;;  %3651 = vrcp.f32 %v2928_v52  ;;  %v3676_v52 = vld [vmem:[%s3955_s30 + $0x28] sm:$0xff] }
 0x913   : > { %v3642_v42 = vpop.eup %3641  ;;  %v2931_v55 = vadd.f32 1.0, %v3640_v51  ;;  %3653 = vpow2.f32 %v2924_v24 }
 0x914   : > { %v2930_v12 = vadd.f32 1.0, %v3642_v42 }
 0x915   : > { %3655 = vrcp.f32 %v2931_v55 }
 0x916   : > { %v3644_v31 = vpop.eup %3643  ;;  %3657 = vrcp.f32 %v2930_v12  ;;  %v3677_v12 = vld [vmem:[%s3955_s30 + $0x50] sm:$0xff] }
 0x917   : > { %v3646_v28 = vpop.eup %3645  ;;  %v2933_v18 = vadd.f32 1.0, %v3644_v31 }
 0x918   : > { %v2932_v11 = vadd.f32 1.0, %v3646_v28  ;;  %v3678_v28 = vld [vmem:[%s3955_s30 + $0x58] sm:$0xff] }
 0x91a   : > { %v3648_v46 = vpop.eup %3647  ;;  %3659 = vrcp.f32 %v2932_v11  ;;  %v3679_v11 = vld [vmem:[%s3955_s30 + $0x60] sm:$0xff] }
 0x91b   : > { %v3650_v26 = vpop.eup %3649  ;;  %v2935_v6 = vadd.f32 1.0, %v3648_v46  ;;  %3661 = vrcp.f32 %v2933_v18  ;;  %v3680_v46 = vld [vmem:[%s3955_s30 + $0x68] sm:$0xff] }
 0x91c   : > { %v3652_v7 = vpop.eup %3651  ;;  %2951 = vperm.xlu0 %3449, %v3650_v26  }
 0x91d   : > { %v3654_v41 = vpop.eup %3653  ;;  %2946 = vperm.xlu1 %3450, %v3652_v7   ;;  %3663 = vrcp.f32 %v2935_v6  ;;  %v3681_v6 = vld [vmem:[%s3955_s30 + $0x70] sm:$0xff] }
 0x91e   : > { %v2934_v29 = vadd.f32 1.0, %v3654_v41  ;;  %v3682_v41 = vld [vmem:[%s3955_s30 + $0x78] sm:$0xff] }
 0x91f   : > { %v3656_v45 = vpop.eup %3655 }
 0x920   : > { %3665 = vrcp.f32 %v2934_v29  ;;  %v3658_v50 = vpop.eup %3657 }
 0x921   : > { %2961 = vperm.xlu1 %3450, %v3656_v45  }
 0x924   : > { %v3660_v59 = vpop.eup %3659 }
 0x925   : > { %2966 = vperm.xlu0 %3449, %v3660_v59   ;;  %2956 = vperm.xlu1 %3450, %v3658_v50   ;;  %v3662_v38 = vpop.eup %3661 }
 0x927   : > { %v3664_v53 = vpop.eup %3663 }
 0x929   : > { %2971 = vperm.xlu1 %3450, %v3662_v38  }
 0x92a   : > { %v3666_v22 = vpop.eup %3665 }
 0x92b   : > { %2976 = vperm.xlu0 %3449, %v3666_v22  }
 0x92d   : > { %2981 = vperm.xlu1 %3450, %v3664_v53  }
 0x99b   : > { %v2952_v56 = vpop.permute.xlu0 %2951 }
 0x99c   : > { %v2986_v16 = vmul.f32 %v2952_v56, %v4998_v60  ;;  %v2987_v1 = vmul.f32 %v2952_v56, %v4994_v3  ;;  %v2947_v5 = vpop.permute.xlu1 %2946  ;;  %v3671_v60 = vld [vmem:[%s3955_s30 + $0x30] sm:$0xff] }
 0x99d   : > { %v2984_v32 = vmul.f32 %v2947_v5, %v4992_v58  ;;  %v2985_v15 = vmul.f32 %v2947_v5, %v4988_v27 }
 0x99e   : > { %v3002_v13 = vadd.f32 %v3667_v36, %v2986_v16  ;;  %v3003_v2 = vadd.f32 %v3668_v20, %v2987_v1 }
 0x99f   : > { %v3000_v61 = vadd.f32 %v3669_v35, %v2984_v32  ;;  %v3001_v0 = vadd.f32 %v3670_v23, %v2985_v15 }
 0x9a0   : > { %3018 = vst [vmem:[%s5129_s25 + $0x10] sm:$0xff] %v3002_v13  ;;  %3019 = vst [vmem:[%s5129_s25 + $0x18] sm:$0xff] %v3003_v2  ;;  %v2962_v27 = vpop.permute.xlu1 %2961 }
 0x9a1   : > { %3016 = vst [vmem:[%s5129_s25] sm:$0xff] %v3000_v61  ;;  %3017 = vst [vmem:[%s5129_s25 + $0x8] sm:$0xff] %v3001_v0  ;;  %v2990_v58 = vmul.f32 %v2962_v27, %v5019_v19  ;;  %v2991_v3 = vmul.f32 %v2962_v27, %v5009_v49 }
 0x9a3   : > { %v3006_v10 = vadd.f32 %v3671_v60, %v2990_v58  ;;  %v3007_v34 = vadd.f32 %v3672_v14, %v2991_v3 }
 0x9a4   : > { %v2967_v63 = vpop.permute.xlu0 %2966  ;;  %v2957_v33 = vpop.permute.xlu1 %2956 }
 0x9a5   : > { %3022 = vst [vmem:[%s5129_s25 + $0x30] sm:$0xff] %v3006_v10  ;;  %3023 = vst [vmem:[%s5129_s25 + $0x38] sm:$0xff] %v3007_v34  ;;  %v2992_v25 = vmul.f32 %v2967_v63, %v5025_v8  ;;  %v2993_v19 = vmul.f32 %v2967_v63, %v5021_v21  ;;  %v2988_v49 = vmul.f32 %v2957_v33, %v5006_v39 }
 0x9a6   : > { %v2989_v47 = vmul.f32 %v2957_v33, %v5004_v40 }
 0x9a7   : > { %v3008_v43 = vadd.f32 %v3673_v62, %v2992_v25  ;;  %v3009_v9 = vadd.f32 %v3674_v30, %v2993_v19  ;;  %v3004_v24 = vadd.f32 %v3675_v54, %v2988_v49 }
 0x9a8   : > { %v3005_v51 = vadd.f32 %v3676_v52, %v2989_v47  ;;  %v2972_v8 = vpop.permute.xlu1 %2971 }
 0x9a9   : > { %3024 = vst [vmem:[%s5129_s25 + $0x40] sm:$0xff] %v3008_v43  ;;  %3025 = vst [vmem:[%s5129_s25 + $0x48] sm:$0xff] %v3009_v9  ;;  %v2994_v40 = vmul.f32 %v2972_v8, %v5032_v44  ;;  %v2995_v39 = vmul.f32 %v2972_v8, %v5027_v57 }
 0x9aa   : > { %3020 = vst [vmem:[%s5129_s25 + $0x20] sm:$0xff] %v3004_v24  ;;  %3021 = vst [vmem:[%s5129_s25 + $0x28] sm:$0xff] %v3005_v51  ;;  %v2977_v21 = vpop.permute.xlu0 %2976 }
 0x9ab   : > { %v2996_v42 = vmul.f32 %v2977_v21, %v5042_v17  ;;  %v2997_v55 = vmul.f32 %v2977_v21, %v5040_v4  ;;  %v3010_v31 = vadd.f32 %v3677_v12, %v2994_v40  ;;  %v3011_v18 = vadd.f32 %v3678_v28, %v2995_v39 }
 0x9ac   : > { %v2982_v44 = vpop.permute.xlu1 %2981 }
 0x9ad   : > { %v3012_v57 = vadd.f32 %v3679_v11, %v2996_v42  ;;  %v3013_v17 = vadd.f32 %v3680_v46, %v2997_v55  ;;  %3026 = vst [vmem:[%s5129_s25 + $0x50] sm:$0xff] %v3010_v31  ;;  %3027 = vst [vmem:[%s5129_s25 + $0x58] sm:$0xff] %v3011_v18  ;;  %v2998_v4 = vmul.f32 %v2982_v44, %v5048_v48 }
 0x9ae   : > { %v2999_v26 = vmul.f32 %v2982_v44, %v5044_v37 }
 0x9af   : > { %3028 = vst [vmem:[%s5129_s25 + $0x60] sm:$0xff] %v3012_v57  ;;  %3029 = vst [vmem:[%s5129_s25 + $0x68] sm:$0xff] %v3013_v17  ;;  %v3014_v7 = vadd.f32 %v3681_v6, %v2998_v4 }
 0x9b0   : > { %v3015_v29 = vadd.f32 %v3682_v41, %v2999_v26 }
 0x9b1   : > { %3030 = vst [vmem:[%s5129_s25 + $0x70] sm:$0xff] %v3014_v7 }
 0x9b2   : > { %3031 = vst [vmem:[%s5129_s25 + $0x78] sm:$0xff] %v3015_v29 }
 0x9b3   : > { %3711 = shalt.err (!%p3708_p2)
}
 0x9b4   : > { %s3712_s30 = scalar_lea.hbm %s5170_s20, 2048  ;;  %s3716_s26 = scalar_lea.hbm %s5273_s0, 4096 }
 0x9b5   : > { %p3713_p3 = scmp.ne.s32.totalorder %s5170_s20, %s3712_s30  ;;  %p3717_p8 = scmp.lt.u32.totalorder %s5170_s20, %s5273_s0 }
 0x9b6   : > { %p3718_p11 = scmp.lt.u32.totalorder %s3716_s26, %s3712_s30  ;;  %p3720_p10 = scmp.lt.u32.totalorder %s3712_s30, %s5170_s20 }
 0x9b7   : > { %p3714_p4 = pnand %p3713_p3, %p3909_p5 }
 0x9b8   : > { %p3719_p9 = por %p3718_p11, %p3717_p8 }
 0x9b9   : > { %p3715_p7 = pneg %p3714_p4 }
 0x9ba   : > { %p3721_p12 = por %p3720_p10, %p3719_p9 }
 0x9bc   : > { %p3722_p13 = pnand %p3721_p12, %p3715_p7 }
 0x9be   : > { %3725 = shalt.err (!%p3722_p13)
}
 0x9bf   : > { %s3774_s21 = smov 256   ;;  %s3775_s22 = smov 16  }
 0x9c0   : > { %3395 = dma.vmem_to_hbm [thread:$0]  (%p3909_p5), %s5172_s19, 2048, %s5170_s20, %s5182_s27, %s3774_s21, %s3774_s21, %s3775_s22  }
 0x9c1 PF: > { %s5274_s24 = sld [smem:[#allocation12_spill]]  ;;  %s5275_s23 = sld [smem:[#allocation10_spill]] }
 0x9c7   : > { %p3407_p0 = scmp.ge.s32.totalorder %s5274_s24, 2  ;;  %s3061_s25 = sand.u32 1, %s5275_s23  }
 0x9c8   : > { %s3062_s30 = scalar_lea.sflag [#allocation5], %s3061_s25 }
 0x9c9   : > { %p3402_p1 = pnand %p3407_p0, %p3913_p6 }
 0x9cb   : > { %3747 = dma.done.wait (!%p3402_p1), %s3062_s30, 2048  }
 0x9cc   : > { %3749 = vsyncadd (!%p3402_p1), %s3062_s30, 4294965248  ;;  %s5277_s30 = sld [smem:[#allocation13_spill]]  ;;  %s5278_s26 = sld [smem:[#allocation11_spill]] }
 0x9cd   : > { %s5279_s29 = sld [smem:[#allocation14_spill]]  ;;  %s5280_s27 = smov %s3756_s28 }
 0x9d2   : > { %p29_p2 = scmp.ge.s32.totalorder %s5277_s30, 4   ;;  %s5281_s28 = smov %s5278_s26 }
 0x9d4   :  { %31 = sbr.rel (!%p29_p2) target bundleno = 9 (0x9), region = 140 }
 0x9db   :  { %3067 = vsyncpa [#allocation5], 1 }
 0x9dc   :  { %3069 = vsyncpa [#allocation5 + $0x1], 1 }
 0x9dd   :  { %3070 = vsyncpa [#allocation6], 1 }
 0x9de   :  { %3072 = vsyncpa [#allocation6 + $0x1], 1 }

</bundles_post_ra>
